<compile_context>
chip_gen: v7x
topology: tpu7x:2x2x1
jax: 0.10.0
libtpu: 0.0.40
codegen_flags: <defaults>
</compile_context>

<pallas_src>
import functools

import jax
import jax.numpy as jnp
from jax import lax
from jax.experimental import pallas as pl
from jax.experimental.pallas import tpu as pltpu

_BN_EPS = 1e-5
_NEG_INF = -1e30
_LEAKY_SLOPE = 0.2            # GATConv default negative_slope
_MXU_DTYPE = jnp.bfloat16     # narrow MXU inputs (v5e/v6e/v7x), f32 accumulation


def _mxu_dot(a, b):
    """MXU matmul with bf16 operands and f32 accumulation."""
    return jnp.dot(a.astype(_MXU_DTYPE), b.astype(_MXU_DTYPE),
                   preferred_element_type=jnp.float32)


def _gelu(x):
    # tanh-form GELU -> a single EUP tanh instead of a VALU-heavy erf polynomial.
    c = 0.7978845608028654  # sqrt(2/pi)
    return 0.5 * x * (1.0 + jnp.tanh(c * (x + 0.044715 * x * x * x)))


# ------------------------------------------------------------------- kernel ---

def gat_topk4_kernel(a_ref, x_ref, oh_ref,
                     w1_ref, w2_ref, w3_ref, w4_ref,
                     sp_ref, lwg_ref, lwa_ref, lb_ref, o_ref, gmp_ref,
                     *, heads, hid, ratio):
    n = a_ref.shape[0]
    ng = oh_ref.shape[1]
    hdim = heads * hid

    a = a_ref[...].astype(jnp.float32)                # [N, N] upcast once (bf16 in HBM)
    x = x_ref[...]                                    # [N, Fin]
    oh = oh_ref[...]                                  # [N, G]
    sp = sp_ref[...]                                  # [24, H] packed tiny params

    # ----------------- loop-invariant tensors, hoisted ONCE (no re-emission) ----------
    ii = lax.broadcasted_iota(jnp.int32, (n, n), 0)
    jj = lax.broadcasted_iota(jnp.int32, (n, n), 1)
    eye = (ii == jj).astype(jnp.float32)
    one_m_eye = 1.0 - eye
    tie = jj < ii                                     # TopK tie-break (lower index wins)
    lane = lax.broadcasted_iota(jnp.int32, (1, hdim), 1)
    cm_list = []                                      # per-head lane masks
    for hh in range(heads):
        lo = hh * hid
        cm_list.append(jnp.logical_and(lane >= lo, lane < lo + hid).astype(jnp.float32))
    # head indicator [H, heads]: routes per-feature logit terms to their head column
    fidx = lax.broadcasted_iota(jnp.int32, (hdim, heads), 0)
    hidx = lax.broadcasted_iota(jnp.int32, (hdim, heads), 1)
    head_oh = jnp.logical_and(fidx >= hidx * hid,
                              fidx < (hidx + 1) * hid).astype(jnp.float32)
    oh_t = jnp.transpose(oh)                          # [G, N], once per call
    # graph id per node, derived in-kernel from the one-hot
    gid = jnp.sum(oh * lax.broadcasted_iota(jnp.int32, (1, ng), 1).astype(jnp.float32),
                  axis=1, keepdims=True)              # [N, 1]
    same = (gid == jnp.transpose(gid)).astype(jnp.float32)   # [N, N] same-graph mask

    m = jnp.ones((n, 1), jnp.float32)                 # live-node mask (column form)
    m_row = jnp.ones((1, n), jnp.float32)             # live-node mask (row form)

    ws = (w1_ref, w2_ref, w3_ref, w4_ref)
    z_gmp = jnp.zeros((ng, hdim), jnp.float32)        # summed global-max readouts
    z_gap = jnp.zeros((ng, hdim), jnp.float32)        # summed global-mean readouts

    for l in range(4):
        r0 = 6 * l
        att_src = sp[r0 + 0:r0 + 1, :]                # [1, H] ([heads, hid] flattened)
        att_dst = sp[r0 + 1:r0 + 2, :]
        conv_b = sp[r0 + 2:r0 + 3, :]
        gamma = sp[r0 + 3:r0 + 4, :]
        beta = sp[r0 + 4:r0 + 5, :]
        pool_w = sp[r0 + 5:r0 + 6, :]

        # ----- GATConv (multi-head, concat=True, add_self_loops=True) -----
        hfeat = _mxu_dot(x, ws[l][...])               # [N, H] = x @ W (lin, no bias)
        a_att = a * one_m_eye + eye                   # remove self loops, add fresh ones
        nbr = a_att > 0.0
        # all-head attention logits via two tiny f32 MXU matmuls + ONE transpose
        alpha_src = jnp.dot(hfeat * att_src, head_oh,
                            preferred_element_type=jnp.float32)   # [N, heads]
        alpha_dst = jnp.dot(hfeat * att_dst, head_oh,
                            preferred_element_type=jnp.float32)   # [N, heads]
        alpha_src_t = jnp.transpose(alpha_src)                    # [heads, N]

        conv = jnp.zeros((n, hdim), jnp.float32)
        for hh in range(heads):
            # e[i, j] = a_dst . W x_i  +  a_src . W x_j
            e = alpha_dst[:, hh:hh + 1] + alpha_src_t[hh:hh + 1, :]          # [N, N]
            e = jnp.where(e >= 0.0, e, _LEAKY_SLOPE * e)                     # LeakyReLU
            e = jnp.where(nbr, e, _NEG_INF)           # softmax restricted to neighbors
            e = e - jnp.max(e, axis=1, keepdims=True)
            wgt = a_att * jnp.exp(e)                  # multiplicity-weighted exp
            # TODO(synk): at N >= ~512 compute denom as an MXU matmul against a ones
            # column instead of the XLU lane reduction (v6e/v7x only have 2 XLUs).
            denom = jnp.sum(wgt, axis=1, keepdims=True)     # >= 1 (self loop at row max)
            inv_d = pl.reciprocal(denom, approx=True)       # EUP, co-issues with VALU
            # pre-scaled weights x head-masked features; 4 matmuls accumulate into conv
            conv = conv + _mxu_dot(wgt * inv_d, hfeat * cm_list[hh])
        h = conv + conv_b

        # ----- GELU + BatchNorm (training-mode batch stats over live nodes) -----
        h = _gelu(h)
        cnt = jnp.maximum(jnp.sum(m, axis=0, keepdims=True), 1.0)          # [1, 1]
        inv_cnt = pl.reciprocal(cnt, approx=True)
        mean = jnp.sum(h * m, axis=0, keepdims=True) * inv_cnt
        diff = h - mean
        var = jnp.sum(diff * diff * m, axis=0, keepdims=True) * inv_cnt
        h = gamma * (diff * lax.rsqrt(var + _BN_EPS)) + beta

        # ----- TopKPooling: score = tanh(x.w/||w||), keep top ceil(ratio*n) per graph ---
        inv_wn = lax.rsqrt(jnp.sum(pool_w * pool_w, axis=1, keepdims=True))
        s = jnp.tanh(jnp.sum(h * pool_w, axis=1, keepdims=True) * inv_wn)  # [N, 1]
        s_row = jnp.transpose(s)
        contrib = same * m_row                        # live, same-graph competitors
        beats = jnp.logical_or(
            s_row > s, jnp.logical_and(s_row == s, tie)).astype(jnp.float32)
        rank = jnp.sum(contrib * beats, axis=1, keepdims=True)             # [N, 1]
        n_graph = jnp.sum(contrib, axis=1, keepdims=True)
        k = jnp.ceil(ratio * n_graph)
        keep = m * (rank < k).astype(jnp.float32)
        keep_row = jnp.transpose(keep)                # [1, N]
        x = h * s * keep                              # x[perm] * score[perm]
        a = a * keep * keep_row                       # filter_adj
        m = keep
        m_row = keep_row

        # ----- per-graph readout [gmp | gap] -----
        sel = oh * keep                               # [N, G] column masks for gmp
        sel_t = oh_t * keep_row                       # [G, N] (no per-layer transpose)
        cnt_g = jnp.sum(sel_t, axis=1, keepdims=True)                      # [G, 1]
        inv_cg = pl.reciprocal(jnp.maximum(cnt_g, 1.0), approx=True)
        gap = jnp.dot(sel_t, x, preferred_element_type=jnp.float32) * inv_cg
        for gg in range(ng):
            col = sel[:, gg:gg + 1]                   # [N, 1]
            row = jnp.max(jnp.where(col > 0.0, x, _NEG_INF), axis=0, keepdims=True)
            gmp_ref[gg:gg + 1, :] = row               # write straight into [G,H] scratch
        gmp = jnp.where(cnt_g > 0.0, gmp_ref[...], 0.0)      # empty-graph guard
        z_gmp = z_gmp + gmp
        z_gap = z_gap + gap

    # ----- final Linear on the summed readouts (cat([gmp, gap]) @ W == split matmuls) ---
    o_ref[...] = (_mxu_dot(z_gmp, lwg_ref[...]) + _mxu_dot(z_gap, lwa_ref[...])
                  + lb_ref[...])


# ------------------------------------------------------------------ wrapper ---

_VMEM = pl.BlockSpec(memory_space=pltpu.MemorySpace.VMEM)


def gat_topk4_forward(x, edge_index, batch, params, *, num_graphs, heads, hid,
                      ratio=0.5):
    n = x.shape[0]
    hdim = heads * hid
    out_f = params["linear"]["w"].shape[1]

    # glue (plain XLA, outside the kernel): dense adjacency A[dst, src] += 1 (stored bf16:
    # exact for multiplicities <= 256, half the DMA / resident VMEM) and the one-hot graph
    # membership.  NOTE: data.edge_attr only rides through TopKPooling.filter_adj in the
    # reference module and never enters the math, so it is not represented.
    a = jnp.zeros((n, n), jnp.float32).at[edge_index[1], edge_index[0]].add(1.0)
    a = a.astype(jnp.bfloat16)
    onehot = (batch[:, None] ==
              jnp.arange(num_graphs, dtype=batch.dtype)[None, :]).astype(jnp.float32)

    # pack all tiny per-layer params into a single [24, H] VMEM slab
    rows = []
    for i in range(1, 5):
        c, b, p = params[f"conv{i}"], params[f"bn{i}"], params[f"pool{i}"]
        rows += [c["att_src"], c["att_dst"], c["bias"], b["gamma"], b["beta"], p["w"]]
    small = jnp.concatenate(rows, axis=0)                       # [24, H]
    lin_w_gmp = params["linear"]["w"][:hdim, :]                 # split -> no in-kernel concat
    lin_w_gap = params["linear"]["w"][hdim:, :]

    kern = functools.partial(gat_topk4_kernel, heads=heads, hid=hid, ratio=ratio)
    # Single fused, gridless pallas_call: all intermediates (h, A, mask, readouts) stay on
    # chip, so there are no per-layer HBM round-trips.
    # TODO(synk): for large N (v5e/v6e ~1.5-2k, v7x ~0.5-1k with its 64 MiB VMEM) tile the
    # [N,N] attention/TopK blocks into row panels via pltpu.emit_pipeline and split the
    # head/feature axis 2+2 across the second v7x TensorCore (BN stats are per-feature, so
    # a feature split preserves semantics); whole-array residency is intentional here.
    return pl.pallas_call(
        kern,
        out_shape=jax.ShapeDtypeStruct((num_graphs, out_f), jnp.float32),
        in_specs=[_VMEM] * 11,
        out_specs=_VMEM,
        scratch_shapes=[pltpu.VMEM((num_graphs, hdim), jnp.float32)],
        compiler_params=pltpu.CompilerParams(vmem_limit_bytes=64 * 1024 * 1024),
    )(a, x, onehot,
      params["conv1"]["w"], params["conv2"]["w"], params["conv3"]["w"],
      params["conv4"]["w"], small, lin_w_gmp, lin_w_gap, params["linear"]["b"])


# ------------------------------------------------------------------- params ---

def init_params(key, in_features, hidden, heads, out_features):
    hdim = hidden * heads
    keys = jax.random.split(key, 24)

    def nrm(k, shape, scale):
        return scale * jax.random.normal(k, shape, jnp.float32)

    params = {}
    fin = in_features
    ki = 0
    for i in range(1, 5):
        params[f"conv{i}"] = {
            "w": nrm(keys[ki + 0], (fin, hdim), 0.2),         # GATConv.lin (no bias)
            "att_src": nrm(keys[ki + 1], (1, hdim), 0.3),     # att_src [heads, hid] flat
            "att_dst": nrm(keys[ki + 2], (1, hdim), 0.3),     # att_dst [heads, hid] flat
            "bias": nrm(keys[ki + 3], (1, hdim), 0.05),       # GATConv.bias (concat)
        }
        params[f"bn{i}"] = {
            "gamma": jnp.ones((1, hdim), jnp.float32),
            "beta": jnp.zeros((1, hdim), jnp.float32),
        }
        params[f"pool{i}"] = {"w": nrm(keys[ki + 4], (1, hdim), 0.5)}  # TopKPooling.weight
        fin = hdim
        ki += 5
    params["linear"] = {
        "w": nrm(keys[20], (2 * hdim, out_features), 0.2),
        "b": nrm(keys[21], (1, out_features), 0.05),
    }
    return params


if __name__ == "__main__":
    N, G, F_IN, HIDDEN, HEADS, OUT, E_PER_GRAPH = 16, 2, 16, 8, 4, 32, 24
    root = jax.random.PRNGKey(0)
    kx, ks, kd, kp = jax.random.split(root, 4)

    x = jax.random.normal(kx, (N, F_IN), jnp.float32)
    npg = N // G
    batch = jnp.repeat(jnp.arange(G, dtype=jnp.int32), npg)
    # deterministic random intra-graph directed edges
    src = jax.random.randint(ks, (G, E_PER_GRAPH), 0, npg)
    dst = jax.random.randint(kd, (G, E_PER_GRAPH), 0, npg)
    offs = (jnp.arange(G, dtype=jnp.int32) * npg)[:, None]
    edge_index = jnp.stack([(src + offs).reshape(-1),
                            (dst + offs).reshape(-1)]).astype(jnp.int32)

    params = init_params(kp, F_IN, HIDDEN, HEADS, OUT)

    fwd = jax.jit(functools.partial(gat_topk4_forward, num_graphs=G,
                                    heads=HEADS, hid=HIDDEN, ratio=0.5))
    out = fwd(x, edge_index, batch, params)
    jax.block_until_ready(out)
    assert out.shape == (G, OUT)
    print("KERNEL_OK")
</pallas_src>

<mosaic_0001>
module attributes {stable_mosaic.version = 11 : i64} {
  func.func private @main(%arg0: i32) attributes {dimension_semantics = [#tpu.dimension_semantics<core_parallel>], iteration_bounds = array<i64: 2>, tpu.core_type = #tpu.core_type<sc_scalar_subcore>, window_params = []} {
    return
  }
}

module attributes {stable_mosaic.version = 11 : i64} {
  func.func private @main(%arg0: i32) attributes {dimension_semantics = [#tpu.dimension_semantics<core_parallel>], iteration_bounds = array<i64: 2>, tpu.core_type = #tpu.core_type<sc_scalar_subcore>, window_params = []} {
    return
  }
}

module attributes {stable_mosaic.version = 11 : i64} {
  func.func @gat_topk4_kernel(%arg0: memref<16x16xbf16, #tpu.memory_space<vmem>>, %arg1: memref<16x16xf32, #tpu.memory_space<vmem>>, %arg2: memref<16x2xf32, #tpu.memory_space<vmem>>, %arg3: memref<16x32xf32, #tpu.memory_space<vmem>>, %arg4: memref<32x32xf32, #tpu.memory_space<vmem>>, %arg5: memref<32x32xf32, #tpu.memory_space<vmem>>, %arg6: memref<32x32xf32, #tpu.memory_space<vmem>>, %arg7: memref<24x32xf32, #tpu.memory_space<vmem>>, %arg8: memref<32x32xf32, #tpu.memory_space<vmem>>, %arg9: memref<32x32xf32, #tpu.memory_space<vmem>>, %arg10: memref<1x32xf32, #tpu.memory_space<vmem>>, %arg11: memref<2x32xf32, #tpu.memory_space<vmem>>, %arg12: memref<2x32xf32, #tpu.memory_space<vmem>>) attributes {dimension_semantics = [], scalar_prefetch = 0 : i64, scratch_operands = 1 : i64, tpu.core_type = #tpu.core_type<tc>} {
    %c0 = arith.constant 0 : index
    %c0_0 = arith.constant 0 : index
    %0 = vector.load %arg0[%c0, %c0_0] : memref<16x16xbf16, #tpu.memory_space<vmem>>, vector<16x16xbf16>
    %1 = arith.extf %0 : vector<16x16xbf16> to vector<16x16xf32>
    %c0_1 = arith.constant 0 : index
    %c0_2 = arith.constant 0 : index
    %2 = vector.load %arg1[%c0_1, %c0_2] : memref<16x16xf32, #tpu.memory_space<vmem>>, vector<16x16xf32>
    %c0_3 = arith.constant 0 : index
    %c0_4 = arith.constant 0 : index
    %3 = vector.load %arg2[%c0_3, %c0_4] : memref<16x2xf32, #tpu.memory_space<vmem>>, vector<16x2xf32>
    %c0_5 = arith.constant 0 : index
    %c0_6 = arith.constant 0 : index
    %4 = vector.load %arg7[%c0_5, %c0_6] : memref<24x32xf32, #tpu.memory_space<vmem>>, vector<24x32xf32>
    %5 = tpu.iota {dimensions = array<i32: 0>} : vector<16x16xi32>
    %6 = tpu.iota {dimensions = array<i32: 1>} : vector<16x16xi32>
    %7 = arith.cmpi eq, %5, %6 : vector<16x16xi32>
    %8 = arith.extui %7 : vector<16x16xi1> to vector<16x16xi32>
    %9 = arith.sitofp %8 : vector<16x16xi32> to vector<16x16xf32>
    %cst = arith.constant 1.000000e+00 : f32
    %10 = vector.broadcast %cst : f32 to vector<16x16xf32>
    %11 = arith.subf %10, %9 : vector<16x16xf32>
    %12 = arith.cmpi slt, %6, %5 : vector<16x16xi32>
    %13 = tpu.iota {dimensions = array<i32: 1>} : vector<1x32xi32>
    %c0_i32 = arith.constant 0 : i32
    %14 = vector.broadcast %c0_i32 : i32 to vector<1x32xi32>
    %15 = arith.cmpi sge, %13, %14 : vector<1x32xi32>
    %c8_i32 = arith.constant 8 : i32
    %16 = vector.broadcast %c8_i32 : i32 to vector<1x32xi32>
    %17 = arith.cmpi slt, %13, %16 : vector<1x32xi32>
    %18 = arith.andi %15, %17 : vector<1x32xi1>
    %19 = arith.extui %18 : vector<1x32xi1> to vector<1x32xi32>
    %20 = arith.sitofp %19 : vector<1x32xi32> to vector<1x32xf32>
    %c8_i32_7 = arith.constant 8 : i32
    %21 = vector.broadcast %c8_i32_7 : i32 to vector<1x32xi32>
    %22 = arith.cmpi sge, %13, %21 : vector<1x32xi32>
    %c16_i32 = arith.constant 16 : i32
    %23 = vector.broadcast %c16_i32 : i32 to vector<1x32xi32>
    %24 = arith.cmpi slt, %13, %23 : vector<1x32xi32>
    %25 = arith.andi %22, %24 : vector<1x32xi1>
    %26 = arith.extui %25 : vector<1x32xi1> to vector<1x32xi32>
    %27 = arith.sitofp %26 : vector<1x32xi32> to vector<1x32xf32>
    %c16_i32_8 = arith.constant 16 : i32
    %28 = vector.broadcast %c16_i32_8 : i32 to vector<1x32xi32>
    %29 = arith.cmpi sge, %13, %28 : vector<1x32xi32>
    %c24_i32 = arith.constant 24 : i32
    %30 = vector.broadcast %c24_i32 : i32 to vector<1x32xi32>
    %31 = arith.cmpi slt, %13, %30 : vector<1x32xi32>
    %32 = arith.andi %29, %31 : vector<1x32xi1>
    %33 = arith.extui %32 : vector<1x32xi1> to vector<1x32xi32>
    %34 = arith.sitofp %33 : vector<1x32xi32> to vector<1x32xf32>
    %c24_i32_9 = arith.constant 24 : i32
    %35 = vector.broadcast %c24_i32_9 : i32 to vector<1x32xi32>
    %36 = arith.cmpi sge, %13, %35 : vector<1x32xi32>
    %c32_i32 = arith.constant 32 : i32
    %37 = vector.broadcast %c32_i32 : i32 to vector<1x32xi32>
    %38 = arith.cmpi slt, %13, %37 : vector<1x32xi32>
    %39 = arith.andi %36, %38 : vector<1x32xi1>
    %40 = arith.extui %39 : vector<1x32xi1> to vector<1x32xi32>
    %41 = arith.sitofp %40 : vector<1x32xi32> to vector<1x32xf32>
    %42 = tpu.iota {dimensions = array<i32: 0>} : vector<32x4xi32>
    %43 = tpu.iota {dimensions = array<i32: 1>} : vector<32x4xi32>
    %c8_i32_10 = arith.constant 8 : i32
    %44 = vector.broadcast %c8_i32_10 : i32 to vector<32x4xi32>
    %45 = arith.muli %43, %44 : vector<32x4xi32>
    %46 = arith.cmpi sge, %42, %45 : vector<32x4xi32>
    %c1_i32 = arith.constant 1 : i32
    %47 = vector.broadcast %c1_i32 : i32 to vector<32x4xi32>
    %48 = arith.addi %43, %47 : vector<32x4xi32>
    %c8_i32_11 = arith.constant 8 : i32
    %49 = vector.broadcast %c8_i32_11 : i32 to vector<32x4xi32>
    %50 = arith.muli %48, %49 : vector<32x4xi32>
    %51 = arith.cmpi slt, %42, %50 : vector<32x4xi32>
    %52 = arith.andi %46, %51 : vector<32x4xi1>
    %53 = arith.extui %52 : vector<32x4xi1> to vector<32x4xi32>
    %54 = arith.sitofp %53 : vector<32x4xi32> to vector<32x4xf32>
    %55 = tpu.transpose %3, [1, 0] : vector<16x2xf32> -> vector<2x16xf32>
    %56 = tpu.iota {dimensions = array<i32: 1>} : vector<1x2xi32>
    %57 = arith.sitofp %56 : vector<1x2xi32> to vector<1x2xf32>
    %58 = vector.broadcast %57 : vector<1x2xf32> to vector<16x2xf32>
    %59 = arith.mulf %3, %58 : vector<16x2xf32>
    %cst_12 = arith.constant dense<0.000000e+00> : vector<16xf32>
    %60 = vector.multi_reduction <add>, %59, %cst_12 [1] : vector<16x2xf32> to vector<16xf32>
    %61 = vector.shape_cast %60 : vector<16xf32> to vector<16x1xf32>
    %62 = tpu.transpose %61, [1, 0] : vector<16x1xf32> -> vector<1x16xf32>
    %63 = vector.broadcast %61 : vector<16x1xf32> to vector<16x16xf32>
    %64 = vector.broadcast %62 : vector<1x16xf32> to vector<16x16xf32>
    %65 = arith.cmpf oeq, %63, %64 : vector<16x16xf32>
    %66 = arith.extui %65 : vector<16x16xi1> to vector<16x16xi32>
    %67 = arith.sitofp %66 : vector<16x16xi32> to vector<16x16xf32>
    %cst_13 = arith.constant 1.000000e+00 : f32
    %68 = vector.broadcast %cst_13 : f32 to vector<16x1xf32>
    %cst_14 = arith.constant 1.000000e+00 : f32
    %69 = vector.broadcast %cst_14 : f32 to vector<1x16xf32>
    %cst_15 = arith.constant 0.000000e+00 : f32
    %70 = vector.broadcast %cst_15 : f32 to vector<2x32xf32>
    %cst_16 = arith.constant 0.000000e+00 : f32
    %71 = vector.broadcast %cst_16 : f32 to vector<2x32xf32>
    %72 = vector.extract_strided_slice %4 {offsets = [0, 0], sizes = [1, 32], strides = [1, 1]} : vector<24x32xf32> to vector<1x32xf32>
    %73 = vector.extract_strided_slice %4 {offsets = [1, 0], sizes = [1, 32], strides = [1, 1]} : vector<24x32xf32> to vector<1x32xf32>
    %74 = vector.extract_strided_slice %4 {offsets = [2, 0], sizes = [1, 32], strides = [1, 1]} : vector<24x32xf32> to vector<1x32xf32>
    %75 = vector.extract_strided_slice %4 {offsets = [3, 0], sizes = [1, 32], strides = [1, 1]} : vector<24x32xf32> to vector<1x32xf32>
    %76 = vector.extract_strided_slice %4 {offsets = [4, 0], sizes = [1, 32], strides = [1, 1]} : vector<24x32xf32> to vector<1x32xf32>
    %77 = vector.extract_strided_slice %4 {offsets = [5, 0], sizes = [1, 32], strides = [1, 1]} : vector<24x32xf32> to vector<1x32xf32>
    %c0_17 = arith.constant 0 : index
    %c0_18 = arith.constant 0 : index
    %78 = vector.load %arg3[%c0_17, %c0_18] : memref<16x32xf32, #tpu.memory_space<vmem>>, vector<16x32xf32>
    %79 = arith.truncf %2 : vector<16x16xf32> to vector<16x16xbf16>
    %80 = arith.truncf %78 : vector<16x32xf32> to vector<16x32xbf16>
    %cst_19 = arith.constant dense<0.000000e+00> : vector<16x32xf32>
    %81 = tpu.matmul %79, %80, %cst_19 {dimension_numbers = #tpu.dot_dimension_numbers<[1], [0], [0], [1], [0, 0, 1, 1], [], []>} : vector<16x16xbf16>, vector<16x32xbf16>, vector<16x32xf32> -> vector<16x32xf32>
    %82 = arith.mulf %1, %11 : vector<16x16xf32>
    %83 = arith.addf %82, %9 : vector<16x16xf32>
    %cst_20 = arith.constant 0.000000e+00 : f32
    %84 = vector.broadcast %cst_20 : f32 to vector<16x16xf32>
    %85 = arith.cmpf ogt, %83, %84 : vector<16x16xf32>
    %86 = vector.broadcast %72 : vector<1x32xf32> to vector<16x32xf32>
    %87 = arith.mulf %81, %86 : vector<16x32xf32>
    %cst_21 = arith.constant dense<0.000000e+00> : vector<16x4xf32>
    %88 = tpu.matmul %87, %54, %cst_21 {dimension_numbers = #tpu.dot_dimension_numbers<[1], [0], [0], [1], [0, 0, 1, 1], [], []>} : vector<16x32xf32>, vector<32x4xf32>, vector<16x4xf32> -> vector<16x4xf32>
    %89 = vector.broadcast %73 : vector<1x32xf32> to vector<16x32xf32>
    %90 = arith.mulf %81, %89 : vector<16x32xf32>
    %cst_22 = arith.constant dense<0.000000e+00> : vector<16x4xf32>
    %91 = tpu.matmul %90, %54, %cst_22 {dimension_numbers = #tpu.dot_dimension_numbers<[1], [0], [0], [1], [0, 0, 1, 1], [], []>} : vector<16x32xf32>, vector<32x4xf32>, vector<16x4xf32> -> vector<16x4xf32>
    %92 = tpu.transpose %88, [1, 0] : vector<16x4xf32> -> vector<4x16xf32>
    %cst_23 = arith.constant 0.000000e+00 : f32
    %93 = vector.broadcast %cst_23 : f32 to vector<16x32xf32>
    %94 = vector.extract_strided_slice %91 {offsets = [0, 0], sizes = [16, 1], strides = [1, 1]} : vector<16x4xf32> to vector<16x1xf32>
    %95 = vector.extract_strided_slice %92 {offsets = [0, 0], sizes = [1, 16], strides = [1, 1]} : vector<4x16xf32> to vector<1x16xf32>
    %96 = vector.broadcast %94 : vector<16x1xf32> to vector<16x16xf32>
    %97 = vector.broadcast %95 : vector<1x16xf32> to vector<16x16xf32>
    %98 = arith.addf %96, %97 : vector<16x16xf32>
    %cst_24 = arith.constant 0.000000e+00 : f32
    %99 = vector.broadcast %cst_24 : f32 to vector<16x16xf32>
    %100 = arith.cmpf oge, %98, %99 : vector<16x16xf32>
    %cst_25 = arith.constant 2.000000e-01 : f32
    %101 = vector.broadcast %cst_25 : f32 to vector<16x16xf32>
    %102 = arith.mulf %101, %98 : vector<16x16xf32>
    %103 = arith.select %100, %98, %102 : vector<16x16xi1>, vector<16x16xf32>
    %cst_26 = arith.constant -1.000000e+30 : f32
    %104 = vector.broadcast %cst_26 : f32 to vector<16x16xf32>
    %105 = arith.select %85, %103, %104 : vector<16x16xi1>, vector<16x16xf32>
    %cst_27 = arith.constant dense<0xFF800000> : vector<16xf32>
    %106 = vector.multi_reduction <maximumf>, %105, %cst_27 [1] : vector<16x16xf32> to vector<16xf32>
    %107 = vector.shape_cast %106 : vector<16xf32> to vector<16x1xf32>
    %108 = vector.broadcast %107 : vector<16x1xf32> to vector<16x16xf32>
    %109 = arith.subf %105, %108 : vector<16x16xf32>
    %110 = math.exp %109 : vector<16x16xf32>
    %111 = arith.mulf %83, %110 : vector<16x16xf32>
    %cst_28 = arith.constant dense<0.000000e+00> : vector<16xf32>
    %112 = vector.multi_reduction <add>, %111, %cst_28 [1] : vector<16x16xf32> to vector<16xf32>
    %113 = vector.shape_cast %112 : vector<16xf32> to vector<16x1xf32>
    %114 = tpu.reciprocal %113 {approx = true} : vector<16x1xf32> -> vector<16x1xf32>
    %115 = vector.broadcast %114 : vector<16x1xf32> to vector<16x16xf32>
    %116 = arith.mulf %111, %115 : vector<16x16xf32>
    %117 = vector.broadcast %20 : vector<1x32xf32> to vector<16x32xf32>
    %118 = arith.mulf %81, %117 : vector<16x32xf32>
    %119 = arith.truncf %116 : vector<16x16xf32> to vector<16x16xbf16>
    %120 = arith.truncf %118 : vector<16x32xf32> to vector<16x32xbf16>
    %cst_29 = arith.constant dense<0.000000e+00> : vector<16x32xf32>
    %121 = tpu.matmul %119, %120, %cst_29 {dimension_numbers = #tpu.dot_dimension_numbers<[1], [0], [0], [1], [0, 0, 1, 1], [], []>} : vector<16x16xbf16>, vector<16x32xbf16>, vector<16x32xf32> -> vector<16x32xf32>
    %122 = arith.addf %93, %121 : vector<16x32xf32>
    %123 = vector.extract_strided_slice %91 {offsets = [0, 1], sizes = [16, 1], strides = [1, 1]} : vector<16x4xf32> to vector<16x1xf32>
    %124 = vector.extract_strided_slice %92 {offsets = [1, 0], sizes = [1, 16], strides = [1, 1]} : vector<4x16xf32> to vector<1x16xf32>
    %125 = vector.broadcast %123 : vector<16x1xf32> to vector<16x16xf32>
    %126 = vector.broadcast %124 : vector<1x16xf32> to vector<16x16xf32>
    %127 = arith.addf %125, %126 : vector<16x16xf32>
    %cst_30 = arith.constant 0.000000e+00 : f32
    %128 = vector.broadcast %cst_30 : f32 to vector<16x16xf32>
    %129 = arith.cmpf oge, %127, %128 : vector<16x16xf32>
    %cst_31 = arith.constant 2.000000e-01 : f32
    %130 = vector.broadcast %cst_31 : f32 to vector<16x16xf32>
    %131 = arith.mulf %130, %127 : vector<16x16xf32>
    %132 = arith.select %129, %127, %131 : vector<16x16xi1>, vector<16x16xf32>
    %cst_32 = arith.constant -1.000000e+30 : f32
    %133 = vector.broadcast %cst_32 : f32 to vector<16x16xf32>
    %134 = arith.select %85, %132, %133 : vector<16x16xi1>, vector<16x16xf32>
    %cst_33 = arith.constant dense<0xFF800000> : vector<16xf32>
    %135 = vector.multi_reduction <maximumf>, %134, %cst_33 [1] : vector<16x16xf32> to vector<16xf32>
    %136 = vector.shape_cast %135 : vector<16xf32> to vector<16x1xf32>
    %137 = vector.broadcast %136 : vector<16x1xf32> to vector<16x16xf32>
    %138 = arith.subf %134, %137 : vector<16x16xf32>
    %139 = math.exp %138 : vector<16x16xf32>
    %140 = arith.mulf %83, %139 : vector<16x16xf32>
    %cst_34 = arith.constant dense<0.000000e+00> : vector<16xf32>
    %141 = vector.multi_reduction <add>, %140, %cst_34 [1] : vector<16x16xf32> to vector<16xf32>
    %142 = vector.shape_cast %141 : vector<16xf32> to vector<16x1xf32>
    %143 = tpu.reciprocal %142 {approx = true} : vector<16x1xf32> -> vector<16x1xf32>
    %144 = vector.broadcast %143 : vector<16x1xf32> to vector<16x16xf32>
    %145 = arith.mulf %140, %144 : vector<16x16xf32>
    %146 = vector.broadcast %27 : vector<1x32xf32> to vector<16x32xf32>
    %147 = arith.mulf %81, %146 : vector<16x32xf32>
    %148 = arith.truncf %145 : vector<16x16xf32> to vector<16x16xbf16>
    %149 = arith.truncf %147 : vector<16x32xf32> to vector<16x32xbf16>
    %cst_35 = arith.constant dense<0.000000e+00> : vector<16x32xf32>
    %150 = tpu.matmul %148, %149, %cst_35 {dimension_numbers = #tpu.dot_dimension_numbers<[1], [0], [0], [1], [0, 0, 1, 1], [], []>} : vector<16x16xbf16>, vector<16x32xbf16>, vector<16x32xf32> -> vector<16x32xf32>
    %151 = arith.addf %122, %150 : vector<16x32xf32>
    %152 = vector.extract_strided_slice %91 {offsets = [0, 2], sizes = [16, 1], strides = [1, 1]} : vector<16x4xf32> to vector<16x1xf32>
    %153 = vector.extract_strided_slice %92 {offsets = [2, 0], sizes = [1, 16], strides = [1, 1]} : vector<4x16xf32> to vector<1x16xf32>
    %154 = vector.broadcast %152 : vector<16x1xf32> to vector<16x16xf32>
    %155 = vector.broadcast %153 : vector<1x16xf32> to vector<16x16xf32>
    %156 = arith.addf %154, %155 : vector<16x16xf32>
    %cst_36 = arith.constant 0.000000e+00 : f32
    %157 = vector.broadcast %cst_36 : f32 to vector<16x16xf32>
    %158 = arith.cmpf oge, %156, %157 : vector<16x16xf32>
    %cst_37 = arith.constant 2.000000e-01 : f32
    %159 = vector.broadcast %cst_37 : f32 to vector<16x16xf32>
    %160 = arith.mulf %159, %156 : vector<16x16xf32>
    %161 = arith.select %158, %156, %160 : vector<16x16xi1>, vector<16x16xf32>
    %cst_38 = arith.constant -1.000000e+30 : f32
    %162 = vector.broadcast %cst_38 : f32 to vector<16x16xf32>
    %163 = arith.select %85, %161, %162 : vector<16x16xi1>, vector<16x16xf32>
    %cst_39 = arith.constant dense<0xFF800000> : vector<16xf32>
    %164 = vector.multi_reduction <maximumf>, %163, %cst_39 [1] : vector<16x16xf32> to vector<16xf32>
    %165 = vector.shape_cast %164 : vector<16xf32> to vector<16x1xf32>
    %166 = vector.broadcast %165 : vector<16x1xf32> to vector<16x16xf32>
    %167 = arith.subf %163, %166 : vector<16x16xf32>
    %168 = math.exp %167 : vector<16x16xf32>
    %169 = arith.mulf %83, %168 : vector<16x16xf32>
    %cst_40 = arith.constant dense<0.000000e+00> : vector<16xf32>
    %170 = vector.multi_reduction <add>, %169, %cst_40 [1] : vector<16x16xf32> to vector<16xf32>
    %171 = vector.shape_cast %170 : vector<16xf32> to vector<16x1xf32>
    %172 = tpu.reciprocal %171 {approx = true} : vector<16x1xf32> -> vector<16x1xf32>
    %173 = vector.broadcast %172 : vector<16x1xf32> to vector<16x16xf32>
    %174 = arith.mulf %169, %173 : vector<16x16xf32>
    %175 = vector.broadcast %34 : vector<1x32xf32> to vector<16x32xf32>
    %176 = arith.mulf %81, %175 : vector<16x32xf32>
    %177 = arith.truncf %174 : vector<16x16xf32> to vector<16x16xbf16>
    %178 = arith.truncf %176 : vector<16x32xf32> to vector<16x32xbf16>
    %cst_41 = arith.constant dense<0.000000e+00> : vector<16x32xf32>
    %179 = tpu.matmul %177, %178, %cst_41 {dimension_numbers = #tpu.dot_dimension_numbers<[1], [0], [0], [1], [0, 0, 1, 1], [], []>} : vector<16x16xbf16>, vector<16x32xbf16>, vector<16x32xf32> -> vector<16x32xf32>
    %180 = arith.addf %151, %179 : vector<16x32xf32>
    %181 = vector.extract_strided_slice %91 {offsets = [0, 3], sizes = [16, 1], strides = [1, 1]} : vector<16x4xf32> to vector<16x1xf32>
    %182 = vector.extract_strided_slice %92 {offsets = [3, 0], sizes = [1, 16], strides = [1, 1]} : vector<4x16xf32> to vector<1x16xf32>
    %183 = vector.broadcast %181 : vector<16x1xf32> to vector<16x16xf32>
    %184 = vector.broadcast %182 : vector<1x16xf32> to vector<16x16xf32>
    %185 = arith.addf %183, %184 : vector<16x16xf32>
    %cst_42 = arith.constant 0.000000e+00 : f32
    %186 = vector.broadcast %cst_42 : f32 to vector<16x16xf32>
    %187 = arith.cmpf oge, %185, %186 : vector<16x16xf32>
    %cst_43 = arith.constant 2.000000e-01 : f32
    %188 = vector.broadcast %cst_43 : f32 to vector<16x16xf32>
    %189 = arith.mulf %188, %185 : vector<16x16xf32>
    %190 = arith.select %187, %185, %189 : vector<16x16xi1>, vector<16x16xf32>
    %cst_44 = arith.constant -1.000000e+30 : f32
    %191 = vector.broadcast %cst_44 : f32 to vector<16x16xf32>
    %192 = arith.select %85, %190, %191 : vector<16x16xi1>, vector<16x16xf32>
    %cst_45 = arith.constant dense<0xFF800000> : vector<16xf32>
    %193 = vector.multi_reduction <maximumf>, %192, %cst_45 [1] : vector<16x16xf32> to vector<16xf32>
    %194 = vector.shape_cast %193 : vector<16xf32> to vector<16x1xf32>
    %195 = vector.broadcast %194 : vector<16x1xf32> to vector<16x16xf32>
    %196 = arith.subf %192, %195 : vector<16x16xf32>
    %197 = math.exp %196 : vector<16x16xf32>
    %198 = arith.mulf %83, %197 : vector<16x16xf32>
    %cst_46 = arith.constant dense<0.000000e+00> : vector<16xf32>
    %199 = vector.multi_reduction <add>, %198, %cst_46 [1] : vector<16x16xf32> to vector<16xf32>
    %200 = vector.shape_cast %199 : vector<16xf32> to vector<16x1xf32>
    %201 = tpu.reciprocal %200 {approx = true} : vector<16x1xf32> -> vector<16x1xf32>
    %202 = vector.broadcast %201 : vector<16x1xf32> to vector<16x16xf32>
    %203 = arith.mulf %198, %202 : vector<16x16xf32>
    %204 = vector.broadcast %41 : vector<1x32xf32> to vector<16x32xf32>
    %205 = arith.mulf %81, %204 : vector<16x32xf32>
    %206 = arith.truncf %203 : vector<16x16xf32> to vector<16x16xbf16>
    %207 = arith.truncf %205 : vector<16x32xf32> to vector<16x32xbf16>
    %cst_47 = arith.constant dense<0.000000e+00> : vector<16x32xf32>
    %208 = tpu.matmul %206, %207, %cst_47 {dimension_numbers = #tpu.dot_dimension_numbers<[1], [0], [0], [1], [0, 0, 1, 1], [], []>} : vector<16x16xbf16>, vector<16x32xbf16>, vector<16x32xf32> -> vector<16x32xf32>
    %209 = arith.addf %180, %208 : vector<16x32xf32>
    %210 = vector.broadcast %74 : vector<1x32xf32> to vector<16x32xf32>
    %211 = arith.addf %209, %210 : vector<16x32xf32>
    %cst_48 = arith.constant 5.000000e-01 : f32
    %212 = vector.broadcast %cst_48 : f32 to vector<16x32xf32>
    %213 = arith.mulf %212, %211 : vector<16x32xf32>
    %cst_49 = arith.constant 4.471500e-02 : f32
    %214 = vector.broadcast %cst_49 : f32 to vector<16x32xf32>
    %215 = arith.mulf %214, %211 : vector<16x32xf32>
    %216 = arith.mulf %215, %211 : vector<16x32xf32>
    %217 = arith.mulf %216, %211 : vector<16x32xf32>
    %218 = arith.addf %211, %217 : vector<16x32xf32>
    %cst_50 = arith.constant 0.797884583 : f32
    %219 = vector.broadcast %cst_50 : f32 to vector<16x32xf32>
    %220 = arith.mulf %219, %218 : vector<16x32xf32>
    %221 = math.tanh %220 : vector<16x32xf32>
    %cst_51 = arith.constant 1.000000e+00 : f32
    %222 = vector.broadcast %cst_51 : f32 to vector<16x32xf32>
    %223 = arith.addf %222, %221 : vector<16x32xf32>
    %224 = arith.mulf %213, %223 : vector<16x32xf32>
    %cst_52 = arith.constant dense<0.000000e+00> : vector<1xf32>
    %225 = vector.multi_reduction <add>, %68, %cst_52 [0] : vector<16x1xf32> to vector<1xf32>
    %226 = vector.shape_cast %225 : vector<1xf32> to vector<1x1xf32>
    %cst_53 = arith.constant 1.000000e+00 : f32
    %227 = vector.broadcast %cst_53 : f32 to vector<1x1xf32>
    %228 = arith.maximumf %226, %227 : vector<1x1xf32>
    %229 = tpu.reciprocal %228 {approx = true} : vector<1x1xf32> -> vector<1x1xf32>
    %230 = vector.broadcast %68 : vector<16x1xf32> to vector<16x32xf32>
    %231 = arith.mulf %224, %230 : vector<16x32xf32>
    %cst_54 = arith.constant dense<0.000000e+00> : vector<32xf32>
    %232 = vector.multi_reduction <add>, %231, %cst_54 [0] : vector<16x32xf32> to vector<32xf32>
    %233 = vector.shape_cast %232 : vector<32xf32> to vector<1x32xf32>
    %234 = vector.broadcast %229 : vector<1x1xf32> to vector<1x32xf32>
    %235 = arith.mulf %233, %234 : vector<1x32xf32>
    %236 = vector.broadcast %235 : vector<1x32xf32> to vector<16x32xf32>
    %237 = arith.subf %224, %236 : vector<16x32xf32>
    %238 = arith.mulf %237, %237 : vector<16x32xf32>
    %239 = vector.broadcast %68 : vector<16x1xf32> to vector<16x32xf32>
    %240 = arith.mulf %238, %239 : vector<16x32xf32>
    %cst_55 = arith.constant dense<0.000000e+00> : vector<32xf32>
    %241 = vector.multi_reduction <add>, %240, %cst_55 [0] : vector<16x32xf32> to vector<32xf32>
    %242 = vector.shape_cast %241 : vector<32xf32> to vector<1x32xf32>
    %243 = vector.broadcast %229 : vector<1x1xf32> to vector<1x32xf32>
    %244 = arith.mulf %242, %243 : vector<1x32xf32>
    %cst_56 = arith.constant 9.99999974E-6 : f32
    %245 = vector.broadcast %cst_56 : f32 to vector<1x32xf32>
    %246 = arith.addf %244, %245 : vector<1x32xf32>
    %247 = math.rsqrt %246 : vector<1x32xf32>
    %248 = vector.broadcast %247 : vector<1x32xf32> to vector<16x32xf32>
    %249 = arith.mulf %237, %248 : vector<16x32xf32>
    %250 = vector.broadcast %75 : vector<1x32xf32> to vector<16x32xf32>
    %251 = arith.mulf %250, %249 : vector<16x32xf32>
    %252 = vector.broadcast %76 : vector<1x32xf32> to vector<16x32xf32>
    %253 = arith.addf %251, %252 : vector<16x32xf32>
    %254 = arith.mulf %77, %77 : vector<1x32xf32>
    %cst_57 = arith.constant dense<0.000000e+00> : vector<1xf32>
    %255 = vector.multi_reduction <add>, %254, %cst_57 [1] : vector<1x32xf32> to vector<1xf32>
    %256 = vector.shape_cast %255 : vector<1xf32> to vector<1x1xf32>
    %257 = math.rsqrt %256 : vector<1x1xf32>
    %258 = vector.broadcast %77 : vector<1x32xf32> to vector<16x32xf32>
    %259 = arith.mulf %253, %258 : vector<16x32xf32>
    %cst_58 = arith.constant dense<0.000000e+00> : vector<16xf32>
    %260 = vector.multi_reduction <add>, %259, %cst_58 [1] : vector<16x32xf32> to vector<16xf32>
    %261 = vector.shape_cast %260 : vector<16xf32> to vector<16x1xf32>
    %262 = vector.broadcast %257 : vector<1x1xf32> to vector<16x1xf32>
    %263 = arith.mulf %261, %262 : vector<16x1xf32>
    %264 = math.tanh %263 : vector<16x1xf32>
    %265 = tpu.transpose %264, [1, 0] : vector<16x1xf32> -> vector<1x16xf32>
    %266 = vector.broadcast %69 : vector<1x16xf32> to vector<16x16xf32>
    %267 = arith.mulf %67, %266 : vector<16x16xf32>
    %268 = vector.broadcast %265 : vector<1x16xf32> to vector<16x16xf32>
    %269 = vector.broadcast %264 : vector<16x1xf32> to vector<16x16xf32>
    %270 = arith.cmpf ogt, %268, %269 : vector<16x16xf32>
    %271 = vector.broadcast %265 : vector<1x16xf32> to vector<16x16xf32>
    %272 = vector.broadcast %264 : vector<16x1xf32> to vector<16x16xf32>
    %273 = arith.cmpf oeq, %271, %272 : vector<16x16xf32>
    %274 = arith.andi %273, %12 : vector<16x16xi1>
    %275 = arith.ori %270, %274 : vector<16x16xi1>
    %276 = arith.extui %275 : vector<16x16xi1> to vector<16x16xi32>
    %277 = arith.sitofp %276 : vector<16x16xi32> to vector<16x16xf32>
    %278 = arith.mulf %267, %277 : vector<16x16xf32>
    %cst_59 = arith.constant dense<0.000000e+00> : vector<16xf32>
    %279 = vector.multi_reduction <add>, %278, %cst_59 [1] : vector<16x16xf32> to vector<16xf32>
    %280 = vector.shape_cast %279 : vector<16xf32> to vector<16x1xf32>
    %cst_60 = arith.constant dense<0.000000e+00> : vector<16xf32>
    %281 = vector.multi_reduction <add>, %267, %cst_60 [1] : vector<16x16xf32> to vector<16xf32>
    %282 = vector.shape_cast %281 : vector<16xf32> to vector<16x1xf32>
    %cst_61 = arith.constant 5.000000e-01 : f32
    %283 = vector.broadcast %cst_61 : f32 to vector<16x1xf32>
    %284 = arith.mulf %283, %282 : vector<16x1xf32>
    %285 = math.ceil %284 : vector<16x1xf32>
    %286 = arith.cmpf olt, %280, %285 : vector<16x1xf32>
    %287 = arith.extui %286 : vector<16x1xi1> to vector<16x1xi32>
    %288 = arith.sitofp %287 : vector<16x1xi32> to vector<16x1xf32>
    %289 = arith.mulf %68, %288 : vector<16x1xf32>
    %290 = tpu.transpose %289, [1, 0] : vector<16x1xf32> -> vector<1x16xf32>
    %291 = vector.broadcast %264 : vector<16x1xf32> to vector<16x32xf32>
    %292 = arith.mulf %253, %291 : vector<16x32xf32>
    %293 = vector.broadcast %289 : vector<16x1xf32> to vector<16x32xf32>
    %294 = arith.mulf %292, %293 : vector<16x32xf32>
    %295 = vector.broadcast %289 : vector<16x1xf32> to vector<16x16xf32>
    %296 = arith.mulf %1, %295 : vector<16x16xf32>
    %297 = vector.broadcast %290 : vector<1x16xf32> to vector<16x16xf32>
    %298 = arith.mulf %296, %297 : vector<16x16xf32>
    %299 = vector.broadcast %289 : vector<16x1xf32> to vector<16x2xf32>
    %300 = arith.mulf %3, %299 : vector<16x2xf32>
    %301 = vector.broadcast %290 : vector<1x16xf32> to vector<2x16xf32>
    %302 = arith.mulf %55, %301 : vector<2x16xf32>
    %cst_62 = arith.constant dense<0.000000e+00> : vector<2xf32>
    %303 = vector.multi_reduction <add>, %302, %cst_62 [1] : vector<2x16xf32> to vector<2xf32>
    %304 = vector.shape_cast %303 : vector<2xf32> to vector<2x1xf32>
    %cst_63 = arith.constant 1.000000e+00 : f32
    %305 = vector.broadcast %cst_63 : f32 to vector<2x1xf32>
    %306 = arith.maximumf %304, %305 : vector<2x1xf32>
    %307 = tpu.reciprocal %306 {approx = true} : vector<2x1xf32> -> vector<2x1xf32>
    %cst_64 = arith.constant dense<0.000000e+00> : vector<2x32xf32>
    %308 = tpu.matmul %302, %294, %cst_64 {dimension_numbers = #tpu.dot_dimension_numbers<[1], [0], [0], [1], [0, 0, 1, 1], [], []>} : vector<2x16xf32>, vector<16x32xf32>, vector<2x32xf32> -> vector<2x32xf32>
    %309 = vector.broadcast %307 : vector<2x1xf32> to vector<2x32xf32>
    %310 = arith.mulf %308, %309 : vector<2x32xf32>
    %311 = vector.extract_strided_slice %300 {offsets = [0, 0], sizes = [16, 1], strides = [1, 1]} : vector<16x2xf32> to vector<16x1xf32>
    %cst_65 = arith.constant 0.000000e+00 : f32
    %312 = vector.broadcast %cst_65 : f32 to vector<16x1xf32>
    %313 = arith.cmpf ogt, %311, %312 : vector<16x1xf32>
    %cst_66 = arith.constant -1.000000e+30 : f32
    %314 = vector.shape_cast %313 : vector<16x1xi1> to vector<16x1xi1>
    %315 = vector.broadcast %314 : vector<16x1xi1> to vector<16x32xi1>
    %316 = vector.broadcast %cst_66 : f32 to vector<16x32xf32>
    %317 = arith.select %315, %294, %316 : vector<16x32xi1>, vector<16x32xf32>
    %cst_67 = arith.constant dense<0xFF800000> : vector<32xf32>
    %318 = vector.multi_reduction <maximumf>, %317, %cst_67 [0] : vector<16x32xf32> to vector<32xf32>
    %319 = vector.shape_cast %318 : vector<32xf32> to vector<1x32xf32>
    %c0_68 = arith.constant 0 : index
    %c0_69 = arith.constant 0 : index
    %320 = vector.load %arg12[%c0_68, %c0_69] : memref<2x32xf32, #tpu.memory_space<vmem>>, vector<1x32xf32>
    tpu.vector_store %arg12[%c0_68, %c0_69], %319 {strides = array<i32>} : memref<2x32xf32, #tpu.memory_space<vmem>>, vector<1x32xf32>,
    %321 = vector.extract_strided_slice %300 {offsets = [0, 1], sizes = [16, 1], strides = [1, 1]} : vector<16x2xf32> to vector<16x1xf32>
    %cst_70 = arith.constant 0.000000e+00 : f32
    %322 = vector.broadcast %cst_70 : f32 to vector<16x1xf32>
    %323 = arith.cmpf ogt, %321, %322 : vector<16x1xf32>
    %cst_71 = arith.constant -1.000000e+30 : f32
    %324 = vector.shape_cast %323 : vector<16x1xi1> to vector<16x1xi1>
    %325 = vector.broadcast %324 : vector<16x1xi1> to vector<16x32xi1>
    %326 = vector.broadcast %cst_71 : f32 to vector<16x32xf32>
    %327 = arith.select %325, %294, %326 : vector<16x32xi1>, vector<16x32xf32>
    %cst_72 = arith.constant dense<0xFF800000> : vector<32xf32>
    %328 = vector.multi_reduction <maximumf>, %327, %cst_72 [0] : vector<16x32xf32> to vector<32xf32>
    %329 = vector.shape_cast %328 : vector<32xf32> to vector<1x32xf32>
    %c1 = arith.constant 1 : index
    %c0_73 = arith.constant 0 : index
    %330 = vector.load %arg12[%c1, %c0_73] : memref<2x32xf32, #tpu.memory_space<vmem>>, vector<1x32xf32>
    tpu.vector_store %arg12[%c1, %c0_73], %329 {strides = array<i32>} : memref<2x32xf32, #tpu.memory_space<vmem>>, vector<1x32xf32>,
    %cst_74 = arith.constant 0.000000e+00 : f32
    %331 = vector.broadcast %cst_74 : f32 to vector<2x1xf32>
    %332 = arith.cmpf ogt, %304, %331 : vector<2x1xf32>
    %c0_75 = arith.constant 0 : index
    %c0_76 = arith.constant 0 : index
    %333 = vector.load %arg12[%c0_75, %c0_76] : memref<2x32xf32, #tpu.memory_space<vmem>>, vector<2x32xf32>
    %cst_77 = arith.constant 0.000000e+00 : f32
    %334 = vector.shape_cast %332 : vector<2x1xi1> to vector<2x1xi1>
    %335 = vector.broadcast %334 : vector<2x1xi1> to vector<2x32xi1>
    %336 = vector.broadcast %cst_77 : f32 to vector<2x32xf32>
    %337 = arith.select %335, %333, %336 : vector<2x32xi1>, vector<2x32xf32>
    %338 = arith.addf %70, %337 : vector<2x32xf32>
    %339 = arith.addf %71, %310 : vector<2x32xf32>
    %340 = vector.extract_strided_slice %4 {offsets = [6, 0], sizes = [1, 32], strides = [1, 1]} : vector<24x32xf32> to vector<1x32xf32>
    %341 = vector.extract_strided_slice %4 {offsets = [7, 0], sizes = [1, 32], strides = [1, 1]} : vector<24x32xf32> to vector<1x32xf32>
    %342 = vector.extract_strided_slice %4 {offsets = [8, 0], sizes = [1, 32], strides = [1, 1]} : vector<24x32xf32> to vector<1x32xf32>
    %343 = vector.extract_strided_slice %4 {offsets = [9, 0], sizes = [1, 32], strides = [1, 1]} : vector<24x32xf32> to vector<1x32xf32>
    %344 = vector.extract_strided_slice %4 {offsets = [10, 0], sizes = [1, 32], strides = [1, 1]} : vector<24x32xf32> to vector<1x32xf32>
    %345 = vector.extract_strided_slice %4 {offsets = [11, 0], sizes = [1, 32], strides = [1, 1]} : vector<24x32xf32> to vector<1x32xf32>
    %c0_78 = arith.constant 0 : index
    %c0_79 = arith.constant 0 : index
    %346 = vector.load %arg4[%c0_78, %c0_79] : memref<32x32xf32, #tpu.memory_space<vmem>>, vector<32x32xf32>
    %347 = arith.truncf %294 : vector<16x32xf32> to vector<16x32xbf16>
    %348 = arith.truncf %346 : vector<32x32xf32> to vector<32x32xbf16>
    %cst_80 = arith.constant dense<0.000000e+00> : vector<16x32xf32>
    %349 = tpu.matmul %347, %348, %cst_80 {dimension_numbers = #tpu.dot_dimension_numbers<[1], [0], [0], [1], [0, 0, 1, 1], [], []>} : vector<16x32xbf16>, vector<32x32xbf16>, vector<16x32xf32> -> vector<16x32xf32>
    %350 = arith.mulf %298, %11 : vector<16x16xf32>
    %351 = arith.addf %350, %9 : vector<16x16xf32>
    %cst_81 = arith.constant 0.000000e+00 : f32
    %352 = vector.broadcast %cst_81 : f32 to vector<16x16xf32>
    %353 = arith.cmpf ogt, %351, %352 : vector<16x16xf32>
    %354 = vector.broadcast %340 : vector<1x32xf32> to vector<16x32xf32>
    %355 = arith.mulf %349, %354 : vector<16x32xf32>
    %cst_82 = arith.constant dense<0.000000e+00> : vector<16x4xf32>
    %356 = tpu.matmul %355, %54, %cst_82 {dimension_numbers = #tpu.dot_dimension_numbers<[1], [0], [0], [1], [0, 0, 1, 1], [], []>} : vector<16x32xf32>, vector<32x4xf32>, vector<16x4xf32> -> vector<16x4xf32>
    %357 = vector.broadcast %341 : vector<1x32xf32> to vector<16x32xf32>
    %358 = arith.mulf %349, %357 : vector<16x32xf32>
    %cst_83 = arith.constant dense<0.000000e+00> : vector<16x4xf32>
    %359 = tpu.matmul %358, %54, %cst_83 {dimension_numbers = #tpu.dot_dimension_numbers<[1], [0], [0], [1], [0, 0, 1, 1], [], []>} : vector<16x32xf32>, vector<32x4xf32>, vector<16x4xf32> -> vector<16x4xf32>
    %360 = tpu.transpose %356, [1, 0] : vector<16x4xf32> -> vector<4x16xf32>
    %cst_84 = arith.constant 0.000000e+00 : f32
    %361 = vector.broadcast %cst_84 : f32 to vector<16x32xf32>
    %362 = vector.extract_strided_slice %359 {offsets = [0, 0], sizes = [16, 1], strides = [1, 1]} : vector<16x4xf32> to vector<16x1xf32>
    %363 = vector.extract_strided_slice %360 {offsets = [0, 0], sizes = [1, 16], strides = [1, 1]} : vector<4x16xf32> to vector<1x16xf32>
    %364 = vector.broadcast %362 : vector<16x1xf32> to vector<16x16xf32>
    %365 = vector.broadcast %363 : vector<1x16xf32> to vector<16x16xf32>
    %366 = arith.addf %364, %365 : vector<16x16xf32>
    %cst_85 = arith.constant 0.000000e+00 : f32
    %367 = vector.broadcast %cst_85 : f32 to vector<16x16xf32>
    %368 = arith.cmpf oge, %366, %367 : vector<16x16xf32>
    %cst_86 = arith.constant 2.000000e-01 : f32
    %369 = vector.broadcast %cst_86 : f32 to vector<16x16xf32>
    %370 = arith.mulf %369, %366 : vector<16x16xf32>
    %371 = arith.select %368, %366, %370 : vector<16x16xi1>, vector<16x16xf32>
    %cst_87 = arith.constant -1.000000e+30 : f32
    %372 = vector.broadcast %cst_87 : f32 to vector<16x16xf32>
    %373 = arith.select %353, %371, %372 : vector<16x16xi1>, vector<16x16xf32>
    %cst_88 = arith.constant dense<0xFF800000> : vector<16xf32>
    %374 = vector.multi_reduction <maximumf>, %373, %cst_88 [1] : vector<16x16xf32> to vector<16xf32>
    %375 = vector.shape_cast %374 : vector<16xf32> to vector<16x1xf32>
    %376 = vector.broadcast %375 : vector<16x1xf32> to vector<16x16xf32>
    %377 = arith.subf %373, %376 : vector<16x16xf32>
    %378 = math.exp %377 : vector<16x16xf32>
    %379 = arith.mulf %351, %378 : vector<16x16xf32>
    %cst_89 = arith.constant dense<0.000000e+00> : vector<16xf32>
    %380 = vector.multi_reduction <add>, %379, %cst_89 [1] : vector<16x16xf32> to vector<16xf32>
    %381 = vector.shape_cast %380 : vector<16xf32> to vector<16x1xf32>
    %382 = tpu.reciprocal %381 {approx = true} : vector<16x1xf32> -> vector<16x1xf32>
    %383 = vector.broadcast %382 : vector<16x1xf32> to vector<16x16xf32>
    %384 = arith.mulf %379, %383 : vector<16x16xf32>
    %385 = vector.broadcast %20 : vector<1x32xf32> to vector<16x32xf32>
    %386 = arith.mulf %349, %385 : vector<16x32xf32>
    %387 = arith.truncf %384 : vector<16x16xf32> to vector<16x16xbf16>
    %388 = arith.truncf %386 : vector<16x32xf32> to vector<16x32xbf16>
    %cst_90 = arith.constant dense<0.000000e+00> : vector<16x32xf32>
    %389 = tpu.matmul %387, %388, %cst_90 {dimension_numbers = #tpu.dot_dimension_numbers<[1], [0], [0], [1], [0, 0, 1, 1], [], []>} : vector<16x16xbf16>, vector<16x32xbf16>, vector<16x32xf32> -> vector<16x32xf32>
    %390 = arith.addf %361, %389 : vector<16x32xf32>
    %391 = vector.extract_strided_slice %359 {offsets = [0, 1], sizes = [16, 1], strides = [1, 1]} : vector<16x4xf32> to vector<16x1xf32>
    %392 = vector.extract_strided_slice %360 {offsets = [1, 0], sizes = [1, 16], strides = [1, 1]} : vector<4x16xf32> to vector<1x16xf32>
    %393 = vector.broadcast %391 : vector<16x1xf32> to vector<16x16xf32>
    %394 = vector.broadcast %392 : vector<1x16xf32> to vector<16x16xf32>
    %395 = arith.addf %393, %394 : vector<16x16xf32>
    %cst_91 = arith.constant 0.000000e+00 : f32
    %396 = vector.broadcast %cst_91 : f32 to vector<16x16xf32>
    %397 = arith.cmpf oge, %395, %396 : vector<16x16xf32>
    %cst_92 = arith.constant 2.000000e-01 : f32
    %398 = vector.broadcast %cst_92 : f32 to vector<16x16xf32>
    %399 = arith.mulf %398, %395 : vector<16x16xf32>
    %400 = arith.select %397, %395, %399 : vector<16x16xi1>, vector<16x16xf32>
    %cst_93 = arith.constant -1.000000e+30 : f32
    %401 = vector.broadcast %cst_93 : f32 to vector<16x16xf32>
    %402 = arith.select %353, %400, %401 : vector<16x16xi1>, vector<16x16xf32>
    %cst_94 = arith.constant dense<0xFF800000> : vector<16xf32>
    %403 = vector.multi_reduction <maximumf>, %402, %cst_94 [1] : vector<16x16xf32> to vector<16xf32>
    %404 = vector.shape_cast %403 : vector<16xf32> to vector<16x1xf32>
    %405 = vector.broadcast %404 : vector<16x1xf32> to vector<16x16xf32>
    %406 = arith.subf %402, %405 : vector<16x16xf32>
    %407 = math.exp %406 : vector<16x16xf32>
    %408 = arith.mulf %351, %407 : vector<16x16xf32>
    %cst_95 = arith.constant dense<0.000000e+00> : vector<16xf32>
    %409 = vector.multi_reduction <add>, %408, %cst_95 [1] : vector<16x16xf32> to vector<16xf32>
    %410 = vector.shape_cast %409 : vector<16xf32> to vector<16x1xf32>
    %411 = tpu.reciprocal %410 {approx = true} : vector<16x1xf32> -> vector<16x1xf32>
    %412 = vector.broadcast %411 : vector<16x1xf32> to vector<16x16xf32>
    %413 = arith.mulf %408, %412 : vector<16x16xf32>
    %414 = vector.broadcast %27 : vector<1x32xf32> to vector<16x32xf32>
    %415 = arith.mulf %349, %414 : vector<16x32xf32>
    %416 = arith.truncf %413 : vector<16x16xf32> to vector<16x16xbf16>
    %417 = arith.truncf %415 : vector<16x32xf32> to vector<16x32xbf16>
    %cst_96 = arith.constant dense<0.000000e+00> : vector<16x32xf32>
    %418 = tpu.matmul %416, %417, %cst_96 {dimension_numbers = #tpu.dot_dimension_numbers<[1], [0], [0], [1], [0, 0, 1, 1], [], []>} : vector<16x16xbf16>, vector<16x32xbf16>, vector<16x32xf32> -> vector<16x32xf32>
    %419 = arith.addf %390, %418 : vector<16x32xf32>
    %420 = vector.extract_strided_slice %359 {offsets = [0, 2], sizes = [16, 1], strides = [1, 1]} : vector<16x4xf32> to vector<16x1xf32>
    %421 = vector.extract_strided_slice %360 {offsets = [2, 0], sizes = [1, 16], strides = [1, 1]} : vector<4x16xf32> to vector<1x16xf32>
    %422 = vector.broadcast %420 : vector<16x1xf32> to vector<16x16xf32>
    %423 = vector.broadcast %421 : vector<1x16xf32> to vector<16x16xf32>
    %424 = arith.addf %422, %423 : vector<16x16xf32>
    %cst_97 = arith.constant 0.000000e+00 : f32
    %425 = vector.broadcast %cst_97 : f32 to vector<16x16xf32>
    %426 = arith.cmpf oge, %424, %425 : vector<16x16xf32>
    %cst_98 = arith.constant 2.000000e-01 : f32
    %427 = vector.broadcast %cst_98 : f32 to vector<16x16xf32>
    %428 = arith.mulf %427, %424 : vector<16x16xf32>
    %429 = arith.select %426, %424, %428 : vector<16x16xi1>, vector<16x16xf32>
    %cst_99 = arith.constant -1.000000e+30 : f32
    %430 = vector.broadcast %cst_99 : f32 to vector<16x16xf32>
    %431 = arith.select %353, %429, %430 : vector<16x16xi1>, vector<16x16xf32>
    %cst_100 = arith.constant dense<0xFF800000> : vector<16xf32>
    %432 = vector.multi_reduction <maximumf>, %431, %cst_100 [1] : vector<16x16xf32> to vector<16xf32>
    %433 = vector.shape_cast %432 : vector<16xf32> to vector<16x1xf32>
    %434 = vector.broadcast %433 : vector<16x1xf32> to vector<16x16xf32>
    %435 = arith.subf %431, %434 : vector<16x16xf32>
    %436 = math.exp %435 : vector<16x16xf32>
    %437 = arith.mulf %351, %436 : vector<16x16xf32>
    %cst_101 = arith.constant dense<0.000000e+00> : vector<16xf32>
    %438 = vector.multi_reduction <add>, %437, %cst_101 [1] : vector<16x16xf32> to vector<16xf32>
    %439 = vector.shape_cast %438 : vector<16xf32> to vector<16x1xf32>
    %440 = tpu.reciprocal %439 {approx = true} : vector<16x1xf32> -> vector<16x1xf32>
    %441 = vector.broadcast %440 : vector<16x1xf32> to vector<16x16xf32>
    %442 = arith.mulf %437, %441 : vector<16x16xf32>
    %443 = vector.broadcast %34 : vector<1x32xf32> to vector<16x32xf32>
    %444 = arith.mulf %349, %443 : vector<16x32xf32>
    %445 = arith.truncf %442 : vector<16x16xf32> to vector<16x16xbf16>
    %446 = arith.truncf %444 : vector<16x32xf32> to vector<16x32xbf16>
    %cst_102 = arith.constant dense<0.000000e+00> : vector<16x32xf32>
    %447 = tpu.matmul %445, %446, %cst_102 {dimension_numbers = #tpu.dot_dimension_numbers<[1], [0], [0], [1], [0, 0, 1, 1], [], []>} : vector<16x16xbf16>, vector<16x32xbf16>, vector<16x32xf32> -> vector<16x32xf32>
    %448 = arith.addf %419, %447 : vector<16x32xf32>
    %449 = vector.extract_strided_slice %359 {offsets = [0, 3], sizes = [16, 1], strides = [1, 1]} : vector<16x4xf32> to vector<16x1xf32>
    %450 = vector.extract_strided_slice %360 {offsets = [3, 0], sizes = [1, 16], strides = [1, 1]} : vector<4x16xf32> to vector<1x16xf32>
    %451 = vector.broadcast %449 : vector<16x1xf32> to vector<16x16xf32>
    %452 = vector.broadcast %450 : vector<1x16xf32> to vector<16x16xf32>
    %453 = arith.addf %451, %452 : vector<16x16xf32>
    %cst_103 = arith.constant 0.000000e+00 : f32
    %454 = vector.broadcast %cst_103 : f32 to vector<16x16xf32>
    %455 = arith.cmpf oge, %453, %454 : vector<16x16xf32>
    %cst_104 = arith.constant 2.000000e-01 : f32
    %456 = vector.broadcast %cst_104 : f32 to vector<16x16xf32>
    %457 = arith.mulf %456, %453 : vector<16x16xf32>
    %458 = arith.select %455, %453, %457 : vector<16x16xi1>, vector<16x16xf32>
    %cst_105 = arith.constant -1.000000e+30 : f32
    %459 = vector.broadcast %cst_105 : f32 to vector<16x16xf32>
    %460 = arith.select %353, %458, %459 : vector<16x16xi1>, vector<16x16xf32>
    %cst_106 = arith.constant dense<0xFF800000> : vector<16xf32>
    %461 = vector.multi_reduction <maximumf>, %460, %cst_106 [1] : vector<16x16xf32> to vector<16xf32>
    %462 = vector.shape_cast %461 : vector<16xf32> to vector<16x1xf32>
    %463 = vector.broadcast %462 : vector<16x1xf32> to vector<16x16xf32>
    %464 = arith.subf %460, %463 : vector<16x16xf32>
    %465 = math.exp %464 : vector<16x16xf32>
    %466 = arith.mulf %351, %465 : vector<16x16xf32>
    %cst_107 = arith.constant dense<0.000000e+00> : vector<16xf32>
    %467 = vector.multi_reduction <add>, %466, %cst_107 [1] : vector<16x16xf32> to vector<16xf32>
    %468 = vector.shape_cast %467 : vector<16xf32> to vector<16x1xf32>
    %469 = tpu.reciprocal %468 {approx = true} : vector<16x1xf32> -> vector<16x1xf32>
    %470 = vector.broadcast %469 : vector<16x1xf32> to vector<16x16xf32>
    %471 = arith.mulf %466, %470 : vector<16x16xf32>
    %472 = vector.broadcast %41 : vector<1x32xf32> to vector<16x32xf32>
    %473 = arith.mulf %349, %472 : vector<16x32xf32>
    %474 = arith.truncf %471 : vector<16x16xf32> to vector<16x16xbf16>
    %475 = arith.truncf %473 : vector<16x32xf32> to vector<16x32xbf16>
    %cst_108 = arith.constant dense<0.000000e+00> : vector<16x32xf32>
    %476 = tpu.matmul %474, %475, %cst_108 {dimension_numbers = #tpu.dot_dimension_numbers<[1], [0], [0], [1], [0, 0, 1, 1], [], []>} : vector<16x16xbf16>, vector<16x32xbf16>, vector<16x32xf32> -> vector<16x32xf32>
    %477 = arith.addf %448, %476 : vector<16x32xf32>
    %478 = vector.broadcast %342 : vector<1x32xf32> to vector<16x32xf32>
    %479 = arith.addf %477, %478 : vector<16x32xf32>
    %cst_109 = arith.constant 5.000000e-01 : f32
    %480 = vector.broadcast %cst_109 : f32 to vector<16x32xf32>
    %481 = arith.mulf %480, %479 : vector<16x32xf32>
    %cst_110 = arith.constant 4.471500e-02 : f32
    %482 = vector.broadcast %cst_110 : f32 to vector<16x32xf32>
    %483 = arith.mulf %482, %479 : vector<16x32xf32>
    %484 = arith.mulf %483, %479 : vector<16x32xf32>
    %485 = arith.mulf %484, %479 : vector<16x32xf32>
    %486 = arith.addf %479, %485 : vector<16x32xf32>
    %cst_111 = arith.constant 0.797884583 : f32
    %487 = vector.broadcast %cst_111 : f32 to vector<16x32xf32>
    %488 = arith.mulf %487, %486 : vector<16x32xf32>
    %489 = math.tanh %488 : vector<16x32xf32>
    %cst_112 = arith.constant 1.000000e+00 : f32
    %490 = vector.broadcast %cst_112 : f32 to vector<16x32xf32>
    %491 = arith.addf %490, %489 : vector<16x32xf32>
    %492 = arith.mulf %481, %491 : vector<16x32xf32>
    %cst_113 = arith.constant dense<0.000000e+00> : vector<1xf32>
    %493 = vector.multi_reduction <add>, %289, %cst_113 [0] : vector<16x1xf32> to vector<1xf32>
    %494 = vector.shape_cast %493 : vector<1xf32> to vector<1x1xf32>
    %cst_114 = arith.constant 1.000000e+00 : f32
    %495 = vector.broadcast %cst_114 : f32 to vector<1x1xf32>
    %496 = arith.maximumf %494, %495 : vector<1x1xf32>
    %497 = tpu.reciprocal %496 {approx = true} : vector<1x1xf32> -> vector<1x1xf32>
    %498 = vector.broadcast %289 : vector<16x1xf32> to vector<16x32xf32>
    %499 = arith.mulf %492, %498 : vector<16x32xf32>
    %cst_115 = arith.constant dense<0.000000e+00> : vector<32xf32>
    %500 = vector.multi_reduction <add>, %499, %cst_115 [0] : vector<16x32xf32> to vector<32xf32>
    %501 = vector.shape_cast %500 : vector<32xf32> to vector<1x32xf32>
    %502 = vector.broadcast %497 : vector<1x1xf32> to vector<1x32xf32>
    %503 = arith.mulf %501, %502 : vector<1x32xf32>
    %504 = vector.broadcast %503 : vector<1x32xf32> to vector<16x32xf32>
    %505 = arith.subf %492, %504 : vector<16x32xf32>
    %506 = arith.mulf %505, %505 : vector<16x32xf32>
    %507 = vector.broadcast %289 : vector<16x1xf32> to vector<16x32xf32>
    %508 = arith.mulf %506, %507 : vector<16x32xf32>
    %cst_116 = arith.constant dense<0.000000e+00> : vector<32xf32>
    %509 = vector.multi_reduction <add>, %508, %cst_116 [0] : vector<16x32xf32> to vector<32xf32>
    %510 = vector.shape_cast %509 : vector<32xf32> to vector<1x32xf32>
    %511 = vector.broadcast %497 : vector<1x1xf32> to vector<1x32xf32>
    %512 = arith.mulf %510, %511 : vector<1x32xf32>
    %cst_117 = arith.constant 9.99999974E-6 : f32
    %513 = vector.broadcast %cst_117 : f32 to vector<1x32xf32>
    %514 = arith.addf %512, %513 : vector<1x32xf32>
    %515 = math.rsqrt %514 : vector<1x32xf32>
    %516 = vector.broadcast %515 : vector<1x32xf32> to vector<16x32xf32>
    %517 = arith.mulf %505, %516 : vector<16x32xf32>
    %518 = vector.broadcast %343 : vector<1x32xf32> to vector<16x32xf32>
    %519 = arith.mulf %518, %517 : vector<16x32xf32>
    %520 = vector.broadcast %344 : vector<1x32xf32> to vector<16x32xf32>
    %521 = arith.addf %519, %520 : vector<16x32xf32>
    %522 = arith.mulf %345, %345 : vector<1x32xf32>
    %cst_118 = arith.constant dense<0.000000e+00> : vector<1xf32>
    %523 = vector.multi_reduction <add>, %522, %cst_118 [1] : vector<1x32xf32> to vector<1xf32>
    %524 = vector.shape_cast %523 : vector<1xf32> to vector<1x1xf32>
    %525 = math.rsqrt %524 : vector<1x1xf32>
    %526 = vector.broadcast %345 : vector<1x32xf32> to vector<16x32xf32>
    %527 = arith.mulf %521, %526 : vector<16x32xf32>
    %cst_119 = arith.constant dense<0.000000e+00> : vector<16xf32>
    %528 = vector.multi_reduction <add>, %527, %cst_119 [1] : vector<16x32xf32> to vector<16xf32>
    %529 = vector.shape_cast %528 : vector<16xf32> to vector<16x1xf32>
    %530 = vector.broadcast %525 : vector<1x1xf32> to vector<16x1xf32>
    %531 = arith.mulf %529, %530 : vector<16x1xf32>
    %532 = math.tanh %531 : vector<16x1xf32>
    %533 = tpu.transpose %532, [1, 0] : vector<16x1xf32> -> vector<1x16xf32>
    %534 = vector.broadcast %290 : vector<1x16xf32> to vector<16x16xf32>
    %535 = arith.mulf %67, %534 : vector<16x16xf32>
    %536 = vector.broadcast %533 : vector<1x16xf32> to vector<16x16xf32>
    %537 = vector.broadcast %532 : vector<16x1xf32> to vector<16x16xf32>
    %538 = arith.cmpf ogt, %536, %537 : vector<16x16xf32>
    %539 = vector.broadcast %533 : vector<1x16xf32> to vector<16x16xf32>
    %540 = vector.broadcast %532 : vector<16x1xf32> to vector<16x16xf32>
    %541 = arith.cmpf oeq, %539, %540 : vector<16x16xf32>
    %542 = arith.andi %541, %12 : vector<16x16xi1>
    %543 = arith.ori %538, %542 : vector<16x16xi1>
    %544 = arith.extui %543 : vector<16x16xi1> to vector<16x16xi32>
    %545 = arith.sitofp %544 : vector<16x16xi32> to vector<16x16xf32>
    %546 = arith.mulf %535, %545 : vector<16x16xf32>
    %cst_120 = arith.constant dense<0.000000e+00> : vector<16xf32>
    %547 = vector.multi_reduction <add>, %546, %cst_120 [1] : vector<16x16xf32> to vector<16xf32>
    %548 = vector.shape_cast %547 : vector<16xf32> to vector<16x1xf32>
    %cst_121 = arith.constant dense<0.000000e+00> : vector<16xf32>
    %549 = vector.multi_reduction <add>, %535, %cst_121 [1] : vector<16x16xf32> to vector<16xf32>
    %550 = vector.shape_cast %549 : vector<16xf32> to vector<16x1xf32>
    %cst_122 = arith.constant 5.000000e-01 : f32
    %551 = vector.broadcast %cst_122 : f32 to vector<16x1xf32>
    %552 = arith.mulf %551, %550 : vector<16x1xf32>
    %553 = math.ceil %552 : vector<16x1xf32>
    %554 = arith.cmpf olt, %548, %553 : vector<16x1xf32>
    %555 = arith.extui %554 : vector<16x1xi1> to vector<16x1xi32>
    %556 = arith.sitofp %555 : vector<16x1xi32> to vector<16x1xf32>
    %557 = arith.mulf %289, %556 : vector<16x1xf32>
    %558 = tpu.transpose %557, [1, 0] : vector<16x1xf32> -> vector<1x16xf32>
    %559 = vector.broadcast %532 : vector<16x1xf32> to vector<16x32xf32>
    %560 = arith.mulf %521, %559 : vector<16x32xf32>
    %561 = vector.broadcast %557 : vector<16x1xf32> to vector<16x32xf32>
    %562 = arith.mulf %560, %561 : vector<16x32xf32>
    %563 = vector.broadcast %557 : vector<16x1xf32> to vector<16x16xf32>
    %564 = arith.mulf %298, %563 : vector<16x16xf32>
    %565 = vector.broadcast %558 : vector<1x16xf32> to vector<16x16xf32>
    %566 = arith.mulf %564, %565 : vector<16x16xf32>
    %567 = vector.broadcast %557 : vector<16x1xf32> to vector<16x2xf32>
    %568 = arith.mulf %3, %567 : vector<16x2xf32>
    %569 = vector.broadcast %558 : vector<1x16xf32> to vector<2x16xf32>
    %570 = arith.mulf %55, %569 : vector<2x16xf32>
    %cst_123 = arith.constant dense<0.000000e+00> : vector<2xf32>
    %571 = vector.multi_reduction <add>, %570, %cst_123 [1] : vector<2x16xf32> to vector<2xf32>
    %572 = vector.shape_cast %571 : vector<2xf32> to vector<2x1xf32>
    %cst_124 = arith.constant 1.000000e+00 : f32
    %573 = vector.broadcast %cst_124 : f32 to vector<2x1xf32>
    %574 = arith.maximumf %572, %573 : vector<2x1xf32>
    %575 = tpu.reciprocal %574 {approx = true} : vector<2x1xf32> -> vector<2x1xf32>
    %cst_125 = arith.constant dense<0.000000e+00> : vector<2x32xf32>
    %576 = tpu.matmul %570, %562, %cst_125 {dimension_numbers = #tpu.dot_dimension_numbers<[1], [0], [0], [1], [0, 0, 1, 1], [], []>} : vector<2x16xf32>, vector<16x32xf32>, vector<2x32xf32> -> vector<2x32xf32>
    %577 = vector.broadcast %575 : vector<2x1xf32> to vector<2x32xf32>
    %578 = arith.mulf %576, %577 : vector<2x32xf32>
    %579 = vector.extract_strided_slice %568 {offsets = [0, 0], sizes = [16, 1], strides = [1, 1]} : vector<16x2xf32> to vector<16x1xf32>
    %cst_126 = arith.constant 0.000000e+00 : f32
    %580 = vector.broadcast %cst_126 : f32 to vector<16x1xf32>
    %581 = arith.cmpf ogt, %579, %580 : vector<16x1xf32>
    %cst_127 = arith.constant -1.000000e+30 : f32
    %582 = vector.shape_cast %581 : vector<16x1xi1> to vector<16x1xi1>
    %583 = vector.broadcast %582 : vector<16x1xi1> to vector<16x32xi1>
    %584 = vector.broadcast %cst_127 : f32 to vector<16x32xf32>
    %585 = arith.select %583, %562, %584 : vector<16x32xi1>, vector<16x32xf32>
    %cst_128 = arith.constant dense<0xFF800000> : vector<32xf32>
    %586 = vector.multi_reduction <maximumf>, %585, %cst_128 [0] : vector<16x32xf32> to vector<32xf32>
    %587 = vector.shape_cast %586 : vector<32xf32> to vector<1x32xf32>
    %c0_129 = arith.constant 0 : index
    %c0_130 = arith.constant 0 : index
    %588 = vector.load %arg12[%c0_129, %c0_130] : memref<2x32xf32, #tpu.memory_space<vmem>>, vector<1x32xf32>
    tpu.vector_store %arg12[%c0_129, %c0_130], %587 {strides = array<i32>} : memref<2x32xf32, #tpu.memory_space<vmem>>, vector<1x32xf32>,
    %589 = vector.extract_strided_slice %568 {offsets = [0, 1], sizes = [16, 1], strides = [1, 1]} : vector<16x2xf32> to vector<16x1xf32>
    %cst_131 = arith.constant 0.000000e+00 : f32
    %590 = vector.broadcast %cst_131 : f32 to vector<16x1xf32>
    %591 = arith.cmpf ogt, %589, %590 : vector<16x1xf32>
    %cst_132 = arith.constant -1.000000e+30 : f32
    %592 = vector.shape_cast %591 : vector<16x1xi1> to vector<16x1xi1>
    %593 = vector.broadcast %592 : vector<16x1xi1> to vector<16x32xi1>
    %594 = vector.broadcast %cst_132 : f32 to vector<16x32xf32>
    %595 = arith.select %593, %562, %594 : vector<16x32xi1>, vector<16x32xf32>
    %cst_133 = arith.constant dense<0xFF800000> : vector<32xf32>
    %596 = vector.multi_reduction <maximumf>, %595, %cst_133 [0] : vector<16x32xf32> to vector<32xf32>
    %597 = vector.shape_cast %596 : vector<32xf32> to vector<1x32xf32>
    %c1_134 = arith.constant 1 : index
    %c0_135 = arith.constant 0 : index
    %598 = vector.load %arg12[%c1_134, %c0_135] : memref<2x32xf32, #tpu.memory_space<vmem>>, vector<1x32xf32>
    tpu.vector_store %arg12[%c1_134, %c0_135], %597 {strides = array<i32>} : memref<2x32xf32, #tpu.memory_space<vmem>>, vector<1x32xf32>,
    %cst_136 = arith.constant 0.000000e+00 : f32
    %599 = vector.broadcast %cst_136 : f32 to vector<2x1xf32>
    %600 = arith.cmpf ogt, %572, %599 : vector<2x1xf32>
    %c0_137 = arith.constant 0 : index
    %c0_138 = arith.constant 0 : index
    %601 = vector.load %arg12[%c0_137, %c0_138] : memref<2x32xf32, #tpu.memory_space<vmem>>, vector<2x32xf32>
    %cst_139 = arith.constant 0.000000e+00 : f32
    %602 = vector.shape_cast %600 : vector<2x1xi1> to vector<2x1xi1>
    %603 = vector.broadcast %602 : vector<2x1xi1> to vector<2x32xi1>
    %604 = vector.broadcast %cst_139 : f32 to vector<2x32xf32>
    %605 = arith.select %603, %601, %604 : vector<2x32xi1>, vector<2x32xf32>
    %606 = arith.addf %338, %605 : vector<2x32xf32>
    %607 = arith.addf %339, %578 : vector<2x32xf32>
    %608 = vector.extract_strided_slice %4 {offsets = [12, 0], sizes = [1, 32], strides = [1, 1]} : vector<24x32xf32> to vector<1x32xf32>
    %609 = vector.extract_strided_slice %4 {offsets = [13, 0], sizes = [1, 32], strides = [1, 1]} : vector<24x32xf32> to vector<1x32xf32>
    %610 = vector.extract_strided_slice %4 {offsets = [14, 0], sizes = [1, 32], strides = [1, 1]} : vector<24x32xf32> to vector<1x32xf32>
    %611 = vector.extract_strided_slice %4 {offsets = [15, 0], sizes = [1, 32], strides = [1, 1]} : vector<24x32xf32> to vector<1x32xf32>
    %612 = vector.extract_strided_slice %4 {offsets = [16, 0], sizes = [1, 32], strides = [1, 1]} : vector<24x32xf32> to vector<1x32xf32>
    %613 = vector.extract_strided_slice %4 {offsets = [17, 0], sizes = [1, 32], strides = [1, 1]} : vector<24x32xf32> to vector<1x32xf32>
    %c0_140 = arith.constant 0 : index
    %c0_141 = arith.constant 0 : index
    %614 = vector.load %arg5[%c0_140, %c0_141] : memref<32x32xf32, #tpu.memory_space<vmem>>, vector<32x32xf32>
    %615 = arith.truncf %562 : vector<16x32xf32> to vector<16x32xbf16>
    %616 = arith.truncf %614 : vector<32x32xf32> to vector<32x32xbf16>
    %cst_142 = arith.constant dense<0.000000e+00> : vector<16x32xf32>
    %617 = tpu.matmul %615, %616, %cst_142 {dimension_numbers = #tpu.dot_dimension_numbers<[1], [0], [0], [1], [0, 0, 1, 1], [], []>} : vector<16x32xbf16>, vector<32x32xbf16>, vector<16x32xf32> -> vector<16x32xf32>
    %618 = arith.mulf %566, %11 : vector<16x16xf32>
    %619 = arith.addf %618, %9 : vector<16x16xf32>
    %cst_143 = arith.constant 0.000000e+00 : f32
    %620 = vector.broadcast %cst_143 : f32 to vector<16x16xf32>
    %621 = arith.cmpf ogt, %619, %620 : vector<16x16xf32>
    %622 = vector.broadcast %608 : vector<1x32xf32> to vector<16x32xf32>
    %623 = arith.mulf %617, %622 : vector<16x32xf32>
    %cst_144 = arith.constant dense<0.000000e+00> : vector<16x4xf32>
    %624 = tpu.matmul %623, %54, %cst_144 {dimension_numbers = #tpu.dot_dimension_numbers<[1], [0], [0], [1], [0, 0, 1, 1], [], []>} : vector<16x32xf32>, vector<32x4xf32>, vector<16x4xf32> -> vector<16x4xf32>
    %625 = vector.broadcast %609 : vector<1x32xf32> to vector<16x32xf32>
    %626 = arith.mulf %617, %625 : vector<16x32xf32>
    %cst_145 = arith.constant dense<0.000000e+00> : vector<16x4xf32>
    %627 = tpu.matmul %626, %54, %cst_145 {dimension_numbers = #tpu.dot_dimension_numbers<[1], [0], [0], [1], [0, 0, 1, 1], [], []>} : vector<16x32xf32>, vector<32x4xf32>, vector<16x4xf32> -> vector<16x4xf32>
    %628 = tpu.transpose %624, [1, 0] : vector<16x4xf32> -> vector<4x16xf32>
    %cst_146 = arith.constant 0.000000e+00 : f32
    %629 = vector.broadcast %cst_146 : f32 to vector<16x32xf32>
    %630 = vector.extract_strided_slice %627 {offsets = [0, 0], sizes = [16, 1], strides = [1, 1]} : vector<16x4xf32> to vector<16x1xf32>
    %631 = vector.extract_strided_slice %628 {offsets = [0, 0], sizes = [1, 16], strides = [1, 1]} : vector<4x16xf32> to vector<1x16xf32>
    %632 = vector.broadcast %630 : vector<16x1xf32> to vector<16x16xf32>
    %633 = vector.broadcast %631 : vector<1x16xf32> to vector<16x16xf32>
    %634 = arith.addf %632, %633 : vector<16x16xf32>
    %cst_147 = arith.constant 0.000000e+00 : f32
    %635 = vector.broadcast %cst_147 : f32 to vector<16x16xf32>
    %636 = arith.cmpf oge, %634, %635 : vector<16x16xf32>
    %cst_148 = arith.constant 2.000000e-01 : f32
    %637 = vector.broadcast %cst_148 : f32 to vector<16x16xf32>
    %638 = arith.mulf %637, %634 : vector<16x16xf32>
    %639 = arith.select %636, %634, %638 : vector<16x16xi1>, vector<16x16xf32>
    %cst_149 = arith.constant -1.000000e+30 : f32
    %640 = vector.broadcast %cst_149 : f32 to vector<16x16xf32>
    %641 = arith.select %621, %639, %640 : vector<16x16xi1>, vector<16x16xf32>
    %cst_150 = arith.constant dense<0xFF800000> : vector<16xf32>
    %642 = vector.multi_reduction <maximumf>, %641, %cst_150 [1] : vector<16x16xf32> to vector<16xf32>
    %643 = vector.shape_cast %642 : vector<16xf32> to vector<16x1xf32>
    %644 = vector.broadcast %643 : vector<16x1xf32> to vector<16x16xf32>
    %645 = arith.subf %641, %644 : vector<16x16xf32>
    %646 = math.exp %645 : vector<16x16xf32>
    %647 = arith.mulf %619, %646 : vector<16x16xf32>
    %cst_151 = arith.constant dense<0.000000e+00> : vector<16xf32>
    %648 = vector.multi_reduction <add>, %647, %cst_151 [1] : vector<16x16xf32> to vector<16xf32>
    %649 = vector.shape_cast %648 : vector<16xf32> to vector<16x1xf32>
    %650 = tpu.reciprocal %649 {approx = true} : vector<16x1xf32> -> vector<16x1xf32>
    %651 = vector.broadcast %650 : vector<16x1xf32> to vector<16x16xf32>
    %652 = arith.mulf %647, %651 : vector<16x16xf32>
    %653 = vector.broadcast %20 : vector<1x32xf32> to vector<16x32xf32>
    %654 = arith.mulf %617, %653 : vector<16x32xf32>
    %655 = arith.truncf %652 : vector<16x16xf32> to vector<16x16xbf16>
    %656 = arith.truncf %654 : vector<16x32xf32> to vector<16x32xbf16>
    %cst_152 = arith.constant dense<0.000000e+00> : vector<16x32xf32>
    %657 = tpu.matmul %655, %656, %cst_152 {dimension_numbers = #tpu.dot_dimension_numbers<[1], [0], [0], [1], [0, 0, 1, 1], [], []>} : vector<16x16xbf16>, vector<16x32xbf16>, vector<16x32xf32> -> vector<16x32xf32>
    %658 = arith.addf %629, %657 : vector<16x32xf32>
    %659 = vector.extract_strided_slice %627 {offsets = [0, 1], sizes = [16, 1], strides = [1, 1]} : vector<16x4xf32> to vector<16x1xf32>
    %660 = vector.extract_strided_slice %628 {offsets = [1, 0], sizes = [1, 16], strides = [1, 1]} : vector<4x16xf32> to vector<1x16xf32>
    %661 = vector.broadcast %659 : vector<16x1xf32> to vector<16x16xf32>
    %662 = vector.broadcast %660 : vector<1x16xf32> to vector<16x16xf32>
    %663 = arith.addf %661, %662 : vector<16x16xf32>
    %cst_153 = arith.constant 0.000000e+00 : f32
    %664 = vector.broadcast %cst_153 : f32 to vector<16x16xf32>
    %665 = arith.cmpf oge, %663, %664 : vector<16x16xf32>
    %cst_154 = arith.constant 2.000000e-01 : f32
    %666 = vector.broadcast %cst_154 : f32 to vector<16x16xf32>
    %667 = arith.mulf %666, %663 : vector<16x16xf32>
    %668 = arith.select %665, %663, %667 : vector<16x16xi1>, vector<16x16xf32>
    %cst_155 = arith.constant -1.000000e+30 : f32
    %669 = vector.broadcast %cst_155 : f32 to vector<16x16xf32>
    %670 = arith.select %621, %668, %669 : vector<16x16xi1>, vector<16x16xf32>
    %cst_156 = arith.constant dense<0xFF800000> : vector<16xf32>
    %671 = vector.multi_reduction <maximumf>, %670, %cst_156 [1] : vector<16x16xf32> to vector<16xf32>
    %672 = vector.shape_cast %671 : vector<16xf32> to vector<16x1xf32>
    %673 = vector.broadcast %672 : vector<16x1xf32> to vector<16x16xf32>
    %674 = arith.subf %670, %673 : vector<16x16xf32>
    %675 = math.exp %674 : vector<16x16xf32>
    %676 = arith.mulf %619, %675 : vector<16x16xf32>
    %cst_157 = arith.constant dense<0.000000e+00> : vector<16xf32>
    %677 = vector.multi_reduction <add>, %676, %cst_157 [1] : vector<16x16xf32> to vector<16xf32>
    %678 = vector.shape_cast %677 : vector<16xf32> to vector<16x1xf32>
    %679 = tpu.reciprocal %678 {approx = true} : vector<16x1xf32> -> vector<16x1xf32>
    %680 = vector.broadcast %679 : vector<16x1xf32> to vector<16x16xf32>
    %681 = arith.mulf %676, %680 : vector<16x16xf32>
    %682 = vector.broadcast %27 : vector<1x32xf32> to vector<16x32xf32>
    %683 = arith.mulf %617, %682 : vector<16x32xf32>
    %684 = arith.truncf %681 : vector<16x16xf32> to vector<16x16xbf16>
    %685 = arith.truncf %683 : vector<16x32xf32> to vector<16x32xbf16>
    %cst_158 = arith.constant dense<0.000000e+00> : vector<16x32xf32>
    %686 = tpu.matmul %684, %685, %cst_158 {dimension_numbers = #tpu.dot_dimension_numbers<[1], [0], [0], [1], [0, 0, 1, 1], [], []>} : vector<16x16xbf16>, vector<16x32xbf16>, vector<16x32xf32> -> vector<16x32xf32>
    %687 = arith.addf %658, %686 : vector<16x32xf32>
    %688 = vector.extract_strided_slice %627 {offsets = [0, 2], sizes = [16, 1], strides = [1, 1]} : vector<16x4xf32> to vector<16x1xf32>
    %689 = vector.extract_strided_slice %628 {offsets = [2, 0], sizes = [1, 16], strides = [1, 1]} : vector<4x16xf32> to vector<1x16xf32>
    %690 = vector.broadcast %688 : vector<16x1xf32> to vector<16x16xf32>
    %691 = vector.broadcast %689 : vector<1x16xf32> to vector<16x16xf32>
    %692 = arith.addf %690, %691 : vector<16x16xf32>
    %cst_159 = arith.constant 0.000000e+00 : f32
    %693 = vector.broadcast %cst_159 : f32 to vector<16x16xf32>
    %694 = arith.cmpf oge, %692, %693 : vector<16x16xf32>
    %cst_160 = arith.constant 2.000000e-01 : f32
    %695 = vector.broadcast %cst_160 : f32 to vector<16x16xf32>
    %696 = arith.mulf %695, %692 : vector<16x16xf32>
    %697 = arith.select %694, %692, %696 : vector<16x16xi1>, vector<16x16xf32>
    %cst_161 = arith.constant -1.000000e+30 : f32
    %698 = vector.broadcast %cst_161 : f32 to vector<16x16xf32>
    %699 = arith.select %621, %697, %698 : vector<16x16xi1>, vector<16x16xf32>
    %cst_162 = arith.constant dense<0xFF800000> : vector<16xf32>
    %700 = vector.multi_reduction <maximumf>, %699, %cst_162 [1] : vector<16x16xf32> to vector<16xf32>
    %701 = vector.shape_cast %700 : vector<16xf32> to vector<16x1xf32>
    %702 = vector.broadcast %701 : vector<16x1xf32> to vector<16x16xf32>
    %703 = arith.subf %699, %702 : vector<16x16xf32>
    %704 = math.exp %703 : vector<16x16xf32>
    %705 = arith.mulf %619, %704 : vector<16x16xf32>
    %cst_163 = arith.constant dense<0.000000e+00> : vector<16xf32>
    %706 = vector.multi_reduction <add>, %705, %cst_163 [1] : vector<16x16xf32> to vector<16xf32>
    %707 = vector.shape_cast %706 : vector<16xf32> to vector<16x1xf32>
    %708 = tpu.reciprocal %707 {approx = true} : vector<16x1xf32> -> vector<16x1xf32>
    %709 = vector.broadcast %708 : vector<16x1xf32> to vector<16x16xf32>
    %710 = arith.mulf %705, %709 : vector<16x16xf32>
    %711 = vector.broadcast %34 : vector<1x32xf32> to vector<16x32xf32>
    %712 = arith.mulf %617, %711 : vector<16x32xf32>
    %713 = arith.truncf %710 : vector<16x16xf32> to vector<16x16xbf16>
    %714 = arith.truncf %712 : vector<16x32xf32> to vector<16x32xbf16>
    %cst_164 = arith.constant dense<0.000000e+00> : vector<16x32xf32>
    %715 = tpu.matmul %713, %714, %cst_164 {dimension_numbers = #tpu.dot_dimension_numbers<[1], [0], [0], [1], [0, 0, 1, 1], [], []>} : vector<16x16xbf16>, vector<16x32xbf16>, vector<16x32xf32> -> vector<16x32xf32>
    %716 = arith.addf %687, %715 : vector<16x32xf32>
    %717 = vector.extract_strided_slice %627 {offsets = [0, 3], sizes = [16, 1], strides = [1, 1]} : vector<16x4xf32> to vector<16x1xf32>
    %718 = vector.extract_strided_slice %628 {offsets = [3, 0], sizes = [1, 16], strides = [1, 1]} : vector<4x16xf32> to vector<1x16xf32>
    %719 = vector.broadcast %717 : vector<16x1xf32> to vector<16x16xf32>
    %720 = vector.broadcast %718 : vector<1x16xf32> to vector<16x16xf32>
    %721 = arith.addf %719, %720 : vector<16x16xf32>
    %cst_165 = arith.constant 0.000000e+00 : f32
    %722 = vector.broadcast %cst_165 : f32 to vector<16x16xf32>
    %723 = arith.cmpf oge, %721, %722 : vector<16x16xf32>
    %cst_166 = arith.constant 2.000000e-01 : f32
    %724 = vector.broadcast %cst_166 : f32 to vector<16x16xf32>
    %725 = arith.mulf %724, %721 : vector<16x16xf32>
    %726 = arith.select %723, %721, %725 : vector<16x16xi1>, vector<16x16xf32>
    %cst_167 = arith.constant -1.000000e+30 : f32
    %727 = vector.broadcast %cst_167 : f32 to vector<16x16xf32>
    %728 = arith.select %621, %726, %727 : vector<16x16xi1>, vector<16x16xf32>
    %cst_168 = arith.constant dense<0xFF800000> : vector<16xf32>
    %729 = vector.multi_reduction <maximumf>, %728, %cst_168 [1] : vector<16x16xf32> to vector<16xf32>
    %730 = vector.shape_cast %729 : vector<16xf32> to vector<16x1xf32>
    %731 = vector.broadcast %730 : vector<16x1xf32> to vector<16x16xf32>
    %732 = arith.subf %728, %731 : vector<16x16xf32>
    %733 = math.exp %732 : vector<16x16xf32>
    %734 = arith.mulf %619, %733 : vector<16x16xf32>
    %cst_169 = arith.constant dense<0.000000e+00> : vector<16xf32>
    %735 = vector.multi_reduction <add>, %734, %cst_169 [1] : vector<16x16xf32> to vector<16xf32>
    %736 = vector.shape_cast %735 : vector<16xf32> to vector<16x1xf32>
    %737 = tpu.reciprocal %736 {approx = true} : vector<16x1xf32> -> vector<16x1xf32>
    %738 = vector.broadcast %737 : vector<16x1xf32> to vector<16x16xf32>
    %739 = arith.mulf %734, %738 : vector<16x16xf32>
    %740 = vector.broadcast %41 : vector<1x32xf32> to vector<16x32xf32>
    %741 = arith.mulf %617, %740 : vector<16x32xf32>
    %742 = arith.truncf %739 : vector<16x16xf32> to vector<16x16xbf16>
    %743 = arith.truncf %741 : vector<16x32xf32> to vector<16x32xbf16>
    %cst_170 = arith.constant dense<0.000000e+00> : vector<16x32xf32>
    %744 = tpu.matmul %742, %743, %cst_170 {dimension_numbers = #tpu.dot_dimension_numbers<[1], [0], [0], [1], [0, 0, 1, 1], [], []>} : vector<16x16xbf16>, vector<16x32xbf16>, vector<16x32xf32> -> vector<16x32xf32>
    %745 = arith.addf %716, %744 : vector<16x32xf32>
    %746 = vector.broadcast %610 : vector<1x32xf32> to vector<16x32xf32>
    %747 = arith.addf %745, %746 : vector<16x32xf32>
    %cst_171 = arith.constant 5.000000e-01 : f32
    %748 = vector.broadcast %cst_171 : f32 to vector<16x32xf32>
    %749 = arith.mulf %748, %747 : vector<16x32xf32>
    %cst_172 = arith.constant 4.471500e-02 : f32
    %750 = vector.broadcast %cst_172 : f32 to vector<16x32xf32>
    %751 = arith.mulf %750, %747 : vector<16x32xf32>
    %752 = arith.mulf %751, %747 : vector<16x32xf32>
    %753 = arith.mulf %752, %747 : vector<16x32xf32>
    %754 = arith.addf %747, %753 : vector<16x32xf32>
    %cst_173 = arith.constant 0.797884583 : f32
    %755 = vector.broadcast %cst_173 : f32 to vector<16x32xf32>
    %756 = arith.mulf %755, %754 : vector<16x32xf32>
    %757 = math.tanh %756 : vector<16x32xf32>
    %cst_174 = arith.constant 1.000000e+00 : f32
    %758 = vector.broadcast %cst_174 : f32 to vector<16x32xf32>
    %759 = arith.addf %758, %757 : vector<16x32xf32>
    %760 = arith.mulf %749, %759 : vector<16x32xf32>
    %cst_175 = arith.constant dense<0.000000e+00> : vector<1xf32>
    %761 = vector.multi_reduction <add>, %557, %cst_175 [0] : vector<16x1xf32> to vector<1xf32>
    %762 = vector.shape_cast %761 : vector<1xf32> to vector<1x1xf32>
    %cst_176 = arith.constant 1.000000e+00 : f32
    %763 = vector.broadcast %cst_176 : f32 to vector<1x1xf32>
    %764 = arith.maximumf %762, %763 : vector<1x1xf32>
    %765 = tpu.reciprocal %764 {approx = true} : vector<1x1xf32> -> vector<1x1xf32>
    %766 = vector.broadcast %557 : vector<16x1xf32> to vector<16x32xf32>
    %767 = arith.mulf %760, %766 : vector<16x32xf32>
    %cst_177 = arith.constant dense<0.000000e+00> : vector<32xf32>
    %768 = vector.multi_reduction <add>, %767, %cst_177 [0] : vector<16x32xf32> to vector<32xf32>
    %769 = vector.shape_cast %768 : vector<32xf32> to vector<1x32xf32>
    %770 = vector.broadcast %765 : vector<1x1xf32> to vector<1x32xf32>
    %771 = arith.mulf %769, %770 : vector<1x32xf32>
    %772 = vector.broadcast %771 : vector<1x32xf32> to vector<16x32xf32>
    %773 = arith.subf %760, %772 : vector<16x32xf32>
    %774 = arith.mulf %773, %773 : vector<16x32xf32>
    %775 = vector.broadcast %557 : vector<16x1xf32> to vector<16x32xf32>
    %776 = arith.mulf %774, %775 : vector<16x32xf32>
    %cst_178 = arith.constant dense<0.000000e+00> : vector<32xf32>
    %777 = vector.multi_reduction <add>, %776, %cst_178 [0] : vector<16x32xf32> to vector<32xf32>
    %778 = vector.shape_cast %777 : vector<32xf32> to vector<1x32xf32>
    %779 = vector.broadcast %765 : vector<1x1xf32> to vector<1x32xf32>
    %780 = arith.mulf %778, %779 : vector<1x32xf32>
    %cst_179 = arith.constant 9.99999974E-6 : f32
    %781 = vector.broadcast %cst_179 : f32 to vector<1x32xf32>
    %782 = arith.addf %780, %781 : vector<1x32xf32>
    %783 = math.rsqrt %782 : vector<1x32xf32>
    %784 = vector.broadcast %783 : vector<1x32xf32> to vector<16x32xf32>
    %785 = arith.mulf %773, %784 : vector<16x32xf32>
    %786 = vector.broadcast %611 : vector<1x32xf32> to vector<16x32xf32>
    %787 = arith.mulf %786, %785 : vector<16x32xf32>
    %788 = vector.broadcast %612 : vector<1x32xf32> to vector<16x32xf32>
    %789 = arith.addf %787, %788 : vector<16x32xf32>
    %790 = arith.mulf %613, %613 : vector<1x32xf32>
    %cst_180 = arith.constant dense<0.000000e+00> : vector<1xf32>
    %791 = vector.multi_reduction <add>, %790, %cst_180 [1] : vector<1x32xf32> to vector<1xf32>
    %792 = vector.shape_cast %791 : vector<1xf32> to vector<1x1xf32>
    %793 = math.rsqrt %792 : vector<1x1xf32>
    %794 = vector.broadcast %613 : vector<1x32xf32> to vector<16x32xf32>
    %795 = arith.mulf %789, %794 : vector<16x32xf32>
    %cst_181 = arith.constant dense<0.000000e+00> : vector<16xf32>
    %796 = vector.multi_reduction <add>, %795, %cst_181 [1] : vector<16x32xf32> to vector<16xf32>
    %797 = vector.shape_cast %796 : vector<16xf32> to vector<16x1xf32>
    %798 = vector.broadcast %793 : vector<1x1xf32> to vector<16x1xf32>
    %799 = arith.mulf %797, %798 : vector<16x1xf32>
    %800 = math.tanh %799 : vector<16x1xf32>
    %801 = tpu.transpose %800, [1, 0] : vector<16x1xf32> -> vector<1x16xf32>
    %802 = vector.broadcast %558 : vector<1x16xf32> to vector<16x16xf32>
    %803 = arith.mulf %67, %802 : vector<16x16xf32>
    %804 = vector.broadcast %801 : vector<1x16xf32> to vector<16x16xf32>
    %805 = vector.broadcast %800 : vector<16x1xf32> to vector<16x16xf32>
    %806 = arith.cmpf ogt, %804, %805 : vector<16x16xf32>
    %807 = vector.broadcast %801 : vector<1x16xf32> to vector<16x16xf32>
    %808 = vector.broadcast %800 : vector<16x1xf32> to vector<16x16xf32>
    %809 = arith.cmpf oeq, %807, %808 : vector<16x16xf32>
    %810 = arith.andi %809, %12 : vector<16x16xi1>
    %811 = arith.ori %806, %810 : vector<16x16xi1>
    %812 = arith.extui %811 : vector<16x16xi1> to vector<16x16xi32>
    %813 = arith.sitofp %812 : vector<16x16xi32> to vector<16x16xf32>
    %814 = arith.mulf %803, %813 : vector<16x16xf32>
    %cst_182 = arith.constant dense<0.000000e+00> : vector<16xf32>
    %815 = vector.multi_reduction <add>, %814, %cst_182 [1] : vector<16x16xf32> to vector<16xf32>
    %816 = vector.shape_cast %815 : vector<16xf32> to vector<16x1xf32>
    %cst_183 = arith.constant dense<0.000000e+00> : vector<16xf32>
    %817 = vector.multi_reduction <add>, %803, %cst_183 [1] : vector<16x16xf32> to vector<16xf32>
    %818 = vector.shape_cast %817 : vector<16xf32> to vector<16x1xf32>
    %cst_184 = arith.constant 5.000000e-01 : f32
    %819 = vector.broadcast %cst_184 : f32 to vector<16x1xf32>
    %820 = arith.mulf %819, %818 : vector<16x1xf32>
    %821 = math.ceil %820 : vector<16x1xf32>
    %822 = arith.cmpf olt, %816, %821 : vector<16x1xf32>
    %823 = arith.extui %822 : vector<16x1xi1> to vector<16x1xi32>
    %824 = arith.sitofp %823 : vector<16x1xi32> to vector<16x1xf32>
    %825 = arith.mulf %557, %824 : vector<16x1xf32>
    %826 = tpu.transpose %825, [1, 0] : vector<16x1xf32> -> vector<1x16xf32>
    %827 = vector.broadcast %800 : vector<16x1xf32> to vector<16x32xf32>
    %828 = arith.mulf %789, %827 : vector<16x32xf32>
    %829 = vector.broadcast %825 : vector<16x1xf32> to vector<16x32xf32>
    %830 = arith.mulf %828, %829 : vector<16x32xf32>
    %831 = vector.broadcast %825 : vector<16x1xf32> to vector<16x16xf32>
    %832 = arith.mulf %566, %831 : vector<16x16xf32>
    %833 = vector.broadcast %826 : vector<1x16xf32> to vector<16x16xf32>
    %834 = arith.mulf %832, %833 : vector<16x16xf32>
    %835 = vector.broadcast %825 : vector<16x1xf32> to vector<16x2xf32>
    %836 = arith.mulf %3, %835 : vector<16x2xf32>
    %837 = vector.broadcast %826 : vector<1x16xf32> to vector<2x16xf32>
    %838 = arith.mulf %55, %837 : vector<2x16xf32>
    %cst_185 = arith.constant dense<0.000000e+00> : vector<2xf32>
    %839 = vector.multi_reduction <add>, %838, %cst_185 [1] : vector<2x16xf32> to vector<2xf32>
    %840 = vector.shape_cast %839 : vector<2xf32> to vector<2x1xf32>
    %cst_186 = arith.constant 1.000000e+00 : f32
    %841 = vector.broadcast %cst_186 : f32 to vector<2x1xf32>
    %842 = arith.maximumf %840, %841 : vector<2x1xf32>
    %843 = tpu.reciprocal %842 {approx = true} : vector<2x1xf32> -> vector<2x1xf32>
    %cst_187 = arith.constant dense<0.000000e+00> : vector<2x32xf32>
    %844 = tpu.matmul %838, %830, %cst_187 {dimension_numbers = #tpu.dot_dimension_numbers<[1], [0], [0], [1], [0, 0, 1, 1], [], []>} : vector<2x16xf32>, vector<16x32xf32>, vector<2x32xf32> -> vector<2x32xf32>
    %845 = vector.broadcast %843 : vector<2x1xf32> to vector<2x32xf32>
    %846 = arith.mulf %844, %845 : vector<2x32xf32>
    %847 = vector.extract_strided_slice %836 {offsets = [0, 0], sizes = [16, 1], strides = [1, 1]} : vector<16x2xf32> to vector<16x1xf32>
    %cst_188 = arith.constant 0.000000e+00 : f32
    %848 = vector.broadcast %cst_188 : f32 to vector<16x1xf32>
    %849 = arith.cmpf ogt, %847, %848 : vector<16x1xf32>
    %cst_189 = arith.constant -1.000000e+30 : f32
    %850 = vector.shape_cast %849 : vector<16x1xi1> to vector<16x1xi1>
    %851 = vector.broadcast %850 : vector<16x1xi1> to vector<16x32xi1>
    %852 = vector.broadcast %cst_189 : f32 to vector<16x32xf32>
    %853 = arith.select %851, %830, %852 : vector<16x32xi1>, vector<16x32xf32>
    %cst_190 = arith.constant dense<0xFF800000> : vector<32xf32>
    %854 = vector.multi_reduction <maximumf>, %853, %cst_190 [0] : vector<16x32xf32> to vector<32xf32>
    %855 = vector.shape_cast %854 : vector<32xf32> to vector<1x32xf32>
    %c0_191 = arith.constant 0 : index
    %c0_192 = arith.constant 0 : index
    %856 = vector.load %arg12[%c0_191, %c0_192] : memref<2x32xf32, #tpu.memory_space<vmem>>, vector<1x32xf32>
    tpu.vector_store %arg12[%c0_191, %c0_192], %855 {strides = array<i32>} : memref<2x32xf32, #tpu.memory_space<vmem>>, vector<1x32xf32>,
    %857 = vector.extract_strided_slice %836 {offsets = [0, 1], sizes = [16, 1], strides = [1, 1]} : vector<16x2xf32> to vector<16x1xf32>
    %cst_193 = arith.constant 0.000000e+00 : f32
    %858 = vector.broadcast %cst_193 : f32 to vector<16x1xf32>
    %859 = arith.cmpf ogt, %857, %858 : vector<16x1xf32>
    %cst_194 = arith.constant -1.000000e+30 : f32
    %860 = vector.shape_cast %859 : vector<16x1xi1> to vector<16x1xi1>
    %861 = vector.broadcast %860 : vector<16x1xi1> to vector<16x32xi1>
    %862 = vector.broadcast %cst_194 : f32 to vector<16x32xf32>
    %863 = arith.select %861, %830, %862 : vector<16x32xi1>, vector<16x32xf32>
    %cst_195 = arith.constant dense<0xFF800000> : vector<32xf32>
    %864 = vector.multi_reduction <maximumf>, %863, %cst_195 [0] : vector<16x32xf32> to vector<32xf32>
    %865 = vector.shape_cast %864 : vector<32xf32> to vector<1x32xf32>
    %c1_196 = arith.constant 1 : index
    %c0_197 = arith.constant 0 : index
    %866 = vector.load %arg12[%c1_196, %c0_197] : memref<2x32xf32, #tpu.memory_space<vmem>>, vector<1x32xf32>
    tpu.vector_store %arg12[%c1_196, %c0_197], %865 {strides = array<i32>} : memref<2x32xf32, #tpu.memory_space<vmem>>, vector<1x32xf32>,
    %cst_198 = arith.constant 0.000000e+00 : f32
    %867 = vector.broadcast %cst_198 : f32 to vector<2x1xf32>
    %868 = arith.cmpf ogt, %840, %867 : vector<2x1xf32>
    %c0_199 = arith.constant 0 : index
    %c0_200 = arith.constant 0 : index
    %869 = vector.load %arg12[%c0_199, %c0_200] : memref<2x32xf32, #tpu.memory_space<vmem>>, vector<2x32xf32>
    %cst_201 = arith.constant 0.000000e+00 : f32
    %870 = vector.shape_cast %868 : vector<2x1xi1> to vector<2x1xi1>
    %871 = vector.broadcast %870 : vector<2x1xi1> to vector<2x32xi1>
    %872 = vector.broadcast %cst_201 : f32 to vector<2x32xf32>
    %873 = arith.select %871, %869, %872 : vector<2x32xi1>, vector<2x32xf32>
    %874 = arith.addf %606, %873 : vector<2x32xf32>
    %875 = arith.addf %607, %846 : vector<2x32xf32>
    %876 = vector.extract_strided_slice %4 {offsets = [18, 0], sizes = [1, 32], strides = [1, 1]} : vector<24x32xf32> to vector<1x32xf32>
    %877 = vector.extract_strided_slice %4 {offsets = [19, 0], sizes = [1, 32], strides = [1, 1]} : vector<24x32xf32> to vector<1x32xf32>
    %878 = vector.extract_strided_slice %4 {offsets = [20, 0], sizes = [1, 32], strides = [1, 1]} : vector<24x32xf32> to vector<1x32xf32>
    %879 = vector.extract_strided_slice %4 {offsets = [21, 0], sizes = [1, 32], strides = [1, 1]} : vector<24x32xf32> to vector<1x32xf32>
    %880 = vector.extract_strided_slice %4 {offsets = [22, 0], sizes = [1, 32], strides = [1, 1]} : vector<24x32xf32> to vector<1x32xf32>
    %881 = vector.extract_strided_slice %4 {offsets = [23, 0], sizes = [1, 32], strides = [1, 1]} : vector<24x32xf32> to vector<1x32xf32>
    %c0_202 = arith.constant 0 : index
    %c0_203 = arith.constant 0 : index
    %882 = vector.load %arg6[%c0_202, %c0_203] : memref<32x32xf32, #tpu.memory_space<vmem>>, vector<32x32xf32>
    %883 = arith.truncf %830 : vector<16x32xf32> to vector<16x32xbf16>
    %884 = arith.truncf %882 : vector<32x32xf32> to vector<32x32xbf16>
    %cst_204 = arith.constant dense<0.000000e+00> : vector<16x32xf32>
    %885 = tpu.matmul %883, %884, %cst_204 {dimension_numbers = #tpu.dot_dimension_numbers<[1], [0], [0], [1], [0, 0, 1, 1], [], []>} : vector<16x32xbf16>, vector<32x32xbf16>, vector<16x32xf32> -> vector<16x32xf32>
    %886 = arith.mulf %834, %11 : vector<16x16xf32>
    %887 = arith.addf %886, %9 : vector<16x16xf32>
    %cst_205 = arith.constant 0.000000e+00 : f32
    %888 = vector.broadcast %cst_205 : f32 to vector<16x16xf32>
    %889 = arith.cmpf ogt, %887, %888 : vector<16x16xf32>
    %890 = vector.broadcast %876 : vector<1x32xf32> to vector<16x32xf32>
    %891 = arith.mulf %885, %890 : vector<16x32xf32>
    %cst_206 = arith.constant dense<0.000000e+00> : vector<16x4xf32>
    %892 = tpu.matmul %891, %54, %cst_206 {dimension_numbers = #tpu.dot_dimension_numbers<[1], [0], [0], [1], [0, 0, 1, 1], [], []>} : vector<16x32xf32>, vector<32x4xf32>, vector<16x4xf32> -> vector<16x4xf32>
    %893 = vector.broadcast %877 : vector<1x32xf32> to vector<16x32xf32>
    %894 = arith.mulf %885, %893 : vector<16x32xf32>
    %cst_207 = arith.constant dense<0.000000e+00> : vector<16x4xf32>
    %895 = tpu.matmul %894, %54, %cst_207 {dimension_numbers = #tpu.dot_dimension_numbers<[1], [0], [0], [1], [0, 0, 1, 1], [], []>} : vector<16x32xf32>, vector<32x4xf32>, vector<16x4xf32> -> vector<16x4xf32>
    %896 = tpu.transpose %892, [1, 0] : vector<16x4xf32> -> vector<4x16xf32>
    %cst_208 = arith.constant 0.000000e+00 : f32
    %897 = vector.broadcast %cst_208 : f32 to vector<16x32xf32>
    %898 = vector.extract_strided_slice %895 {offsets = [0, 0], sizes = [16, 1], strides = [1, 1]} : vector<16x4xf32> to vector<16x1xf32>
    %899 = vector.extract_strided_slice %896 {offsets = [0, 0], sizes = [1, 16], strides = [1, 1]} : vector<4x16xf32> to vector<1x16xf32>
    %900 = vector.broadcast %898 : vector<16x1xf32> to vector<16x16xf32>
    %901 = vector.broadcast %899 : vector<1x16xf32> to vector<16x16xf32>
    %902 = arith.addf %900, %901 : vector<16x16xf32>
    %cst_209 = arith.constant 0.000000e+00 : f32
    %903 = vector.broadcast %cst_209 : f32 to vector<16x16xf32>
    %904 = arith.cmpf oge, %902, %903 : vector<16x16xf32>
    %cst_210 = arith.constant 2.000000e-01 : f32
    %905 = vector.broadcast %cst_210 : f32 to vector<16x16xf32>
    %906 = arith.mulf %905, %902 : vector<16x16xf32>
    %907 = arith.select %904, %902, %906 : vector<16x16xi1>, vector<16x16xf32>
    %cst_211 = arith.constant -1.000000e+30 : f32
    %908 = vector.broadcast %cst_211 : f32 to vector<16x16xf32>
    %909 = arith.select %889, %907, %908 : vector<16x16xi1>, vector<16x16xf32>
    %cst_212 = arith.constant dense<0xFF800000> : vector<16xf32>
    %910 = vector.multi_reduction <maximumf>, %909, %cst_212 [1] : vector<16x16xf32> to vector<16xf32>
    %911 = vector.shape_cast %910 : vector<16xf32> to vector<16x1xf32>
    %912 = vector.broadcast %911 : vector<16x1xf32> to vector<16x16xf32>
    %913 = arith.subf %909, %912 : vector<16x16xf32>
    %914 = math.exp %913 : vector<16x16xf32>
    %915 = arith.mulf %887, %914 : vector<16x16xf32>
    %cst_213 = arith.constant dense<0.000000e+00> : vector<16xf32>
    %916 = vector.multi_reduction <add>, %915, %cst_213 [1] : vector<16x16xf32> to vector<16xf32>
    %917 = vector.shape_cast %916 : vector<16xf32> to vector<16x1xf32>
    %918 = tpu.reciprocal %917 {approx = true} : vector<16x1xf32> -> vector<16x1xf32>
    %919 = vector.broadcast %918 : vector<16x1xf32> to vector<16x16xf32>
    %920 = arith.mulf %915, %919 : vector<16x16xf32>
    %921 = vector.broadcast %20 : vector<1x32xf32> to vector<16x32xf32>
    %922 = arith.mulf %885, %921 : vector<16x32xf32>
    %923 = arith.truncf %920 : vector<16x16xf32> to vector<16x16xbf16>
    %924 = arith.truncf %922 : vector<16x32xf32> to vector<16x32xbf16>
    %cst_214 = arith.constant dense<0.000000e+00> : vector<16x32xf32>
    %925 = tpu.matmul %923, %924, %cst_214 {dimension_numbers = #tpu.dot_dimension_numbers<[1], [0], [0], [1], [0, 0, 1, 1], [], []>} : vector<16x16xbf16>, vector<16x32xbf16>, vector<16x32xf32> -> vector<16x32xf32>
    %926 = arith.addf %897, %925 : vector<16x32xf32>
    %927 = vector.extract_strided_slice %895 {offsets = [0, 1], sizes = [16, 1], strides = [1, 1]} : vector<16x4xf32> to vector<16x1xf32>
    %928 = vector.extract_strided_slice %896 {offsets = [1, 0], sizes = [1, 16], strides = [1, 1]} : vector<4x16xf32> to vector<1x16xf32>
    %929 = vector.broadcast %927 : vector<16x1xf32> to vector<16x16xf32>
    %930 = vector.broadcast %928 : vector<1x16xf32> to vector<16x16xf32>
    %931 = arith.addf %929, %930 : vector<16x16xf32>
    %cst_215 = arith.constant 0.000000e+00 : f32
    %932 = vector.broadcast %cst_215 : f32 to vector<16x16xf32>
    %933 = arith.cmpf oge, %931, %932 : vector<16x16xf32>
    %cst_216 = arith.constant 2.000000e-01 : f32
    %934 = vector.broadcast %cst_216 : f32 to vector<16x16xf32>
    %935 = arith.mulf %934, %931 : vector<16x16xf32>
    %936 = arith.select %933, %931, %935 : vector<16x16xi1>, vector<16x16xf32>
    %cst_217 = arith.constant -1.000000e+30 : f32
    %937 = vector.broadcast %cst_217 : f32 to vector<16x16xf32>
    %938 = arith.select %889, %936, %937 : vector<16x16xi1>, vector<16x16xf32>
    %cst_218 = arith.constant dense<0xFF800000> : vector<16xf32>
    %939 = vector.multi_reduction <maximumf>, %938, %cst_218 [1] : vector<16x16xf32> to vector<16xf32>
    %940 = vector.shape_cast %939 : vector<16xf32> to vector<16x1xf32>
    %941 = vector.broadcast %940 : vector<16x1xf32> to vector<16x16xf32>
    %942 = arith.subf %938, %941 : vector<16x16xf32>
    %943 = math.exp %942 : vector<16x16xf32>
    %944 = arith.mulf %887, %943 : vector<16x16xf32>
    %cst_219 = arith.constant dense<0.000000e+00> : vector<16xf32>
    %945 = vector.multi_reduction <add>, %944, %cst_219 [1] : vector<16x16xf32> to vector<16xf32>
    %946 = vector.shape_cast %945 : vector<16xf32> to vector<16x1xf32>
    %947 = tpu.reciprocal %946 {approx = true} : vector<16x1xf32> -> vector<16x1xf32>
    %948 = vector.broadcast %947 : vector<16x1xf32> to vector<16x16xf32>
    %949 = arith.mulf %944, %948 : vector<16x16xf32>
    %950 = vector.broadcast %27 : vector<1x32xf32> to vector<16x32xf32>
    %951 = arith.mulf %885, %950 : vector<16x32xf32>
    %952 = arith.truncf %949 : vector<16x16xf32> to vector<16x16xbf16>
    %953 = arith.truncf %951 : vector<16x32xf32> to vector<16x32xbf16>
    %cst_220 = arith.constant dense<0.000000e+00> : vector<16x32xf32>
    %954 = tpu.matmul %952, %953, %cst_220 {dimension_numbers = #tpu.dot_dimension_numbers<[1], [0], [0], [1], [0, 0, 1, 1], [], []>} : vector<16x16xbf16>, vector<16x32xbf16>, vector<16x32xf32> -> vector<16x32xf32>
    %955 = arith.addf %926, %954 : vector<16x32xf32>
    %956 = vector.extract_strided_slice %895 {offsets = [0, 2], sizes = [16, 1], strides = [1, 1]} : vector<16x4xf32> to vector<16x1xf32>
    %957 = vector.extract_strided_slice %896 {offsets = [2, 0], sizes = [1, 16], strides = [1, 1]} : vector<4x16xf32> to vector<1x16xf32>
    %958 = vector.broadcast %956 : vector<16x1xf32> to vector<16x16xf32>
    %959 = vector.broadcast %957 : vector<1x16xf32> to vector<16x16xf32>
    %960 = arith.addf %958, %959 : vector<16x16xf32>
    %cst_221 = arith.constant 0.000000e+00 : f32
    %961 = vector.broadcast %cst_221 : f32 to vector<16x16xf32>
    %962 = arith.cmpf oge, %960, %961 : vector<16x16xf32>
    %cst_222 = arith.constant 2.000000e-01 : f32
    %963 = vector.broadcast %cst_222 : f32 to vector<16x16xf32>
    %964 = arith.mulf %963, %960 : vector<16x16xf32>
    %965 = arith.select %962, %960, %964 : vector<16x16xi1>, vector<16x16xf32>
    %cst_223 = arith.constant -1.000000e+30 : f32
    %966 = vector.broadcast %cst_223 : f32 to vector<16x16xf32>
    %967 = arith.select %889, %965, %966 : vector<16x16xi1>, vector<16x16xf32>
    %cst_224 = arith.constant dense<0xFF800000> : vector<16xf32>
    %968 = vector.multi_reduction <maximumf>, %967, %cst_224 [1] : vector<16x16xf32> to vector<16xf32>
    %969 = vector.shape_cast %968 : vector<16xf32> to vector<16x1xf32>
    %970 = vector.broadcast %969 : vector<16x1xf32> to vector<16x16xf32>
    %971 = arith.subf %967, %970 : vector<16x16xf32>
    %972 = math.exp %971 : vector<16x16xf32>
    %973 = arith.mulf %887, %972 : vector<16x16xf32>
    %cst_225 = arith.constant dense<0.000000e+00> : vector<16xf32>
    %974 = vector.multi_reduction <add>, %973, %cst_225 [1] : vector<16x16xf32> to vector<16xf32>
    %975 = vector.shape_cast %974 : vector<16xf32> to vector<16x1xf32>
    %976 = tpu.reciprocal %975 {approx = true} : vector<16x1xf32> -> vector<16x1xf32>
    %977 = vector.broadcast %976 : vector<16x1xf32> to vector<16x16xf32>
    %978 = arith.mulf %973, %977 : vector<16x16xf32>
    %979 = vector.broadcast %34 : vector<1x32xf32> to vector<16x32xf32>
    %980 = arith.mulf %885, %979 : vector<16x32xf32>
    %981 = arith.truncf %978 : vector<16x16xf32> to vector<16x16xbf16>
    %982 = arith.truncf %980 : vector<16x32xf32> to vector<16x32xbf16>
    %cst_226 = arith.constant dense<0.000000e+00> : vector<16x32xf32>
    %983 = tpu.matmul %981, %982, %cst_226 {dimension_numbers = #tpu.dot_dimension_numbers<[1], [0], [0], [1], [0, 0, 1, 1], [], []>} : vector<16x16xbf16>, vector<16x32xbf16>, vector<16x32xf32> -> vector<16x32xf32>
    %984 = arith.addf %955, %983 : vector<16x32xf32>
    %985 = vector.extract_strided_slice %895 {offsets = [0, 3], sizes = [16, 1], strides = [1, 1]} : vector<16x4xf32> to vector<16x1xf32>
    %986 = vector.extract_strided_slice %896 {offsets = [3, 0], sizes = [1, 16], strides = [1, 1]} : vector<4x16xf32> to vector<1x16xf32>
    %987 = vector.broadcast %985 : vector<16x1xf32> to vector<16x16xf32>
    %988 = vector.broadcast %986 : vector<1x16xf32> to vector<16x16xf32>
    %989 = arith.addf %987, %988 : vector<16x16xf32>
    %cst_227 = arith.constant 0.000000e+00 : f32
    %990 = vector.broadcast %cst_227 : f32 to vector<16x16xf32>
    %991 = arith.cmpf oge, %989, %990 : vector<16x16xf32>
    %cst_228 = arith.constant 2.000000e-01 : f32
    %992 = vector.broadcast %cst_228 : f32 to vector<16x16xf32>
    %993 = arith.mulf %992, %989 : vector<16x16xf32>
    %994 = arith.select %991, %989, %993 : vector<16x16xi1>, vector<16x16xf32>
    %cst_229 = arith.constant -1.000000e+30 : f32
    %995 = vector.broadcast %cst_229 : f32 to vector<16x16xf32>
    %996 = arith.select %889, %994, %995 : vector<16x16xi1>, vector<16x16xf32>
    %cst_230 = arith.constant dense<0xFF800000> : vector<16xf32>
    %997 = vector.multi_reduction <maximumf>, %996, %cst_230 [1] : vector<16x16xf32> to vector<16xf32>
    %998 = vector.shape_cast %997 : vector<16xf32> to vector<16x1xf32>
    %999 = vector.broadcast %998 : vector<16x1xf32> to vector<16x16xf32>
    %1000 = arith.subf %996, %999 : vector<16x16xf32>
    %1001 = math.exp %1000 : vector<16x16xf32>
    %1002 = arith.mulf %887, %1001 : vector<16x16xf32>
    %cst_231 = arith.constant dense<0.000000e+00> : vector<16xf32>
    %1003 = vector.multi_reduction <add>, %1002, %cst_231 [1] : vector<16x16xf32> to vector<16xf32>
    %1004 = vector.shape_cast %1003 : vector<16xf32> to vector<16x1xf32>
    %1005 = tpu.reciprocal %1004 {approx = true} : vector<16x1xf32> -> vector<16x1xf32>
    %1006 = vector.broadcast %1005 : vector<16x1xf32> to vector<16x16xf32>
    %1007 = arith.mulf %1002, %1006 : vector<16x16xf32>
    %1008 = vector.broadcast %41 : vector<1x32xf32> to vector<16x32xf32>
    %1009 = arith.mulf %885, %1008 : vector<16x32xf32>
    %1010 = arith.truncf %1007 : vector<16x16xf32> to vector<16x16xbf16>
    %1011 = arith.truncf %1009 : vector<16x32xf32> to vector<16x32xbf16>
    %cst_232 = arith.constant dense<0.000000e+00> : vector<16x32xf32>
    %1012 = tpu.matmul %1010, %1011, %cst_232 {dimension_numbers = #tpu.dot_dimension_numbers<[1], [0], [0], [1], [0, 0, 1, 1], [], []>} : vector<16x16xbf16>, vector<16x32xbf16>, vector<16x32xf32> -> vector<16x32xf32>
    %1013 = arith.addf %984, %1012 : vector<16x32xf32>
    %1014 = vector.broadcast %878 : vector<1x32xf32> to vector<16x32xf32>
    %1015 = arith.addf %1013, %1014 : vector<16x32xf32>
    %cst_233 = arith.constant 5.000000e-01 : f32
    %1016 = vector.broadcast %cst_233 : f32 to vector<16x32xf32>
    %1017 = arith.mulf %1016, %1015 : vector<16x32xf32>
    %cst_234 = arith.constant 4.471500e-02 : f32
    %1018 = vector.broadcast %cst_234 : f32 to vector<16x32xf32>
    %1019 = arith.mulf %1018, %1015 : vector<16x32xf32>
    %1020 = arith.mulf %1019, %1015 : vector<16x32xf32>
    %1021 = arith.mulf %1020, %1015 : vector<16x32xf32>
    %1022 = arith.addf %1015, %1021 : vector<16x32xf32>
    %cst_235 = arith.constant 0.797884583 : f32
    %1023 = vector.broadcast %cst_235 : f32 to vector<16x32xf32>
    %1024 = arith.mulf %1023, %1022 : vector<16x32xf32>
    %1025 = math.tanh %1024 : vector<16x32xf32>
    %cst_236 = arith.constant 1.000000e+00 : f32
    %1026 = vector.broadcast %cst_236 : f32 to vector<16x32xf32>
    %1027 = arith.addf %1026, %1025 : vector<16x32xf32>
    %1028 = arith.mulf %1017, %1027 : vector<16x32xf32>
    %cst_237 = arith.constant dense<0.000000e+00> : vector<1xf32>
    %1029 = vector.multi_reduction <add>, %825, %cst_237 [0] : vector<16x1xf32> to vector<1xf32>
    %1030 = vector.shape_cast %1029 : vector<1xf32> to vector<1x1xf32>
    %cst_238 = arith.constant 1.000000e+00 : f32
    %1031 = vector.broadcast %cst_238 : f32 to vector<1x1xf32>
    %1032 = arith.maximumf %1030, %1031 : vector<1x1xf32>
    %1033 = tpu.reciprocal %1032 {approx = true} : vector<1x1xf32> -> vector<1x1xf32>
    %1034 = vector.broadcast %825 : vector<16x1xf32> to vector<16x32xf32>
    %1035 = arith.mulf %1028, %1034 : vector<16x32xf32>
    %cst_239 = arith.constant dense<0.000000e+00> : vector<32xf32>
    %1036 = vector.multi_reduction <add>, %1035, %cst_239 [0] : vector<16x32xf32> to vector<32xf32>
    %1037 = vector.shape_cast %1036 : vector<32xf32> to vector<1x32xf32>
    %1038 = vector.broadcast %1033 : vector<1x1xf32> to vector<1x32xf32>
    %1039 = arith.mulf %1037, %1038 : vector<1x32xf32>
    %1040 = vector.broadcast %1039 : vector<1x32xf32> to vector<16x32xf32>
    %1041 = arith.subf %1028, %1040 : vector<16x32xf32>
    %1042 = arith.mulf %1041, %1041 : vector<16x32xf32>
    %1043 = vector.broadcast %825 : vector<16x1xf32> to vector<16x32xf32>
    %1044 = arith.mulf %1042, %1043 : vector<16x32xf32>
    %cst_240 = arith.constant dense<0.000000e+00> : vector<32xf32>
    %1045 = vector.multi_reduction <add>, %1044, %cst_240 [0] : vector<16x32xf32> to vector<32xf32>
    %1046 = vector.shape_cast %1045 : vector<32xf32> to vector<1x32xf32>
    %1047 = vector.broadcast %1033 : vector<1x1xf32> to vector<1x32xf32>
    %1048 = arith.mulf %1046, %1047 : vector<1x32xf32>
    %cst_241 = arith.constant 9.99999974E-6 : f32
    %1049 = vector.broadcast %cst_241 : f32 to vector<1x32xf32>
    %1050 = arith.addf %1048, %1049 : vector<1x32xf32>
    %1051 = math.rsqrt %1050 : vector<1x32xf32>
    %1052 = vector.broadcast %1051 : vector<1x32xf32> to vector<16x32xf32>
    %1053 = arith.mulf %1041, %1052 : vector<16x32xf32>
    %1054 = vector.broadcast %879 : vector<1x32xf32> to vector<16x32xf32>
    %1055 = arith.mulf %1054, %1053 : vector<16x32xf32>
    %1056 = vector.broadcast %880 : vector<1x32xf32> to vector<16x32xf32>
    %1057 = arith.addf %1055, %1056 : vector<16x32xf32>
    %1058 = arith.mulf %881, %881 : vector<1x32xf32>
    %cst_242 = arith.constant dense<0.000000e+00> : vector<1xf32>
    %1059 = vector.multi_reduction <add>, %1058, %cst_242 [1] : vector<1x32xf32> to vector<1xf32>
    %1060 = vector.shape_cast %1059 : vector<1xf32> to vector<1x1xf32>
    %1061 = math.rsqrt %1060 : vector<1x1xf32>
    %1062 = vector.broadcast %881 : vector<1x32xf32> to vector<16x32xf32>
    %1063 = arith.mulf %1057, %1062 : vector<16x32xf32>
    %cst_243 = arith.constant dense<0.000000e+00> : vector<16xf32>
    %1064 = vector.multi_reduction <add>, %1063, %cst_243 [1] : vector<16x32xf32> to vector<16xf32>
    %1065 = vector.shape_cast %1064 : vector<16xf32> to vector<16x1xf32>
    %1066 = vector.broadcast %1061 : vector<1x1xf32> to vector<16x1xf32>
    %1067 = arith.mulf %1065, %1066 : vector<16x1xf32>
    %1068 = math.tanh %1067 : vector<16x1xf32>
    %1069 = tpu.transpose %1068, [1, 0] : vector<16x1xf32> -> vector<1x16xf32>
    %1070 = vector.broadcast %826 : vector<1x16xf32> to vector<16x16xf32>
    %1071 = arith.mulf %67, %1070 : vector<16x16xf32>
    %1072 = vector.broadcast %1069 : vector<1x16xf32> to vector<16x16xf32>
    %1073 = vector.broadcast %1068 : vector<16x1xf32> to vector<16x16xf32>
    %1074 = arith.cmpf ogt, %1072, %1073 : vector<16x16xf32>
    %1075 = vector.broadcast %1069 : vector<1x16xf32> to vector<16x16xf32>
    %1076 = vector.broadcast %1068 : vector<16x1xf32> to vector<16x16xf32>
    %1077 = arith.cmpf oeq, %1075, %1076 : vector<16x16xf32>
    %1078 = arith.andi %1077, %12 : vector<16x16xi1>
    %1079 = arith.ori %1074, %1078 : vector<16x16xi1>
    %1080 = arith.extui %1079 : vector<16x16xi1> to vector<16x16xi32>
    %1081 = arith.sitofp %1080 : vector<16x16xi32> to vector<16x16xf32>
    %1082 = arith.mulf %1071, %1081 : vector<16x16xf32>
    %cst_244 = arith.constant dense<0.000000e+00> : vector<16xf32>
    %1083 = vector.multi_reduction <add>, %1082, %cst_244 [1] : vector<16x16xf32> to vector<16xf32>
    %1084 = vector.shape_cast %1083 : vector<16xf32> to vector<16x1xf32>
    %cst_245 = arith.constant dense<0.000000e+00> : vector<16xf32>
    %1085 = vector.multi_reduction <add>, %1071, %cst_245 [1] : vector<16x16xf32> to vector<16xf32>
    %1086 = vector.shape_cast %1085 : vector<16xf32> to vector<16x1xf32>
    %cst_246 = arith.constant 5.000000e-01 : f32
    %1087 = vector.broadcast %cst_246 : f32 to vector<16x1xf32>
    %1088 = arith.mulf %1087, %1086 : vector<16x1xf32>
    %1089 = math.ceil %1088 : vector<16x1xf32>
    %1090 = arith.cmpf olt, %1084, %1089 : vector<16x1xf32>
    %1091 = arith.extui %1090 : vector<16x1xi1> to vector<16x1xi32>
    %1092 = arith.sitofp %1091 : vector<16x1xi32> to vector<16x1xf32>
    %1093 = arith.mulf %825, %1092 : vector<16x1xf32>
    %1094 = tpu.transpose %1093, [1, 0] : vector<16x1xf32> -> vector<1x16xf32>
    %1095 = vector.broadcast %1068 : vector<16x1xf32> to vector<16x32xf32>
    %1096 = arith.mulf %1057, %1095 : vector<16x32xf32>
    %1097 = vector.broadcast %1093 : vector<16x1xf32> to vector<16x32xf32>
    %1098 = arith.mulf %1096, %1097 : vector<16x32xf32>
    %1099 = vector.broadcast %1093 : vector<16x1xf32> to vector<16x2xf32>
    %1100 = arith.mulf %3, %1099 : vector<16x2xf32>
    %1101 = vector.broadcast %1094 : vector<1x16xf32> to vector<2x16xf32>
    %1102 = arith.mulf %55, %1101 : vector<2x16xf32>
    %cst_247 = arith.constant dense<0.000000e+00> : vector<2xf32>
    %1103 = vector.multi_reduction <add>, %1102, %cst_247 [1] : vector<2x16xf32> to vector<2xf32>
    %1104 = vector.shape_cast %1103 : vector<2xf32> to vector<2x1xf32>
    %cst_248 = arith.constant 1.000000e+00 : f32
    %1105 = vector.broadcast %cst_248 : f32 to vector<2x1xf32>
    %1106 = arith.maximumf %1104, %1105 : vector<2x1xf32>
    %1107 = tpu.reciprocal %1106 {approx = true} : vector<2x1xf32> -> vector<2x1xf32>
    %cst_249 = arith.constant dense<0.000000e+00> : vector<2x32xf32>
    %1108 = tpu.matmul %1102, %1098, %cst_249 {dimension_numbers = #tpu.dot_dimension_numbers<[1], [0], [0], [1], [0, 0, 1, 1], [], []>} : vector<2x16xf32>, vector<16x32xf32>, vector<2x32xf32> -> vector<2x32xf32>
    %1109 = vector.broadcast %1107 : vector<2x1xf32> to vector<2x32xf32>
    %1110 = arith.mulf %1108, %1109 : vector<2x32xf32>
    %1111 = vector.extract_strided_slice %1100 {offsets = [0, 0], sizes = [16, 1], strides = [1, 1]} : vector<16x2xf32> to vector<16x1xf32>
    %cst_250 = arith.constant 0.000000e+00 : f32
    %1112 = vector.broadcast %cst_250 : f32 to vector<16x1xf32>
    %1113 = arith.cmpf ogt, %1111, %1112 : vector<16x1xf32>
    %cst_251 = arith.constant -1.000000e+30 : f32
    %1114 = vector.shape_cast %1113 : vector<16x1xi1> to vector<16x1xi1>
    %1115 = vector.broadcast %1114 : vector<16x1xi1> to vector<16x32xi1>
    %1116 = vector.broadcast %cst_251 : f32 to vector<16x32xf32>
    %1117 = arith.select %1115, %1098, %1116 : vector<16x32xi1>, vector<16x32xf32>
    %cst_252 = arith.constant dense<0xFF800000> : vector<32xf32>
    %1118 = vector.multi_reduction <maximumf>, %1117, %cst_252 [0] : vector<16x32xf32> to vector<32xf32>
    %1119 = vector.shape_cast %1118 : vector<32xf32> to vector<1x32xf32>
    %c0_253 = arith.constant 0 : index
    %c0_254 = arith.constant 0 : index
    %1120 = vector.load %arg12[%c0_253, %c0_254] : memref<2x32xf32, #tpu.memory_space<vmem>>, vector<1x32xf32>
    tpu.vector_store %arg12[%c0_253, %c0_254], %1119 {strides = array<i32>} : memref<2x32xf32, #tpu.memory_space<vmem>>, vector<1x32xf32>,
    %1121 = vector.extract_strided_slice %1100 {offsets = [0, 1], sizes = [16, 1], strides = [1, 1]} : vector<16x2xf32> to vector<16x1xf32>
    %cst_255 = arith.constant 0.000000e+00 : f32
    %1122 = vector.broadcast %cst_255 : f32 to vector<16x1xf32>
    %1123 = arith.cmpf ogt, %1121, %1122 : vector<16x1xf32>
    %cst_256 = arith.constant -1.000000e+30 : f32
    %1124 = vector.shape_cast %1123 : vector<16x1xi1> to vector<16x1xi1>
    %1125 = vector.broadcast %1124 : vector<16x1xi1> to vector<16x32xi1>
    %1126 = vector.broadcast %cst_256 : f32 to vector<16x32xf32>
    %1127 = arith.select %1125, %1098, %1126 : vector<16x32xi1>, vector<16x32xf32>
    %cst_257 = arith.constant dense<0xFF800000> : vector<32xf32>
    %1128 = vector.multi_reduction <maximumf>, %1127, %cst_257 [0] : vector<16x32xf32> to vector<32xf32>
    %1129 = vector.shape_cast %1128 : vector<32xf32> to vector<1x32xf32>
    %c1_258 = arith.constant 1 : index
    %c0_259 = arith.constant 0 : index
    %1130 = vector.load %arg12[%c1_258, %c0_259] : memref<2x32xf32, #tpu.memory_space<vmem>>, vector<1x32xf32>
    tpu.vector_store %arg12[%c1_258, %c0_259], %1129 {strides = array<i32>} : memref<2x32xf32, #tpu.memory_space<vmem>>, vector<1x32xf32>,
    %cst_260 = arith.constant 0.000000e+00 : f32
    %1131 = vector.broadcast %cst_260 : f32 to vector<2x1xf32>
    %1132 = arith.cmpf ogt, %1104, %1131 : vector<2x1xf32>
    %c0_261 = arith.constant 0 : index
    %c0_262 = arith.constant 0 : index
    %1133 = vector.load %arg12[%c0_261, %c0_262] : memref<2x32xf32, #tpu.memory_space<vmem>>, vector<2x32xf32>
    %cst_263 = arith.constant 0.000000e+00 : f32
    %1134 = vector.shape_cast %1132 : vector<2x1xi1> to vector<2x1xi1>
    %1135 = vector.broadcast %1134 : vector<2x1xi1> to vector<2x32xi1>
    %1136 = vector.broadcast %cst_263 : f32 to vector<2x32xf32>
    %1137 = arith.select %1135, %1133, %1136 : vector<2x32xi1>, vector<2x32xf32>
    %1138 = arith.addf %874, %1137 : vector<2x32xf32>
    %1139 = arith.addf %875, %1110 : vector<2x32xf32>
    %c0_264 = arith.constant 0 : index
    %c0_265 = arith.constant 0 : index
    %1140 = vector.load %arg8[%c0_264, %c0_265] : memref<32x32xf32, #tpu.memory_space<vmem>>, vector<32x32xf32>
    %1141 = arith.truncf %1138 : vector<2x32xf32> to vector<2x32xbf16>
    %1142 = arith.truncf %1140 : vector<32x32xf32> to vector<32x32xbf16>
    %cst_266 = arith.constant dense<0.000000e+00> : vector<2x32xf32>
    %1143 = tpu.matmul %1141, %1142, %cst_266 {dimension_numbers = #tpu.dot_dimension_numbers<[1], [0], [0], [1], [0, 0, 1, 1], [], []>} : vector<2x32xbf16>, vector<32x32xbf16>, vector<2x32xf32> -> vector<2x32xf32>
    %c0_267 = arith.constant 0 : index
    %c0_268 = arith.constant 0 : index
    %1144 = vector.load %arg9[%c0_267, %c0_268] : memref<32x32xf32, #tpu.memory_space<vmem>>, vector<32x32xf32>
    %1145 = arith.truncf %1139 : vector<2x32xf32> to vector<2x32xbf16>
    %1146 = arith.truncf %1144 : vector<32x32xf32> to vector<32x32xbf16>
    %cst_269 = arith.constant dense<0.000000e+00> : vector<2x32xf32>
    %1147 = tpu.matmul %1145, %1146, %cst_269 {dimension_numbers = #tpu.dot_dimension_numbers<[1], [0], [0], [1], [0, 0, 1, 1], [], []>} : vector<2x32xbf16>, vector<32x32xbf16>, vector<2x32xf32> -> vector<2x32xf32>
    %1148 = arith.addf %1143, %1147 : vector<2x32xf32>
    %c0_270 = arith.constant 0 : index
    %c0_271 = arith.constant 0 : index
    %1149 = vector.load %arg10[%c0_270, %c0_271] : memref<1x32xf32, #tpu.memory_space<vmem>>, vector<1x32xf32>
    %1150 = vector.broadcast %1149 : vector<1x32xf32> to vector<2x32xf32>
    %1151 = arith.addf %1148, %1150 : vector<2x32xf32>
    %c0_272 = arith.constant 0 : index
    %c0_273 = arith.constant 0 : index
    %1152 = vector.load %arg11[%c0_272, %c0_273] : memref<2x32xf32, #tpu.memory_space<vmem>>, vector<2x32xf32>
    tpu.vector_store %arg11[%c0_272, %c0_273], %1151 {strides = array<i32>} : memref<2x32xf32, #tpu.memory_space<vmem>>, vector<2x32xf32>,
    return
  }
}

</mosaic_0001>

<bundles_post_ra>
// kernel: gat_topk4_forward.1
= control target key start
LH: loop header
LB: loop body
LE: loop exit
PB: predicated region body
PF: predicated region fallthrough
CT: control target
= control target key end

     0   :  { %16 = vsyncpa [#allocation4], 0  ;;  %s6984_s0 = inlined_call_operand.hbm [shape: bf16[16,16], index: 0, kind: input, shape index: {}]   ;;  %s6985_s1 = inlined_call_operand.hbm [shape: f32[16,16], index: 1, kind: input, shape index: {}]   ;;  %s6986_s2 = inlined_call_operand.hbm [shape: f32[16,2], index: 2, kind: input, shape index: {}]   ;;  %s6987_s3 = inlined_call_operand.hbm [shape: f32[16,32], index: 3, kind: input, shape index: {}]   ;;  %s6988_s4 = inlined_call_operand.hbm [shape: f32[32,32], index: 4, kind: input, shape index: {}]   ;;  %s6989_s5 = inlined_call_operand.hbm [shape: f32[32,32], index: 5, kind: input, shape index: {}]   ;;  %s6990_s6 = inlined_call_operand.hbm [shape: f32[32,32], index: 6, kind: input, shape index: {}]   ;;  %s6991_s7 = inlined_call_operand.hbm [shape: f32[24,32], index: 7, kind: input, shape index: {}]   ;;  %s6992_s8 = inlined_call_operand.hbm [shape: f32[32,32], index: 8, kind: input, shape index: {}]   ;;  %s6993_s9 = inlined_call_operand.hbm [shape: f32[32,32], index: 9, kind: input, shape index: {}]   ;;  %s6994_s10 = inlined_call_operand.hbm [shape: f32[1,32], index: 10, kind: input, shape index: {}]   ;;  %s6995_s11 = inlined_call_operand.hbm [shape: f32[2,32], index: 11, kind: output, shape index: {}]  }
   0x1   :  { %17 = vsyncpa [#allocation7], 0 }
   0x2   :  { %18 = vsyncpa [#allocation10], 0 }
   0x3   :  { %19 = vsyncpa [#allocation13], 0 }
   0x4   :  { %20 = vsyncpa [#allocation16], 0 }
   0x5   :  { %21 = vsyncpa [#allocation19], 0 }
   0x6   :  { %22 = vsyncpa [#allocation5], 0  ;;  %s5542_s17 = smov [#allocation6]   ;;  %s5264_s21 = scalar_lea.hbm %s6985_s1, 256 }
   0x7   :  { %s40_s18 = sshll.u32 %s5542_s17, 4  ;;  %p5265_p0 = scmp.ne.s32.totalorder %s6985_s1, %s5264_s21  ;;  %s41_s18 = int_to_ptr.vmem [resolvable:$true] %s40_s18 }
   0x8   :  { %p5268_p1 = scmp.lt.u32.totalorder %s5264_s21, %s6985_s1 }
   0xa   :  { %p5270_p2 = pnand %p5268_p1, %p5265_p0 }
   0xc   :  { %5273 = shalt.err (!%p5270_p2)
}
   0xd   :  { %s5274_s26 = scalar_lea.vmem %s41_s18, 256  ;;  %p5279_p4 = scmp.lt.s32.totalorder %s41_s18, %s41_s18 }
   0xe   :  { %p5275_p3 = scmp.ne.s32.totalorder %s41_s18, %s5274_s26  ;;  %p5280_p5 = scmp.lt.s32.totalorder %s5274_s26, %s5274_s26 }
  0x10   :  { %p5281_p6 = por %p5280_p5, %p5279_p4 }
  0x12   :  { %p5282_p7 = pnand %p5281_p6, %p5275_p3 }
  0x14   :  { %5285 = shalt.err (!%p5282_p7)
}
  0x15   :  { %s5543_s27 = smov 128   ;;  %s5544_s28 = smov 8  }
  0x16   :  { %46 = dma.hbm_to_vmem [thread:$0]  %s6985_s1, 256, %s41_s18, [#allocation7], %s5543_s27, %s5543_s27, %s5544_s28  }
  0x17   :  { %s5545_s12 = smov [#allocation9]   ;;  %s5546_s14 = smov [#allocation12]  }
  0x18   :  { %s64_s13 = sshll.u32 %s5545_s12, 4  ;;  %s88_s15 = sshll.u32 %s5546_s14, 4  ;;  %s65_s13 = int_to_ptr.vmem [resolvable:$true] %s64_s13  ;;  %s89_s15 = int_to_ptr.vmem [resolvable:$true] %s88_s15 }
  0x19   :  { %s5286_s19 = scalar_lea.hbm %s6987_s3, 256 }
  0x1a   :  { %p5287_p8 = scmp.ne.s32.totalorder %s6987_s3, %s5286_s19  ;;  %p5290_p9 = scmp.lt.u32.totalorder %s5286_s19, %s6987_s3 }
  0x1c   :  { %p5292_p10 = pnand %p5290_p9, %p5287_p8 }
  0x1e   :  { %5295 = shalt.err (!%p5292_p10)
}
  0x1f   :  { %s5296_s1 = scalar_lea.vmem %s65_s13, 256  ;;  %p5301_p12 = scmp.lt.s32.totalorder %s65_s13, %s65_s13 }
  0x20   :  { %p5297_p11 = scmp.ne.s32.totalorder %s65_s13, %s5296_s1  ;;  %p5302_p13 = scmp.lt.s32.totalorder %s5296_s1, %s5296_s1 }
  0x22   :  { %p5303_p0 = por %p5302_p13, %p5301_p12 }
  0x24   :  { %p5304_p1 = pnand %p5303_p0, %p5297_p11 }
  0x26   :  { %5307 = shalt.err (!%p5304_p1)
}
  0x27   :  { %70 = dma.hbm_to_vmem [thread:$0]  %s6987_s3, 256, %s65_s13, [#allocation10], %s5543_s27, %s5543_s27, %s5544_s28  }
  0x28   :  { %s5308_s29 = scalar_lea.hbm %s6989_s5, 512 }
  0x29   :  { %p5309_p2 = scmp.ne.s32.totalorder %s6989_s5, %s5308_s29  ;;  %p5312_p3 = scmp.lt.u32.totalorder %s5308_s29, %s6989_s5 }
  0x2b   :  { %p5314_p4 = pnand %p5312_p3, %p5309_p2 }
  0x2d   :  { %5317 = shalt.err (!%p5314_p4)
}
  0x2e   :  { %s5318_s17 = scalar_lea.vmem %s89_s15, 512  ;;  %p5323_p6 = scmp.lt.s32.totalorder %s89_s15, %s89_s15 }
  0x2f   :  { %p5319_p5 = scmp.ne.s32.totalorder %s89_s15, %s5318_s17  ;;  %p5324_p7 = scmp.lt.s32.totalorder %s5318_s17, %s5318_s17 }
  0x31   :  { %p5325_p8 = por %p5324_p7, %p5323_p6 }
  0x33   :  { %p5326_p9 = pnand %p5325_p8, %p5319_p5 }
  0x35   :  { %5329 = shalt.err (!%p5326_p9)
}
  0x36   :  { %94 = dma.hbm_to_vmem [thread:$0]  %s6989_s5, 512, %s89_s15, [#allocation13], %s5543_s27, %s5543_s27, %s5544_s28  }
  0x37   :  { %s5547_s19 = smov [#allocation15]   ;;  %s5548_s21 = smov [#allocation18]  }
  0x38   :  { %s112_s20 = sshll.u32 %s5547_s19, 4  ;;  %s136_s22 = sshll.u32 %s5548_s21, 4  ;;  %s113_s20 = int_to_ptr.vmem [resolvable:$true] %s112_s20  ;;  %s137_s22 = int_to_ptr.vmem [resolvable:$true] %s136_s22 }
  0x39   :  { %s5330_s18 = scalar_lea.hbm %s6991_s7, 384 }
  0x3a   :  { %p5331_p10 = scmp.ne.s32.totalorder %s6991_s7, %s5330_s18  ;;  %p5334_p11 = scmp.lt.u32.totalorder %s5330_s18, %s6991_s7 }
  0x3c   :  { %p5336_p12 = pnand %p5334_p11, %p5331_p10 }
  0x3e   :  { %5339 = shalt.err (!%p5336_p12)
}
  0x3f   :  { %s5340_s5 = scalar_lea.vmem %s113_s20, 384  ;;  %p5345_p0 = scmp.lt.s32.totalorder %s113_s20, %s113_s20 }
  0x40   :  { %p5341_p13 = scmp.ne.s32.totalorder %s113_s20, %s5340_s5  ;;  %p5346_p1 = scmp.lt.s32.totalorder %s5340_s5, %s5340_s5 }
  0x42   :  { %p5347_p2 = por %p5346_p1, %p5345_p0 }
  0x44   :  { %p5348_p3 = pnand %p5347_p2, %p5341_p13 }
  0x46   :  { %5351 = shalt.err (!%p5348_p3)
}
  0x47   :  { %118 = dma.hbm_to_vmem [thread:$0]  %s6991_s7, 384, %s113_s20, [#allocation16], %s5543_s27, %s5543_s27, %s5544_s28  }
  0x48   :  { %s5352_s16 = scalar_lea.hbm %s6993_s9, 512 }
  0x49   :  { %p5353_p4 = scmp.ne.s32.totalorder %s6993_s9, %s5352_s16  ;;  %p5356_p5 = scmp.lt.u32.totalorder %s5352_s16, %s6993_s9 }
  0x4b   :  { %p5358_p6 = pnand %p5356_p5, %p5353_p4 }
  0x4d   :  { %5361 = shalt.err (!%p5358_p6)
}
  0x4e   :  { %s5362_s21 = scalar_lea.vmem %s137_s22, 512  ;;  %p5367_p8 = scmp.lt.s32.totalorder %s137_s22, %s137_s22 }
  0x4f   :  { %p5363_p7 = scmp.ne.s32.totalorder %s137_s22, %s5362_s21  ;;  %p5368_p9 = scmp.lt.s32.totalorder %s5362_s21, %s5362_s21 }
  0x51   :  { %p5369_p10 = por %p5368_p9, %p5367_p8 }
  0x53   :  { %p5370_p11 = pnand %p5369_p10, %p5363_p7 }
  0x55   :  { %5373 = shalt.err (!%p5370_p11)
}
  0x56   :  { %142 = dma.hbm_to_vmem [thread:$0]  %s6993_s9, 512, %s137_s22, [#allocation19], %s5543_s27, %s5543_s27, %s5544_s28  }
  0x57   :  { %s5549_s23 = smov [#allocation3]   ;;  %s5374_s25 = scalar_lea.hbm %s6984_s0, 128 }
  0x58   :  { %s28_s1 = sshll.u32 %s5549_s23, 4  ;;  %p5375_p12 = scmp.ne.s32.totalorder %s6984_s0, %s5374_s25  ;;  %s29_s1 = int_to_ptr.vmem [resolvable:$true] %s28_s1 }
  0x59   :  { %p5378_p13 = scmp.lt.u32.totalorder %s5374_s25, %s6984_s0 }
  0x5b   :  { %p5380_p0 = pnand %p5378_p13, %p5375_p12 }
  0x5d   :  { %5383 = shalt.err (!%p5380_p0)
}
  0x5e   :  { %s5384_s30 = scalar_lea.vmem %s29_s1, 128  ;;  %p5389_p2 = scmp.lt.s32.totalorder %s29_s1, %s29_s1 }
  0x5f   :  { %p5385_p1 = scmp.ne.s32.totalorder %s29_s1, %s5384_s30  ;;  %p5390_p3 = scmp.lt.s32.totalorder %s5384_s30, %s5384_s30 }
  0x61   :  { %p5391_p4 = por %p5390_p3, %p5389_p2 }
  0x63   :  { %p5392_p5 = pnand %p5391_p4, %p5385_p1 }
  0x65   :  { %5395 = shalt.err (!%p5392_p5)
}
  0x66   :  { %s5550_s9 = smov 64   ;;  %s5551_s22 = smov 4  }
  0x67   :  { %34 = dma.hbm_to_vmem [thread:$0]  %s6984_s0, 128, %s29_s1, [#allocation4], %s5550_s9, %s5550_s9, %s5551_s22  }
  0x68   :  { %s5552_s16 = smov [#allocation8]   ;;  %s5553_s3 = smov [#allocation11]  }
  0x69   :  { %s52_s17 = sshll.u32 %s5552_s16, 4  ;;  %s76_s13 = sshll.u32 %s5553_s3, 4  ;;  %s53_s17 = int_to_ptr.vmem [resolvable:$true] %s52_s17  ;;  %s5713_s13 = int_to_ptr.vmem [resolvable:$true] %s76_s13 }
  0x6a   :  { %s5396_s7 = scalar_lea.hbm %s6986_s2, 256 }
  0x6b   :  { %p5397_p6 = scmp.ne.s32.totalorder %s6986_s2, %s5396_s7  ;;  %p5400_p7 = scmp.lt.u32.totalorder %s5396_s7, %s6986_s2 }
  0x6d   :  { %p5402_p8 = pnand %p5400_p7, %p5397_p6 }
  0x6f   :  { %5405 = shalt.err (!%p5402_p8)
}
  0x70   :  { %s5406_s0 = scalar_lea.vmem %s53_s17, 256  ;;  %p5411_p10 = scmp.lt.s32.totalorder %s53_s17, %s53_s17 }
  0x71   :  { %p5407_p9 = scmp.ne.s32.totalorder %s53_s17, %s5406_s0  ;;  %p5412_p11 = scmp.lt.s32.totalorder %s5406_s0, %s5406_s0 }
  0x73   :  { %p5413_p12 = por %p5412_p11, %p5411_p10 }
  0x75   :  { %p5414_p13 = pnand %p5413_p12, %p5407_p9 }
  0x77   :  { %5417 = shalt.err (!%p5414_p13)
}
  0x78   :  { %58 = dma.hbm_to_vmem [thread:$0]  %s6986_s2, 256, %s53_s17, [#allocation7], %s5543_s27, %s5543_s27, %s5544_s28  }
  0x79   :  { %s5418_s5 = scalar_lea.hbm %s6988_s4, 512 }
  0x7a   :  { %p5419_p0 = scmp.ne.s32.totalorder %s6988_s4, %s5418_s5  ;;  %p5422_p1 = scmp.lt.u32.totalorder %s5418_s5, %s6988_s4 }
  0x7c   :  { %p5424_p2 = pnand %p5422_p1, %p5419_p0 }
  0x7e   :  { %5427 = shalt.err (!%p5424_p2)
}
  0x7f   :  { %s5428_s12 = scalar_lea.vmem %s5713_s13, 512  ;;  %p5433_p4 = scmp.lt.s32.totalorder %s5713_s13, %s5713_s13 }
  0x80   :  { %p5429_p3 = scmp.ne.s32.totalorder %s5713_s13, %s5428_s12  ;;  %p5434_p5 = scmp.lt.s32.totalorder %s5428_s12, %s5428_s12 }
  0x82   :  { %p5435_p6 = por %p5434_p5, %p5433_p4 }
  0x84   :  { %p5436_p7 = pnand %p5435_p6, %p5429_p3 }
  0x86   :  { %5439 = shalt.err (!%p5436_p7)
}
  0x87   :  { %82 = dma.hbm_to_vmem [thread:$0]  %s6988_s4, 512, %s5713_s13, [#allocation10], %s5543_s27, %s5543_s27, %s5544_s28  }
  0x88   :  { %s5554_s16 = smov [#allocation14]   ;;  %s5555_s3 = smov [#allocation17]  }
  0x89   :  { %s100_s17 = sshll.u32 %s5554_s16, 4  ;;  %s124_s19 = sshll.u32 %s5555_s3, 4  ;;  %s101_s17 = int_to_ptr.vmem [resolvable:$true] %s100_s17  ;;  %s5750_s19 = int_to_ptr.vmem [resolvable:$true] %s124_s19 }
  0x8a   :  { %s5440_s20 = scalar_lea.hbm %s6990_s6, 512 }
  0x8b   :  { %p5441_p8 = scmp.ne.s32.totalorder %s6990_s6, %s5440_s20  ;;  %p5444_p9 = scmp.lt.u32.totalorder %s5440_s20, %s6990_s6 }
  0x8d   :  { %p5446_p10 = pnand %p5444_p9, %p5441_p8 }
  0x8f   :  { %5449 = shalt.err (!%p5446_p10)
}
  0x90   :  { %s5450_s4 = scalar_lea.vmem %s101_s17, 512  ;;  %p5455_p12 = scmp.lt.s32.totalorder %s101_s17, %s101_s17 }
  0x91   :  { %p5451_p11 = scmp.ne.s32.totalorder %s101_s17, %s5450_s4  ;;  %p5456_p13 = scmp.lt.s32.totalorder %s5450_s4, %s5450_s4 }
  0x93   :  { %p5457_p0 = por %p5456_p13, %p5455_p12 }
  0x95   :  { %p5458_p1 = pnand %p5457_p0, %p5451_p11 }
  0x97   :  { %5461 = shalt.err (!%p5458_p1)
}
  0x98   :  { %106 = dma.hbm_to_vmem [thread:$0]  %s6990_s6, 512, %s101_s17, [#allocation13], %s5543_s27, %s5543_s27, %s5544_s28  }
  0x99   :  { %s5462_s29 = scalar_lea.hbm %s6992_s8, 512 }
  0x9a   :  { %p5463_p2 = scmp.ne.s32.totalorder %s6992_s8, %s5462_s29  ;;  %p5466_p3 = scmp.lt.u32.totalorder %s5462_s29, %s6992_s8 }
  0x9c   :  { %p5468_p4 = pnand %p5466_p3, %p5463_p2 }
  0x9e   :  { %5471 = shalt.err (!%p5468_p4)
}
  0x9f   :  { %s5472_s22 = scalar_lea.vmem %s5750_s19, 512  ;;  %p5477_p6 = scmp.lt.s32.totalorder %s5750_s19, %s5750_s19 }
  0xa0   :  { %p5473_p5 = scmp.ne.s32.totalorder %s5750_s19, %s5472_s22  ;;  %p5478_p7 = scmp.lt.s32.totalorder %s5472_s22, %s5472_s22 }
  0xa2   :  { %p5479_p8 = por %p5478_p7, %p5477_p6 }
  0xa4   :  { %p5480_p9 = pnand %p5479_p8, %p5473_p5 }
  0xa6   :  { %5483 = shalt.err (!%p5480_p9)
}
  0xa7   :  { %130 = dma.hbm_to_vmem [thread:$0]  %s6992_s8, 512, %s5750_s19, [#allocation16], %s5543_s27, %s5543_s27, %s5544_s28  }
  0xa8   :  { %s5556_s2 = smov [#allocation20]   ;;  %s5484_s3 = scalar_lea.hbm %s6994_s10, 16 }
  0xa9   :  { %s149_s14 = sshll.u32 %s5556_s2, 4  ;;  %p5485_p10 = scmp.ne.s32.totalorder %s6994_s10, %s5484_s3  ;;  %s150_s14 = int_to_ptr.vmem [resolvable:$true] %s149_s14 }
  0xaa   :  { %p5488_p11 = scmp.lt.u32.totalorder %s5484_s3, %s6994_s10 }
  0xac   :  { %p5490_p12 = pnand %p5488_p11, %p5485_p10 }
  0xae   :  { %5493 = shalt.err (!%p5490_p12)
}
  0xaf   :  { %s5494_s18 = scalar_lea.vmem %s150_s14, 16  ;;  %s5498_s8 = scalar_lea.vmem %s150_s14, 32 }
  0xb0   :  { %p5495_p13 = scmp.ne.s32.totalorder %s150_s14, %s5494_s18  ;;  %p5499_p0 = scmp.lt.s32.totalorder %s150_s14, %s150_s14 }
  0xb1   :  { %p5500_p1 = scmp.lt.s32.totalorder %s5498_s8, %s5494_s18 }
  0xb3   :  { %p5501_p2 = por %p5500_p1, %p5499_p0 }
  0xb5   :  { %p5502_p3 = pnand %p5501_p2, %p5495_p13 }
  0xb7   :  { %5505 = shalt.err (!%p5502_p3)
}
  0xb8   :  { %152 = dma.hbm_to_vmem [thread:$0]  %s6994_s10, 16, %s150_s14, [#allocation19]  }
  0xb9   :  { %5528 = dma.done.wait [#allocation4], 128  }
  0xba   :  { %5529 = vsyncadd [#allocation4], 4294967168 }
  0xbb   :  { %5530 = dma.done.wait [#allocation7], 512  }
  0xbc   :  { %5531 = vsyncadd [#allocation7], 4294966784 }
  0xbd   :  { %5532 = dma.done.wait [#allocation10], 768  }
  0xbe   :  { %5533 = vsyncadd [#allocation10], 4294966528 }
  0xbf   :  { %5534 = dma.done.wait [#allocation13], 1024  }
  0xc0   :  { %5535 = vsyncadd [#allocation13], 4294966272 }
  0xc1   :  { %5536 = dma.done.wait [#allocation16], 896  }
  0xc2   :  { %5537 = vsyncadd [#allocation16], 4294966400 }
  0xc3   :  { %5538 = dma.done.wait [#allocation19], 528  }
  0xc4   :  { %5539 = vsyncadd [#allocation19], 4294966768  ;;  %v198_v0 = vlaneseq  ;;  %v7008_v1 = vmov 0.0   ;;  %vm5558_vm0 = vmmov 0   ;;  %v342_v8 = vld [vmem:[#allocation9] sm:$0xff]  ;;  %v343_v9 = vld [vmem:[#allocation9 + $0x8] sm:$0xff] }
  0xc5   :  { %4673 = vmatprep.subr.bf16.mxu0 %v7008_v1  ;;  %4675 = vmatprep.mubr.msk.bf16.mxu0 %vm5558_vm0, %v7008_v1  ;;  %v191_v10 = vld [vmem:[#allocation6] sm:$0xff]  ;;  %v345_v11 = vpack.c.bf16 %v343_v9, %v342_v8  ;;  %v192_v12 = vld [vmem:[#allocation6 + $0x8] sm:$0xff]  ;;  %vm346_vm6 = vcmask 130048   ;;  %v7002_v15 = vmov 1.0|1.0   ;;  %v7000_v19 = vmov 1  }
  0xc6   :  { %v5802_v2 = vshrl.u32 %v198_v0, 7  ;;  %v5804_v3 = vand.u32 127, %v198_v0  ;;  %v344_v13 = vpack.c.bf16 %v192_v12, %v191_v10  ;;  %5031 = vset.pattern.permute.xlu0 %v7000_v19  ;;  %v7004_v20 = vmov 0   ;;  %v5864_v23 = vld [vmem:[#allocation15] sm:$0xff]  ;;  %v5922_v58 = vld [vmem:[#allocation3] sm:$0xff]   ;;  %s5565_s10 = smov [#allocation21]  }
  0xc7   :  { %4674 = vmatpush3.bf16.msra.mxu0 %v345_v11  ;;  %5032 = vset.pattern.permute.xlu1 %v7004_v20  ;;  %v6998_v54 = vmov 2   ;;  %v6996_v55 = vmov 3   ;;  %v4563_v61 = vunpack.c.h.bf16 %v5922_v58  ;;  %v4562_v8 = vunpack.c.l.bf16 %v5922_v58  ;;  %s4443_s19 = sshll.u32 %s5565_s10, 4  ;;  %s4444_s19 = int_to_ptr.vmem [resolvable:$true] %s4443_s19 }
  0xc8   :  { %v5807_v4 = vadd.s32 8, %v5802_v2  ;;  %v235_v5 = vmul.u32 8, %v5804_v3  ;;  %v240_v6 = vadd.s32 1, %v5804_v3  ;;  %v233_v16 = vadd.s32 16, %v5802_v2  ;;  %s5506_s24 = scalar_lea.vmem %s4444_s19, 32  ;;  %p5511_p5 = scmp.lt.s32.totalorder %s4444_s19, %s4444_s19 }
  0xc9   :  { %v234_v17 = vadd.s32 24, %v5802_v2  ;;  %v5857_v21 = vsub.s32 0, %v5802_v2  ;;  %v5860_v22 = vsub.s32 1, %v5802_v2  ;;  %p5507_p4 = scmp.ne.s32.totalorder %s4444_s19, %s5506_s24  ;;  %p5512_p6 = scmp.lt.s32.totalorder %s5506_s24, %s5506_s24 }
  0xca   :  { %vm236_vm1 = vcmp.ge.s32.totalorder %v5802_v2, %v235_v5  ;;  %v241_v7 = vmul.u32 8, %v240_v6  ;;  %vm237_vm2 = vcmp.ge.s32.totalorder %v5807_v4, %v235_v5  ;;  %4676 = vmatmul.mubr.msk.bf16.vlgmr.msra.gmra.mrb[0].mxu0 %vm346_vm6, %v344_v13  ;;  %vm238_vm9 = vcmp.ge.s32.totalorder %v233_v16, %v235_v5 }
  0xcb   :  { %vm239_vm10 = vcmp.ge.s32.totalorder %v234_v17, %v235_v5  ;;  %v400_v24 = vrot.slane %v5864_v23, %v5857_v21  ;;  %v488_v25 = vrot.slane %v5864_v23, %v5860_v22  ;;  %p5513_p7 = por %p5512_p6, %p5511_p5 }
  0xcc   :  { %vm242_vm3 = vcmp.lt.s32.totalorder %v5802_v2, %v241_v7  ;;  %vm243_vm4 = vcmp.lt.s32.totalorder %v5807_v4, %v241_v7  ;;  %vm244_vm11 = vcmp.lt.s32.totalorder %v233_v16, %v241_v7  ;;  %vm245_vm12 = vcmp.lt.s32.totalorder %v234_v17, %v241_v7 }
  0xcd   :  { %vm246_vm5 = vmand %vm236_vm1, %vm242_vm3  ;;  %vm218_vm1 = vcmp.ge.s32.totalorder %v5804_v3, 8  ;;  %vm223_vm3 = vcmp.ge.s32.totalorder %v5804_v3, 16  ;;  %v5940_v7 = vsub.s32 2, %v5802_v2  ;;  %p5514_p8 = pnand %p5513_p7, %p5507_p4 }
  0xce   :  { %vm247_vm7 = vmand %vm237_vm2, %vm243_vm4  ;;  %vm219_vm2 = vcmp.lt.s32.totalorder %v5804_v3, 16  ;;  %vm224_vm4 = vcmp.lt.s32.totalorder %v5804_v3, 24 }
  0xcf   :  { %vm5815_vm8 = vmpackc.low %vm247_vm7, %vm246_vm5  ;;  %vm228_vm7 = vcmp.ge.s32.totalorder %v5804_v3, 24 }
  0xd0   :  { %4940 = vmatprep.subr.msk.bf16.mxu0 %vm5815_vm8, %v7002_v15  ;;  %4932 = vmatprep.subr.msk.bf16.mxu1 %vm5815_vm8, %v7002_v15  ;;  %vm248_vm13 = vmand %vm238_vm9, %vm244_vm11  ;;  %vm229_vm9 = vcmp.lt.s32.totalorder %v5804_v3, 32 }
  0xd1   :  { %4934 = vmatpush3.bf16.msk.msra.mxu1 %vm5815_vm8, %v7002_v15  ;;  %4942 = vmatpush3.bf16.msk.msra.mxu0 %vm5815_vm8, %v7002_v15  ;;  %vm249_vm14 = vmand %vm239_vm10, %vm245_vm12  ;;  %vm214_vm10 = vcmp.lt.s32.totalorder %v5804_v3, 8 }
  0xd2   :  { %vm5834_vm15 = vmpackc.low %vm249_vm14, %vm248_vm13  ;;  %v5877_v27 = vsel %vm214_vm10, 1.0, %v7008_v1  ;;  %vm403_vm13 = vcmask 261120   ;;  %vm204_vm14 = vcmp.eq.s32.totalorder %v5807_v4, %v5804_v3 }
  0xd3   :  { %4944 = vmatprep.subr.msk.bf16.mxu0 %vm5834_vm15, %v7002_v15  ;;  %4936 = vmatprep.subr.msk.bf16.mxu1 %vm5834_vm15, %v7002_v15  ;;  %vm220_vm5 = vmand %vm218_vm1, %vm219_vm2  ;;  %v5925_v59 = vsel %vm204_vm14, 1.0, %v7008_v1  ;;  %vm203_vm1 = vcmp.eq.s32.totalorder %v5802_v2, %v5804_v3 }
  0xd4   :  { %vm225_vm11 = vmand %vm223_vm3, %vm224_vm4  ;;  %v5874_v26 = vsel %vm220_vm5, 1.0, %v7008_v1  ;;  %7031 = vst [vmem:[#allocation29_spill] sm:$0xff] %v5925_v59  ;;  %v5929_v62 = vsub.f32 1.0, %v5925_v59  ;;  %v5934_v63 = vsel %vm203_vm1, 1.0, %v7008_v1  ;;  %vm1053_vm1 = vcmask 259077  }
  0xd5   :  { %4946 = vmatpush3.bf16.msk.msra.mxu0 %vm5834_vm15, %v7002_v15  ;;  %4938 = vmatpush3.bf16.msk.msra.mxu1 %vm5834_vm15, %v7002_v15  ;;  %vm230_vm12 = vmand %vm228_vm7, %vm229_vm9  ;;  %v5880_v28 = vsel %vm225_vm11, 1.0, %v7008_v1  ;;  %7032 = vst [vmem:[#allocation30_spill] sm:$0xff] %v5934_v63  ;;  %v5944_v9 = vsub.f32 1.0, %v5934_v63 }
  0xd6   :  { %4701 = vmatprep.subr.bf16.mxu1 %v7008_v1  ;;  %4707 = vmatprep.subr.bf16.mxu0 %v7008_v1  ;;  %v5883_v33 = vsel %vm230_vm12, 1.0, %v7008_v1  ;;  %v392_v6 = vmul.f32 %v4563_v61, %v5929_v62 }
  0xd7   :  { %7033 = vst [vmem:[#allocation31_spill] sm:$0xff] %v5944_v9 }
  0xd8   :  { %v5947_v11 = vadd.f32 %v5925_v59, %v392_v6 }
  0xda   :  { %vm396_vm2 = vcmp.gt.f32.partialorder %v5947_v11, 0.0 }
 0x19d   :  { %v384_v29 = vpop.f32.mrb[0].mxu0 }
 0x19e   :  { %v4677_v30 = vpop.f32.mrb[1].mxu0  ;;  %v401_v31 = vmul.f32 %v400_v24, %v384_v29  ;;  %v489_v32 = vmul.f32 %v488_v25, %v384_v29  ;;  %v702_v35 = vmul.f32 %v5874_v26, %v384_v29  ;;  %v652_v36 = vmul.f32 %v5877_v27, %v384_v29 }
 0x19f   :  { %v387_v34 = vpop.f32.mrb[2].mxu0  ;;  %v5888_v37 = vmul.f32 %v5880_v28, %v384_v29  ;;  %v5898_v44 = vmul.f32 %v5883_v33, %v384_v29 }
 0x1a0   :  { %v4678_v38 = vpop.f32.mrb[3].mxu0  ;;  %v402_v39 = vmul.f32 %v400_v24, %v387_v34  ;;  %4687 = vmatprep.mubr.msk.f32.mxu1 %vm403_vm13, %v401_v31  ;;  %v490_v40 = vmul.f32 %v488_v25, %v387_v34  ;;  %4698 = vmatprep.mubr.msk.f32.mxu0 %vm403_vm13, %v489_v32  ;;  %v703_v41 = vmul.f32 %v5874_v26, %v387_v34 }
 0x1a1   :  { %v653_v42 = vmul.f32 %v5877_v27, %v387_v34  ;;  %v5895_v43 = vmul.f32 %v5880_v28, %v387_v34  ;;  %v5901_v45 = vmul.f32 %v5883_v33, %v387_v34  ;;  %v391_v24 = vmul.f32 %v4562_v8, %v5944_v9 }
 0x1a2   :  { %4688 = vmatmul.mubr.msk.f32.vlgmr.msra.gmra.mrb[0].mxu1 %vm403_vm13, %v402_v39  ;;  %4699 = vmatmul.mubr.msk.f32.vlgmr.msra.gmra.mrb[4].mxu0 %vm403_vm13, %v490_v40  ;;  %v705_v46 = vpack.c.bf16 %v703_v41, %v702_v35  ;;  %v5957_v35 = vsub.s32 3, %v5802_v2 }
 0x1a3   :  { %v655_v47 = vpack.c.bf16 %v653_v42, %v652_v36  ;;  %4703 = vmatprep.mubr.msk.bf16.mxu1 %vm5558_vm0, %v7008_v1  ;;  %v843_v48 = vpack.c.bf16 %v5895_v43, %v5888_v37  ;;  %4709 = vmatprep.mubr.msk.bf16.mxu0 %vm5558_vm0, %v7008_v1  ;;  %v939_v49 = vpack.c.bf16 %v5901_v45, %v5898_v44 }
 0x1a4   :  { %4702 = vmatpush3.bf16.msra.mxu1 %v705_v46  ;;  %v5960_v38 = vadd.f32 %v5934_v63, %v391_v24  ;;  %v1052_v44 = vmul.f32 %v5864_v23, %v5864_v23 }
 0x1a5   :  { %4708 = vmatpush3.bf16.msra.mxu0 %v655_v47  ;;  %4713 = vmatprep.subr.bf16.mxu1 %v7008_v1 }
 0x1a6   :  { %4719 = vmatprep.subr.bf16.mxu0 %v7008_v1  ;;  %vm395_vm9 = vcmp.gt.f32.partialorder %v5960_v38, 0.0  ;;  %v1054_v45 = vsel %vm1053_vm1, %v1052_v44, 0.0 }
 0x275   :  { %v4689_v50 = vpop.f32.mrb[0].mxu1  ;;  %v4700_v51 = vpop.f32.mrb[4].mxu0 }
 0x276   :  { %v476_v52 = vpop.f32.mrb[1].mxu1  ;;  %611 = vperm.xlu1 %5032, %v4700_v51   ;;  %661 = vperm.xlu0 %5031, %v4700_v51   ;;  %v563_v53 = vpop.f32.mrb[5].mxu0 }
 0x27a   :  { %5033 = vset.pattern.permute.xlu1 %v6998_v54  ;;  %657 = vperm.xlu0 %5031, %v563_v53  }
 0x27b   :  { %799 = vperm.xlu1 %5033, %v4700_v51  }
 0x27e   :  { %5035 = vset.pattern.permute.xlu0 %v6998_v54 }
 0x27f   :  { %5034 = vset.pattern.permute.xlu1 %v7004_v20  ;;  %795 = vperm.xlu0 %5035, %v563_v53  }
 0x280   :  { %606 = vperm.xlu1 %5034, %v563_v53  }
 0x283   :  { %5036 = vset.pattern.permute.xlu0 %v6996_v55 }
 0x284   :  { %5037 = vset.pattern.permute.xlu1 %v6996_v55  ;;  %895 = vperm.xlu0 %5036, %v4700_v51  }
 0x285   :  { %891 = vperm.xlu1 %5037, %v563_v53  }
 0x2ae   :  { %572 = vxpose.xlu1.b32.start [1/2] (short) (narrow) %v476_v52, 8 }
 0x2b2   :  { %573 = vxpose.xlu1.b32.end [2/2] (short) (narrow) %v4689_v50, 8 }
 0x2f5   :  { %v612_v56 = vpop.permute.xlu1 %611  ;;  %v662_v0 = vpop.permute.xlu0 %661 }
 0x2f9   :  { %v658_v17 = vpop.permute.xlu0 %657 }
 0x2fa   :  { %v800_v57 = vpop.permute.xlu1 %799 }
 0x2fe   :  { %v796_v53 = vpop.permute.xlu0 %795 }
 0x2ff   :  { %v607_v60 = vpop.permute.xlu1 %606 }
 0x304   :  { %v892_v5 = vpop.permute.xlu1 %891 }
 0x32e   :  { %v588_v10 = vpop.trf.xlu1 }
 0x32f   :  { %v617_v12 = vrot.slane %v588_v10, %v5857_v21  ;;  %v667_v13 = vrot.slane %v588_v10, %v5860_v22  ;;  %v805_v16 = vrot.slane %v588_v10, %v5940_v7 }
 0x331   :  { %v669_v25 = vadd.f32 %v667_v13, %v662_v0  ;;  %v619_v29 = vadd.f32 %v617_v12, %v612_v56  ;;  %v807_v30 = vadd.f32 %v805_v16, %v800_v57  ;;  %v668_v31 = vadd.f32 %v667_v13, %v658_v17 }
 0x332   :  { %v618_v42 = vadd.f32 %v617_v12, %v607_v60  ;;  %v901_v57 = vrot.slane %v588_v10, %v5957_v35  ;;  %v806_v6 = vadd.f32 %v805_v16, %v796_v53 }
 0x333   :  { %vm671_vm3 = vcmp.ge.f32.partialorder %v669_v25, 0.0  ;;  %v673_v32 = vmul.f32 0.2, %v669_v25  ;;  %vm621_vm4 = vcmp.ge.f32.partialorder %v619_v29, 0.0  ;;  %v623_v34 = vmul.f32 0.2, %v619_v29 }
 0x334   :  { %vm809_vm5 = vcmp.ge.f32.partialorder %v807_v30, 0.0  ;;  %v811_v36 = vmul.f32 0.2, %v807_v30  ;;  %v672_v41 = vmul.f32 0.2, %v668_v31  ;;  %vm670_vm7 = vcmp.ge.f32.partialorder %v668_v31, 0.0 }
 0x335   :  { %v675_v39 = vsel %vm671_vm3, %v669_v25, %v673_v32  ;;  %v625_v40 = vsel %vm621_vm4, %v619_v29, %v623_v34  ;;  %v622_v0 = vmul.f32 0.2, %v618_v42  ;;  %vm620_vm10 = vcmp.ge.f32.partialorder %v618_v42, 0.0 }
 0x336   :  { %v677_v46 = vsel %vm396_vm2, %v675_v39, -1e+30  ;;  %v627_v47 = vsel %vm396_vm2, %v625_v40, -1e+30  ;;  %v813_v50 = vsel %vm809_vm5, %v807_v30, %v811_v36  ;;  %v674_v60 = vsel %vm670_vm7, %v668_v31, %v672_v41  ;;  %v896_v30 = vpop.permute.xlu0 %895 }
 0x337   :  { %v681_v51 = vsel %vm346_vm6, %v677_v46, -inf  ;;  %v631_v52 = vsel %vm346_vm6, %v627_v47, -inf  ;;  %v815_v56 = vsel %vm396_vm2, %v813_v50, -1e+30  ;;  %v676_v13 = vsel %vm395_vm9, %v674_v60, -1e+30 }
 0x338   :  { %682 = vmax.xlane.f32.xlu0 %v681_v51  ;;  %632 = vmax.xlane.f32.xlu1 %v631_v52  ;;  %v819_v12 = vsel %vm346_vm6, %v815_v56, -inf  ;;  %v624_v17 = vsel %vm620_vm10, %v618_v42, %v622_v0  ;;  %v810_v24 = vmul.f32 0.2, %v806_v6  ;;  %v902_v25 = vadd.f32 %v901_v57, %v892_v5 }
 0x339   :  { %vm808_vm11 = vcmp.ge.f32.partialorder %v806_v6, 0.0  ;;  %v678_v29 = vsel %vm346_vm6, %v676_v13, -inf  ;;  %v626_v10 = vsel %vm395_vm9, %v624_v17, -1e+30  ;;  %v903_v32 = vadd.f32 %v901_v57, %v896_v30 }
 0x33a   :  { %v812_v31 = vsel %vm808_vm11, %v806_v6, %v810_v24  ;;  %v906_v16 = vmul.f32 0.2, %v902_v25  ;;  %vm904_vm12 = vcmp.ge.f32.partialorder %v902_v25, 0.0  ;;  %v628_v34 = vsel %vm346_vm6, %v626_v10, -inf }
 0x33b   :  { %v814_v36 = vsel %vm395_vm9, %v812_v31, -1e+30  ;;  %v907_v5 = vmul.f32 0.2, %v903_v32  ;;  %vm905_vm14 = vcmp.ge.f32.partialorder %v903_v32, 0.0  ;;  %vm212_vm5 = vcmp.lt.s32.totalorder %v5804_v3, %v5807_v4 }
 0x33c   :  { %820 = vmax.xlane.f32.xlu0 %v819_v12  ;;  %v908_v39 = vsel %vm904_vm12, %v902_v25, %v906_v16  ;;  %v816_v40 = vsel %vm346_vm6, %v814_v36, -inf  ;;  %vm211_vm10 = vcmp.lt.s32.totalorder %v5804_v3, %v5802_v2 }
 0x33d   :  { %v910_v41 = vsel %vm395_vm9, %v908_v39, -1e+30  ;;  %v909_v42 = vsel %vm905_vm14, %v903_v32, %v907_v5 }
 0x33e   :  { %v912_v50 = vsel %vm346_vm6, %v910_v41, -inf  ;;  %v911_v51 = vsel %vm396_vm2, %v909_v42, -1e+30  ;;  %vm293_vm2 = vcmask 15360  }
 0x33f   :  { %v915_v52 = vsel %vm346_vm6, %v911_v51, -inf }
 0x340   :  { %679 = vmax.xlane.f32.xlu0 %v678_v29 }
 0x344   :  { %629 = vmax.xlane.f32.xlu0 %v628_v34 }
 0x348   :  { %817 = vmax.xlane.f32.xlu0 %v816_v40 }
 0x34c   :  { %913 = vmax.xlane.f32.xlu0 %v912_v50 }
 0x350   :  { %916 = vmax.xlane.f32.xlu0 %v915_v52 }
 0x3c5   :  { %v683_v53 = vpop.xlane.xlu0 %682  ;;  %v633_v57 = vpop.xlane.xlu1 %632 }
 0x3c6   :  { %v685_v60 = vsub.f32 %v677_v46, %v683_v53  ;;  %v635_v0 = vsub.f32 %v627_v47, %v633_v57 }
 0x3c8   :  { %v688_v6 = vmul.f32 1.442695, %v685_v60  ;;  %v638_v12 = vmul.f32 1.442695, %v635_v0 }
 0x3c9   :  { %v821_v17 = vpop.xlane.xlu0 %820 }
 0x3ca   :  { %5070 = vpow2.f32 %v688_v6  ;;  %v823_v24 = vsub.f32 %v815_v56, %v821_v17 }
 0x3cb   :  { %5072 = vpow2.f32 %v638_v12 }
 0x3cc   :  { %v826_v25 = vmul.f32 1.442695, %v823_v24 }
 0x3cd   :  { %v680_v29 = vpop.xlane.xlu0 %679 }
 0x3ce   :  { %5074 = vpow2.f32 %v826_v25  ;;  %v684_v30 = vsub.f32 %v676_v13, %v680_v29 }
 0x3d0   :  { %v686_v31 = vmul.f32 1.442695, %v684_v30 }
 0x3d1   :  { %v630_v16 = vpop.xlane.xlu0 %629 }
 0x3d2   :  { %5076 = vpow2.f32 %v686_v31  ;;  %v634_v32 = vsub.f32 %v626_v10, %v630_v16 }
 0x3d4   :  { %v5071_v34 = vpop.eup %5070  ;;  %v636_v39 = vmul.f32 1.442695, %v634_v32 }
 0x3d5   :  { %v5073_v5 = vpop.eup %5072  ;;  %v818_v40 = vpop.xlane.xlu0 %817  ;;  %v691_v46 = vmul.f32 %v5071_v34, %v5947_v11 }
 0x3d6   :  { %5078 = vpow2.f32 %v636_v39  ;;  %v822_v47 = vsub.f32 %v814_v36, %v818_v40  ;;  %v641_v56 = vmul.f32 %v5073_v5, %v5947_v11 }
 0x3d7   :  { %v695_v42 = vsel %vm346_vm6, %v691_v46, 0.0 }
 0x3d8   :  { %v5075_v50 = vpop.eup %5074  ;;  %v824_v52 = vmul.f32 1.442695, %v822_v47  ;;  %696 = vadd.xlane.f32.xlu0 %v695_v42  ;;  %v645_v10 = vsel %vm346_vm6, %v641_v56, 0.0 }
 0x3d9   :  { %v914_v13 = vpop.xlane.xlu0 %913  ;;  %v5993_v57 = vmul.f32 %v5075_v50, %v5947_v11 }
 0x3da   :  { %5080 = vpow2.f32 %v824_v52  ;;  %v918_v53 = vsub.f32 %v910_v41, %v914_v13 }
 0x3db   :  { %v833_v12 = vsel %vm346_vm6, %v5993_v57, 0.0 }
 0x3dc   :  { %v5077_v60 = vpop.eup %5076  ;;  %v920_v0 = vmul.f32 1.442695, %v918_v53  ;;  %646 = vadd.xlane.f32.xlu0 %v645_v10 }
 0x3dd   :  { %v917_v6 = vpop.xlane.xlu0 %916  ;;  %v690_v17 = vmul.f32 %v5077_v60, %v5960_v38 }
 0x3de   :  { %5082 = vpow2.f32 %v920_v0  ;;  %v919_v36 = vsub.f32 %v911_v51, %v917_v6 }
 0x3df   :  { %v692_v41 = vsel %vm346_vm6, %v690_v17, 0.0 }
 0x3e0   :  { %v5079_v24 = vpop.eup %5078  ;;  %v922_v25 = vmul.f32 1.442695, %v919_v36  ;;  %834 = vadd.xlane.f32.xlu0 %v833_v12 }
 0x3e1   :  { %v640_v29 = vmul.f32 %v5079_v24, %v5960_v38 }
 0x3e2   :  { %5084 = vpow2.f32 %v922_v25 }
 0x3e3   :  { %v642_v31 = vsel %vm346_vm6, %v640_v29, 0.0 }
 0x3e4   :  { %v5081_v30 = vpop.eup %5080  ;;  %693 = vadd.xlane.f32.xlu0 %v692_v41 }
 0x3e5   :  { %v828_v16 = vmul.f32 %v5081_v30, %v5960_v38 }
 0x3e7   :  { %v830_v34 = vsel %vm346_vm6, %v828_v16, 0.0 }
 0x3e8   :  { %v5083_v51 = vpop.eup %5082  ;;  %643 = vadd.xlane.f32.xlu0 %v642_v31 }
 0x3e9   :  { %v924_v32 = vmul.f32 %v5083_v51, %v5960_v38 }
 0x3eb   :  { %v926_v39 = vsel %vm346_vm6, %v924_v32, 0.0 }
 0x3ec   :  { %v5085_v5 = vpop.eup %5084  ;;  %831 = vadd.xlane.f32.xlu0 %v830_v34  ;;  %927 = vadd.xlane.f32.xlu1 %v926_v39 }
 0x3ed   :  { %v925_v40 = vmul.f32 %v5085_v5, %v5947_v11 }
 0x3ef   :  { %v929_v47 = vsel %vm346_vm6, %v925_v40, 0.0 }
 0x3f0   :  { %930 = vadd.xlane.f32.xlu0 %v929_v47  ;;  %1055 = vadd.xlane.f32.xlu1 %v1054_v45 }
 0x465   :  { %v697_v42 = vpop.xlane.xlu0 %696 }
 0x466   :  { %5086 = vrcp.f32 %v697_v42 }
 0x469   :  { %v647_v50 = vpop.xlane.xlu0 %646 }
 0x46d   :  { %v835_v52 = vpop.xlane.xlu0 %834 }
 0x470   :  { %v5087_v60 = vpop.eup %5086 }
 0x471   :  { %v694_v13 = vpop.xlane.xlu0 %693  ;;  %v701_v11 = vmul.f32 %v5087_v60, %v691_v46  ;;  %v989_v60 = vrot.slane %v5864_v23, %v5940_v7 }
 0x472   :  { %5088 = vrcp.f32 %v694_v13 }
 0x473   :  { %5090 = vrcp.f32 %v647_v50 }
 0x475   :  { %v644_v38 = vpop.xlane.xlu0 %643 }
 0x476   :  { %5092 = vrcp.f32 %v644_v38 }
 0x477   :  { %5094 = vrcp.f32 %v835_v52 }
 0x479   :  { %v928_v53 = vpop.xlane.xlu1 %927  ;;  %v832_v10 = vpop.xlane.xlu0 %831 }
 0x47a   :  { %5096 = vrcp.f32 %v832_v10 }
 0x47b   :  { %5098 = vrcp.f32 %v928_v53 }
 0x47c   :  { %v5089_v0 = vpop.eup %5088 }
 0x47d   :  { %v700_v6 = vmul.f32 %v5089_v0, %v690_v17  ;;  %v931_v36 = vpop.xlane.xlu0 %930  ;;  %v5091_v12 = vpop.eup %5090 }
 0x47e   :  { %5100 = vrcp.f32 %v931_v36  ;;  %v651_v41 = vmul.f32 %v5091_v12, %v641_v56 }
 0x47f   :  { %v704_v24 = vpack.c.bf16 %v701_v11, %v700_v6 }
 0x480   :  { %v5093_v25 = vpop.eup %5092 }
 0x481   :  { %v650_v30 = vmul.f32 %v5093_v25, %v640_v29  ;;  %4704 = vmatmul.mubr.msk.bf16.vlgmr.msra.gmra.mrb[4].mxu1 %vm346_vm6, %v704_v24  ;;  %v5095_v31 = vpop.eup %5094 }
 0x482   :  { %4714 = vmatpush3.bf16.msra.mxu1 %v843_v48  ;;  %4715 = vmatprep.mubr.msk.bf16.mxu1 %vm5558_vm0, %v7008_v1  ;;  %v839_v34 = vmul.f32 %v5095_v31, %v5993_v57 }
 0x483   :  { %v654_v51 = vpack.c.bf16 %v651_v41, %v650_v30 }
 0x484   :  { %v5097_v46 = vpop.eup %5096 }
 0x485   :  { %4710 = vmatmul.mubr.msk.bf16.vlgmr.msra.gmra.mrb[8].mxu0 %vm346_vm6, %v654_v51  ;;  %v5099_v17 = vpop.eup %5098  ;;  %v838_v39 = vmul.f32 %v5097_v46, %v828_v16 }
 0x486   :  { %4720 = vmatpush3.bf16.msra.mxu0 %v939_v49  ;;  %4721 = vmatprep.mubr.msk.bf16.mxu0 %vm5558_vm0, %v7008_v1  ;;  %v934_v48 = vmul.f32 %v5099_v17, %v924_v32 }
 0x487   :  { %4732 = vmatprep.subr.bf16.mxu0 %v7008_v1  ;;  %v842_v43 = vpack.c.bf16 %v839_v34, %v838_v39 }
 0x488   :  { %v5101_v37 = vpop.eup %5100 }
 0x489   :  { %v935_v56 = vmul.f32 %v5101_v37, %v925_v40  ;;  %4716 = vmatmul.mubr.msk.bf16.vlgmr.msra.gmra.mrb[8].mxu1 %vm346_vm6, %v842_v43 }
 0x48a   :  { %4729 = vmatprep.mubr.msk.f32.mxu1 %vm5558_vm0, %v7008_v1 }
 0x48b   :  { %v938_v29 = vpack.c.bf16 %v935_v56, %v934_v48 }
 0x48d   :  { %4722 = vmatmul.mubr.msk.bf16.vlgmr.msra.gmra.mrb[12].mxu0 %vm346_vm6, %v938_v29 }
 0x48e   :  { %4736 = vmatprep.mubr.msk.bf16.mxu0 %vm5558_vm0, %v7008_v1 }
 0x554   :  { %v743_v49 = vpop.f32.mrb[4].mxu1 }
 0x555   :  { %v4705_v57 = vpop.f32.mrb[5].mxu1 }
 0x556   :  { %v746_v16 = vpop.f32.mrb[6].mxu1 }
 0x557   :  { %v4706_v32 = vpop.f32.mrb[7].mxu1 }
 0x558   :  { %v787_v5 = vpop.f32.mrb[8].mxu0 }
 0x559   :  { %v788_v40 = vadd.f32 %v787_v5, %v743_v49  ;;  %v4711_v47 = vpop.f32.mrb[9].mxu0 }
 0x55a   :  { %v790_v42 = vpop.f32.mrb[10].mxu0 }
 0x55b   :  { %v791_v50 = vadd.f32 %v790_v42, %v746_v16  ;;  %v4712_v52 = vpop.f32.mrb[11].mxu0 }
 0x55c   :  { %v881_v13 = vpop.f32.mrb[8].mxu1 }
 0x55d   :  { %v888_v38 = vadd.f32 %v881_v13, %v788_v40  ;;  %v4717_v53 = vpop.f32.mrb[9].mxu1 }
 0x55e   :  { %v884_v10 = vpop.f32.mrb[10].mxu1 }
 0x55f   :  { %v889_v0 = vadd.f32 %v884_v10, %v791_v50  ;;  %v4718_v11 = vpop.f32.mrb[11].mxu1 }
 0x560   :  { %v977_v6 = vpop.f32.mrb[12].mxu0 }
 0x561   :  { %v984_v36 = vadd.f32 %v977_v6, %v888_v38  ;;  %v4723_v12 = vpop.f32.mrb[13].mxu0 }
 0x562   :  { %v980_v24 = vpop.f32.mrb[14].mxu0 }
 0x563   :  { %v990_v25 = vadd.f32 %v989_v60, %v984_v36  ;;  %v985_v41 = vadd.f32 %v980_v24, %v889_v0  ;;  %v4724_v30 = vpop.f32.mrb[15].mxu0 }
 0x565   :  { %v994_v31 = vmul.f32 0.044715, %v990_v25  ;;  %v991_v51 = vadd.f32 %v989_v60, %v985_v41  ;;  %v992_v45 = vmul.f32 0.5, %v990_v25 }
 0x567   :  { %v996_v46 = vmul.f32 %v994_v31, %v990_v25  ;;  %v995_v17 = vmul.f32 0.044715, %v991_v51  ;;  %v993_v16 = vmul.f32 0.5, %v991_v51 }
 0x569   :  { %v998_v34 = vmul.f32 %v996_v46, %v990_v25  ;;  %v997_v39 = vmul.f32 %v995_v17, %v991_v51 }
 0x56b   :  { %v1000_v37 = vadd.f32 %v998_v34, %v990_v25  ;;  %v999_v43 = vmul.f32 %v997_v39, %v991_v51 }
 0x56d   :  { %v1002_v48 = vmul.f32 0.7978846, %v1000_v37  ;;  %v1001_v56 = vadd.f32 %v999_v43, %v991_v51  ;;  %v6036_v43 = vsub.s32 4, %v5802_v2 }
 0x56f   :  { %5102 = vtanh.f32 %v1002_v48  ;;  %v1003_v29 = vmul.f32 0.7978846, %v1001_v56  ;;  %7034 = vst [vmem:[#allocation32_spill] sm:$0xff] %v6036_v43  ;;  %v1043_v48 = vrot.slane %v5864_v23, %v5957_v35  ;;  %v6041_v56 = vsub.s32 5, %v5802_v2 }
 0x571   :  { %5104 = vtanh.f32 %v1003_v29  ;;  %7035 = vst [vmem:[#allocation33_spill] sm:$0xff] %v6041_v56 }
 0x579   :  { %v5103_v44 = vpop.eup %5102 }
 0x57a   :  { %v1006_v49 = vadd.f32 1.0, %v5103_v44 }
 0x57b   :  { %v5105_v57 = vpop.eup %5104 }
 0x57c   :  { %v1007_v32 = vadd.f32 1.0, %v5105_v57  ;;  %v1008_v5 = vmul.f32 %v1006_v49, %v992_v45  ;;  %v1049_v45 = vrot.slane %v5864_v23, %v6036_v43 }
 0x57e   :  { %v1009_v40 = vmul.f32 %v1007_v32, %v993_v16  ;;  %v1012_v47 = vsel %vm403_vm13, %v1008_v5, 0.0  ;;  %v1061_v16 = vrot.slane %v5864_v23, %v6041_v56 }
 0x580   :  { %v1013_v42 = vsel %vm403_vm13, %v1009_v40, 0.0 }
 0x581   :  { %v1014_v50 = vadd.f32 %v1013_v42, %v1012_v47  ;;  %v6050_v47 = vld [vmem:[#allocation8 + $0x8] sm:$0xff] }
 0x583   :  { %v1015_v52 = vrot.slane %v1014_v50, 4 }
 0x585   :  { %v1016_v13 = vadd.f32 %v1015_v52, %v1014_v50 }
 0x587   :  { %v1017_v38 = vrot.slane %v1016_v13, 2 }
 0x589   :  { %v1018_v53 = vadd.f32 %v1017_v38, %v1016_v13 }
 0x58b   :  { %v1019_v10 = vrot.slane %v1018_v53, 1 }
 0x58d   :  { %v1020_v60 = vadd.f32 %v1019_v10, %v1018_v53 }
 0x58f   :  { %v1021_v0 = vmul.f32 0.0625, %v1020_v60 }
 0x591   :  { %v1022_v11 = vsub.f32 %v1008_v5, %v1021_v0  ;;  %v1023_v6 = vsub.f32 %v1009_v40, %v1021_v0  ;;  %v290_v5 = vcvt.s32.f32 %v5804_v3  ;;  %v6048_v40 = vld [vmem:[#allocation8] sm:$0xff] }
 0x593   :  { %v1024_v36 = vmul.f32 %v1022_v11, %v1022_v11  ;;  %v1025_v12 = vmul.f32 %v1023_v6, %v1023_v6  ;;  %v291_v38 = vmul.f32 %v290_v5, %v6048_v40  ;;  %v292_v53 = vmul.f32 %v290_v5, %v6050_v47 }
 0x595   :  { %v1026_v24 = vsel %vm403_vm13, %v1024_v36, 0.0  ;;  %v1027_v25 = vsel %vm403_vm13, %v1025_v12, 0.0  ;;  %v294_v0 = vsel %vm293_vm2, %v291_v38, 0.0  ;;  %v1329_v38 = vld [vmem:[#allocation11] sm:$0xff] }
 0x596   :  { %v1028_v41 = vadd.f32 %v1027_v25, %v1026_v24 }
 0x598   :  { %v1029_v30 = vrot.slane %v1028_v41, 4 }
 0x59a   :  { %v1030_v31 = vadd.f32 %v1029_v30, %v1028_v41 }
 0x59c   :  { %v1031_v51 = vrot.slane %v1030_v31, 2 }
 0x59e   :  { %v1032_v46 = vadd.f32 %v1031_v51, %v1030_v31 }
 0x5a0   :  { %v1033_v17 = vrot.slane %v1032_v46, 1 }
 0x5a2   :  { %v1034_v34 = vadd.f32 %v1033_v17, %v1032_v46 }
 0x5a4   :  { %v1035_v39 = vmul.f32 0.0625, %v1034_v34 }
 0x5a6   :  { %v1036_v37 = vadd.f32 1e-05, %v1035_v39 }
 0x5a8   :  { %5106 = vrsqrt.f32 %v1036_v37 }
 0x5b2   :  { %v5107_v29 = vpop.eup %5106 }
 0x5b3   :  { %v1039_v44 = vmul.f32 %v5107_v29, %v1023_v6  ;;  %v1038_v49 = vmul.f32 %v5107_v29, %v1022_v11  ;;  %v297_v11 = vsel %vm293_vm2, %v292_v53, 0.0  ;;  %v1056_v6 = vpop.xlane.xlu1 %1055  ;;  %v1330_v53 = vld [vmem:[#allocation11 + $0x8] sm:$0xff] }
 0x5b4   :  { %5108 = vrsqrt.f32 %v1056_v6  ;;  %v7006_v6 = vmov 0.0|0.0  }
 0x5b5   :  { %v1045_v57 = vmul.f32 %v1043_v48, %v1039_v44  ;;  %v1044_v32 = vmul.f32 %v1043_v48, %v1038_v49  ;;  %4947 = vmatprep.subr.bf16.mxu1 %v7006_v6 }
 0x5b7   :  { %v6052_v42 = vadd.f32 %v1049_v45, %v1045_v57  ;;  %v6054_v50 = vadd.f32 %v1049_v45, %v1044_v32 }
 0x5b9   :  { %v1063_v52 = vmul.f32 %v1061_v16, %v6052_v42  ;;  %v1062_v13 = vmul.f32 %v1061_v16, %v6054_v50 }
 0x5bb   :  { %v1067_v10 = vsel %vm403_vm13, %v1063_v52, 0.0  ;;  %v1064_v60 = vsel %vm403_vm13, %v1062_v13, 0.0 }
 0x5bc   :  { %1068 = vadd.xlane.f32.xlu1 %v1067_v10  ;;  %1065 = vadd.xlane.f32.xlu0 %v1064_v60  ;;  %v1334_v10 = vpack.c.bf16 %v1330_v53, %v1329_v38  ;;  %v1331_v60 = vld [vmem:[#allocation11 + $0x10] sm:$0xff] }
 0x5be   :  { %v5109_v36 = vpop.eup %5108  ;;  %4733 = vmatpush3.bf16.msra.mxu0 %v1334_v10 }
 0x5bf   :  { %v1073_v12 = vrot.slane %v5109_v36, %v6041_v56  ;;  %4734 = vmatprep.subr.bf16.mxu0 %v7008_v1 }
 0x5c0   :  { %295 = vadd.xlane.f32.xlu0 %v294_v0  ;;  %298 = vadd.xlane.f32.xlu1 %v297_v11  ;;  %v1332_v0 = vld [vmem:[#allocation11 + $0x18] sm:$0xff] }
 0x5c1   :  { %v1335_v11 = vpack.c.bf16 %v1332_v0, %v1331_v60 }
 0x5c3   :  { %4735 = vmatpush3.bf16.msra.mxu0 %v1335_v11 }
 0x5c4   :  { %4959 = vmatprep.subr.msk.bf16.mxu0 %vm5815_vm8, %v7002_v15 }
 0x649   :  { %v1066_v24 = vpop.xlane.xlu0 %1065  ;;  %v1069_v25 = vpop.xlane.xlu1 %1068 }
 0x64a   :  { %v1074_v41 = vmul.f32 %v1073_v12, %v1066_v24  ;;  %v1075_v30 = vmul.f32 %v1073_v12, %v1069_v25 }
 0x64c   :  { %5110 = vtanh.f32 %v1074_v41 }
 0x64d   :  { %v296_v31 = vpop.xlane.xlu0 %295  ;;  %v299_v51 = vpop.xlane.xlu1 %298  ;;  %5112 = vtanh.f32 %v1075_v30 }
 0x64e   :  { %300 = vxpose.xlu0.b32.start [1/2] (short) (narrow) %v296_v31, 8 }
 0x652   :  { %301 = vxpose.xlu0.b32.end [2/2] (short) (narrow) %v299_v51, 8 }
 0x656   :  { %v5111_v46 = vpop.eup %5110 }
 0x657   :  { %1078 = vxpose.xlu1.b32.start [1/2] (short) (narrow) %v5111_v46, 8  ;;  %v5113_v17 = vpop.eup %5112 }
 0x65b   :  { %1079 = vxpose.xlu1.b32.end [2/2] (short) (narrow) %v5113_v17, 8 }
 0x6ce   :  { %v316_v34 = vpop.trf.xlu0 }
 0x6cf   :  { %v335_v39 = vrot.slane %v316_v34, %v5857_v21 }
 0x6d1   :  { %vm336_vm3 = vcmp.eq.f32.partialorder %v296_v31, %v335_v39  ;;  %vm337_vm4 = vcmp.eq.f32.partialorder %v299_v51, %v335_v39  ;;  %v1183_v51 = vmul.f32 %v5113_v17, %v6052_v42 }
 0x6d2   :  { %v6065_v37 = vsel %vm336_vm3, 1.0, %v7008_v1  ;;  %v6068_v48 = vsel %vm337_vm4, 1.0, %v7008_v1 }
 0x6d3   :  { %v1137_v29 = vsel %vm346_vm6, %v6068_v48, 0.0  ;;  %v1134_v44 = vsel %vm346_vm6, %v6065_v37, 0.0 }
 0x6d4   :  { %1138 = vadd.xlane.f32.xlu1 %v1137_v29  ;;  %1135 = vadd.xlane.f32.xlu0 %v1134_v44 }
 0x6d7   :  { %v1094_v45 = vpop.trf.xlu1 }
 0x6d8   :  { %v1113_v49 = vrot.slane %v1094_v45, %v5857_v21 }
 0x6da   :  { %vm1115_vm7 = vcmp.gt.f32.partialorder %v1113_v49, %v5113_v17  ;;  %vm1117_vm9 = vcmp.eq.f32.partialorder %v1113_v49, %v5113_v17  ;;  %vm1116_vm11 = vcmp.eq.f32.partialorder %v1113_v49, %v5111_v46  ;;  %vm1114_vm14 = vcmp.gt.f32.partialorder %v1113_v49, %v5111_v46 }
 0x6db   :  { %vm1119_vm12 = vmand %vm1117_vm9, %vm212_vm5  ;;  %v6154_v49 = vsub.s32 6, %v5802_v2 }
 0x6dc   :  { %vm1121_vm1 = vmor %vm1115_vm7, %vm1119_vm12 }
 0x6dd   :  { %v4487_v57 = vsel %vm1121_vm1, 1.0, %v7008_v1  ;;  %vm1118_vm2 = vmand %vm1116_vm11, %vm211_vm10 }
 0x6de   :  { %v1127_v16 = vmul.f32 %v4487_v57, %v6068_v48  ;;  %vm1120_vm3 = vmor %vm1114_vm14, %vm1118_vm2  ;;  %v6157_v57 = vsub.s32 7, %v5802_v2 }
 0x6df   :  { %v4486_v32 = vsel %vm1120_vm3, 1.0, %v7008_v1 }
 0x6e0   :  { %v1131_v5 = vsel %vm346_vm6, %v1127_v16, 0.0  ;;  %v1126_v52 = vmul.f32 %v4486_v32, %v6065_v37  ;;  %v1389_v16 = vrot.slane %v5864_v23, %v6154_v49  ;;  %v1476_v32 = vrot.slane %v5864_v23, %v6157_v57 }
 0x6e1   :  { %1132 = vadd.xlane.f32.xlu1 %v1131_v5 }
 0x6e2   :  { %v1128_v13 = vsel %vm346_vm6, %v1126_v52, 0.0 }
 0x6e3   :  { %1129 = vadd.xlane.f32.xlu0 %v1128_v13 }
 0x714   :  { %258 = vxpose.xlu1.b32.start [1/2] (short) (narrow) %v6048_v40, 8  ;;  %v1182_v40 = vmul.f32 %v5111_v46, %v6054_v50 }
 0x718   :  { %259 = vxpose.xlu1.b32.end [2/2] (short) (narrow) %v6050_v47, 8 }
 0x736   :  { %5038 = vset.pattern.permute.xlu1 %v7000_v19 }
 0x761   :  { %v1139_v36 = vpop.xlane.xlu1 %1138  ;;  %v1136_v12 = vpop.xlane.xlu0 %1135 }
 0x762   :  { %v1141_v24 = vmul.f32 0.5, %v1139_v36  ;;  %v1140_v25 = vmul.f32 0.5, %v1136_v12 }
 0x764   :  { %v1143_v41 = vceil.f32 %v1141_v24  ;;  %v1142_v31 = vceil.f32 %v1140_v25 }
 0x76e   :  { %v1133_v30 = vpop.xlane.xlu1 %1132 }
 0x76f   :  { %vm1145_vm4 = vcmp.lt.f32.partialorder %v1133_v30, %v1143_v41 }
 0x770   :  { %v6101_v34 = vsel %vm1145_vm4, 1.0, %v7008_v1  ;;  %v1130_v39 = vpop.xlane.xlu0 %1129 }
 0x771   :  { %7036 = vst [vmem:[#allocation34_spill] sm:$0xff] %v6101_v34  ;;  %vm1144_vm7 = vcmp.lt.f32.partialorder %v1130_v39, %v1142_v31  ;;  %v6105_v47 = vmul.f32 %v6101_v34, %v1183_v51 }
 0x772   :  { %v6108_v29 = vsel %vm1144_vm7, 1.0, %v7008_v1 }
 0x773   :  { %7037 = vst [vmem:[#allocation35_spill] sm:$0xff] %v6105_v47  ;;  %7038 = vst [vmem:[#allocation36_spill] sm:$0xff] %v6108_v29  ;;  %1150 = vxpose.xlu0.b32.start [1/2] (short) (narrow) %v6108_v29, 8  ;;  %v6112_v44 = vmul.f32 %v6108_v29, %v1182_v40 }
 0x775   :  { %7039 = vst [vmem:[#allocation37_spill] sm:$0xff] %v6112_v44  ;;  %v4948_v42 = vpack.c.bf16 %v6105_v47, %v6112_v44 }
 0x777   :  { %1151 = vxpose.xlu0.b32.end [2/2] (short) (narrow) %v6101_v34, 8  ;;  %4949 = vmatpush3.bf16.msra.mxu1 %v4948_v42 }
 0x778   :  { %4737 = vmatmul.mubr.msk.bf16.vlgmr.msra.gmra.mrb[16].mxu0 %vm403_vm13, %v4948_v42  ;;  %4951 = vmatprep.subr.msk.bf16.mxu1 %vm5815_vm8, %v7002_v15 }
 0x779   :  { %4961 = vmatpush3.bf16.msk.msra.mxu0 %vm5815_vm8, %v7002_v15 }
 0x77a   :  { %4963 = vmatprep.subr.msk.bf16.mxu0 %vm5834_vm15, %v7002_v15 }
 0x77d   :  { %4965 = vmatpush3.bf16.msk.msra.mxu0 %vm5834_vm15, %v7002_v15 }
 0x77e   :  { %4768 = vmatprep.subr.bf16.mxu0 %v7008_v1 }
 0x794   :  { %v6132_v46 = vpop.trf.xlu1 }
 0x7a0   :  { %5039 = vset.pattern.permute.xlu0 %v7000_v19 }
 0x7f3   :  { %v1166_v50 = vpop.trf.xlu0 }
 0x7f4   :  { %v6135_v17 = vrot.slane %v1166_v50, %v5857_v21 }
 0x7f6   :  { %v6139_v45 = vmul.f32 %v6135_v17, %v6132_v46 }
 0x7f8   :  { %7040 = vst [vmem:[#allocation38_spill] sm:$0xff] %v6139_v45  ;;  %4730 = vmatmul.mubr.msk.f32.vlgmr.msra.gmra.mrb[2].mxu1 %vm346_vm6, %v6139_v45 }
 0x7f9   :  { %4953 = vmatpush3.bf16.msk.msra.mxu1 %vm5815_vm8, %v7002_v15 }
 0x7fa   :  { %4955 = vmatprep.subr.msk.bf16.mxu1 %vm5834_vm15, %v7002_v15 }
 0x7fd   :  { %4957 = vmatpush3.bf16.msk.msra.mxu1 %vm5834_vm15, %v7002_v15 }
 0x7fe   :  { %4762 = vmatprep.subr.bf16.mxu1 %v7008_v1 }
 0x84b   :  { %v1373_v5 = vpop.f32.mrb[16].mxu0 }
 0x84c   :  { %v4738_v52 = vpop.f32.mrb[17].mxu0  ;;  %v1390_v13 = vmul.f32 %v1389_v16, %v1373_v5  ;;  %v1477_v38 = vmul.f32 %v1476_v32, %v1373_v5  ;;  %v1690_v10 = vmul.f32 %v5874_v26, %v1373_v5  ;;  %v1640_v60 = vmul.f32 %v5877_v27, %v1373_v5 }
 0x84d   :  { %v1376_v53 = vpop.f32.mrb[18].mxu0  ;;  %v6166_v0 = vmul.f32 %v5880_v28, %v1373_v5  ;;  %v6176_v41 = vmul.f32 %v5883_v33, %v1373_v5 }
 0x84e   :  { %v4739_v11 = vpop.f32.mrb[19].mxu0  ;;  %v1391_v36 = vmul.f32 %v1389_v16, %v1376_v53  ;;  %4748 = vmatprep.mubr.msk.f32.mxu1 %vm403_vm13, %v1390_v13  ;;  %v1478_v12 = vmul.f32 %v1476_v32, %v1376_v53  ;;  %4759 = vmatprep.mubr.msk.f32.mxu0 %vm403_vm13, %v1477_v38  ;;  %v1691_v23 = vmul.f32 %v5874_v26, %v1376_v53 }
 0x84f   :  { %v1641_v24 = vmul.f32 %v5877_v27, %v1376_v53  ;;  %v6173_v25 = vmul.f32 %v5880_v28, %v1376_v53  ;;  %v6179_v30 = vmul.f32 %v5883_v33, %v1376_v53  ;;  %v1186_v11 = vmul.f32 %v4562_v8, %v6108_v29 }
 0x850   :  { %4749 = vmatmul.mubr.msk.f32.vlgmr.msra.gmra.mrb[12].mxu1 %vm403_vm13, %v1391_v36  ;;  %4760 = vmatmul.mubr.msk.f32.vlgmr.msra.gmra.mrb[6].mxu0 %vm403_vm13, %v1478_v12  ;;  %v1693_v31 = vpack.c.bf16 %v1691_v23, %v1690_v10 }
 0x851   :  { %v1643_v51 = vpack.c.bf16 %v1641_v24, %v1640_v60  ;;  %4764 = vmatprep.mubr.msk.bf16.mxu1 %vm5558_vm0, %v7008_v1  ;;  %4770 = vmatprep.mubr.msk.bf16.mxu0 %vm5558_vm0, %v7008_v1  ;;  %v1187_v60 = vmul.f32 %v4563_v61, %v6101_v34  ;;  %v6208_v36 = vmul.f32 %v6135_v17, %v1186_v11 }
 0x852   :  { %4763 = vmatpush3.bf16.msra.mxu1 %v1693_v31 }
 0x853   :  { %4769 = vmatpush3.bf16.msra.mxu0 %v1643_v51  ;;  %4774 = vmatprep.subr.bf16.mxu1 %v7008_v1  ;;  %v6211_v12 = vmul.f32 %v6135_v17, %v1187_v60  ;;  %v1380_v31 = vmul.f32 %v6208_v36, %v5944_v9 }
 0x854   :  { %4780 = vmatprep.subr.bf16.mxu0 %v7008_v1 }
 0x855   :  { %v1381_v51 = vmul.f32 %v6211_v12, %v5929_v62 }
 0x8cb   :  { %v6193_v42 = vpop.f32.mrb[2].mxu1 }
 0x8cc   :  { %7041 = vst [vmem:[#allocation39_spill] sm:$0xff] %v6193_v42  ;;  %v4731_v50 = vpop.f32.mrb[3].mxu1 }
 0x923   :  { %v4750_v16 = vpop.f32.mrb[12].mxu1  ;;  %v4761_v32 = vpop.f32.mrb[6].mxu0 }
 0x924   :  { %v1464_v5 = vpop.f32.mrb[13].mxu1  ;;  %1649 = vperm.xlu1 %5038, %v4761_v32   ;;  %v1551_v52 = vpop.f32.mrb[7].mxu0 }
 0x925   :  { %1645 = vperm.xlu0 %5039, %v1551_v52  }
 0x928   :  { %5041 = vset.pattern.permute.xlu1 %v6998_v54 }
 0x929   :  { %1787 = vperm.xlu1 %5041, %v4761_v32   ;;  %5040 = vset.pattern.permute.xlu0 %v7004_v20 }
 0x92a   :  { %1599 = vperm.xlu0 %5040, %v4761_v32  }
 0x92d   :  { %5042 = vset.pattern.permute.xlu1 %v7004_v20 }
 0x92e   :  { %1594 = vperm.xlu1 %5042, %v1551_v52   ;;  %5044 = vset.pattern.permute.xlu0 %v6996_v55 }
 0x92f   :  { %1879 = vperm.xlu0 %5044, %v1551_v52  }
 0x932   :  { %5043 = vset.pattern.permute.xlu1 %v6998_v54 }
 0x933   :  { %1783 = vperm.xlu1 %5043, %v1551_v52  }
 0x937   :  { %5045 = vset.pattern.permute.xlu1 %v6996_v55 }
 0x938   :  { %1883 = vperm.xlu1 %5045, %v4761_v32   ;;  %v6221_v32 = vadd.f32 %v5934_v63, %v1380_v31 }
 0x93a   :  { %vm1384_vm12 = vcmp.gt.f32.partialorder %v6221_v32, 0.0 }
 0x961   :  { %1560 = vxpose.xlu1.b32.start [1/2] (short) (narrow) %v1464_v5, 8  ;;  %v6224_v5 = vadd.f32 %v5925_v59, %v1381_v51 }
 0x963   :  { %vm1385_vm14 = vcmp.gt.f32.partialorder %v6224_v5, 0.0 }
 0x965   :  { %1561 = vxpose.xlu1.b32.end [2/2] (short) (narrow) %v4750_v16, 8 }
 0x9a3   :  { %v1650_v13 = vpop.permute.xlu1 %1649 }
 0x9a4   :  { %v1646_v23 = vpop.permute.xlu0 %1645 }
 0x9a8   :  { %v1788_v38 = vpop.permute.xlu1 %1787 }
 0x9a9   :  { %v1600_v16 = vpop.permute.xlu0 %1599 }
 0x9ad   :  { %v1595_v53 = vpop.permute.xlu1 %1594 }
 0x9b2   :  { %v1784_v10 = vpop.permute.xlu1 %1783 }
 0x9b7   :  { %v1884_v24 = vpop.permute.xlu1 %1883 }
 0x9e1   :  { %v1576_v50 = vpop.trf.xlu1 }
 0x9e2   :  { %v1605_v61 = vrot.slane %v1576_v50, %v5857_v21  ;;  %v1655_v58 = vrot.slane %v1576_v50, %v5860_v22  ;;  %v1793_v8 = vrot.slane %v1576_v50, %v5940_v7 }
 0x9e4   :  { %v1794_v52 = vadd.f32 %v1793_v8, %v1784_v10  ;;  %v1657_v60 = vadd.f32 %v1655_v58, %v1650_v13  ;;  %v1607_v11 = vadd.f32 %v1605_v61, %v1600_v16  ;;  %v1656_v55 = vadd.f32 %v1655_v58, %v1646_v23 }
 0x9e5   :  { %v1606_v6 = vadd.f32 %v1605_v61, %v1595_v53  ;;  %v1795_v61 = vadd.f32 %v1793_v8, %v1788_v38 }
 0x9e6   :  { %vm1796_vm9 = vcmp.ge.f32.partialorder %v1794_v52, 0.0  ;;  %v1798_v54 = vmul.f32 0.2, %v1794_v52  ;;  %vm1659_vm11 = vcmp.ge.f32.partialorder %v1657_v60, 0.0  ;;  %v1661_v19 = vmul.f32 0.2, %v1657_v60 }
 0x9e7   :  { %vm1609_vm1 = vcmp.ge.f32.partialorder %v1607_v11, 0.0  ;;  %v1611_v15 = vmul.f32 0.2, %v1607_v11  ;;  %v1660_v40 = vmul.f32 0.2, %v1656_v55  ;;  %vm1658_vm2 = vcmp.ge.f32.partialorder %v1656_v55, 0.0 }
 0x9e8   :  { %v1800_v20 = vsel %vm1796_vm9, %v1794_v52, %v1798_v54  ;;  %v1663_v31 = vsel %vm1659_vm11, %v1657_v60, %v1661_v19  ;;  %v1889_v54 = vrot.slane %v1576_v50, %v5957_v35  ;;  %vm1608_vm3 = vcmp.ge.f32.partialorder %v1606_v6, 0.0 }
 0x9e9   :  { %v6230_v10 = vsel %vm1384_vm12, %v1800_v20, -1e+30  ;;  %v1665_v13 = vsel %vm1385_vm14, %v1663_v31, -1e+30  ;;  %v1613_v23 = vsel %vm1609_vm1, %v1607_v11, %v1611_v15  ;;  %v1662_v53 = vsel %vm1658_vm2, %v1656_v55, %v1660_v40  ;;  %v1880_v15 = vpop.permute.xlu0 %1879 }
 0x9ea   :  { %v1804_v51 = vsel %vm346_vm6, %v6230_v10, -inf  ;;  %v1669_v58 = vsel %vm346_vm6, %v1665_v13, -inf  ;;  %v1615_v19 = vsel %vm1385_vm14, %v1613_v23, -1e+30  ;;  %v1610_v20 = vmul.f32 0.2, %v1606_v6 }
 0x9eb   :  { %1805 = vmax.xlane.f32.xlu1 %v1804_v51  ;;  %1670 = vmax.xlane.f32.xlu0 %v1669_v58  ;;  %v1619_v16 = vsel %vm346_vm6, %v1615_v19, -inf  ;;  %v1664_v52 = vsel %vm1384_vm12, %v1662_v53, -1e+30  ;;  %v1799_v11 = vmul.f32 0.2, %v1795_v61  ;;  %v1890_v31 = vadd.f32 %v1889_v54, %v1880_v15 }
 0x9ec   :  { %v1612_v60 = vsel %vm1608_vm3, %v1606_v6, %v1610_v20  ;;  %vm1797_vm4 = vcmp.ge.f32.partialorder %v1795_v61, 0.0  ;;  %v1666_v51 = vsel %vm346_vm6, %v1664_v52, -inf  ;;  %v1891_v50 = vadd.f32 %v1889_v54, %v1884_v24 }
 0x9ed   :  { %v1614_v55 = vsel %vm1384_vm12, %v1612_v60, -1e+30  ;;  %v1801_v40 = vsel %vm1797_vm4, %v1795_v61, %v1799_v11  ;;  %v1894_v38 = vmul.f32 0.2, %v1890_v31  ;;  %vm1892_vm7 = vcmp.ge.f32.partialorder %v1890_v31, 0.0 }
 0x9ee   :  { %v1616_v8 = vsel %vm346_vm6, %v1614_v55, -inf  ;;  %v1803_v23 = vsel %vm1385_vm14, %v1801_v40, -1e+30  ;;  %v1895_v58 = vmul.f32 0.2, %v1891_v50  ;;  %vm1893_vm9 = vcmp.ge.f32.partialorder %v1891_v50, 0.0 }
 0x9ef   :  { %1620 = vmax.xlane.f32.xlu0 %v1619_v16  ;;  %v1896_v6 = vsel %vm1892_vm7, %v1890_v31, %v1894_v38  ;;  %v1807_v53 = vsel %vm346_vm6, %v1803_v23, -inf  ;;  %vm2052_vm11 = vcmask 257027  }
 0x9f0   :  { %v1898_v20 = vsel %vm1384_vm12, %v1896_v6, -1e+30  ;;  %v1897_v16 = vsel %vm1893_vm9, %v1891_v50, %v1895_v58 }
 0x9f1   :  { %v1900_v61 = vsel %vm346_vm6, %v1898_v20, -inf  ;;  %v1899_v24 = vsel %vm1385_vm14, %v1897_v16, -1e+30 }
 0x9f2   :  { %v1903_v54 = vsel %vm346_vm6, %v1899_v24, -inf }
 0x9f3   :  { %1667 = vmax.xlane.f32.xlu0 %v1666_v51 }
 0x9f7   :  { %1617 = vmax.xlane.f32.xlu0 %v1616_v8 }
 0x9fb   :  { %1808 = vmax.xlane.f32.xlu0 %v1807_v53 }
 0x9ff   :  { %1901 = vmax.xlane.f32.xlu0 %v1900_v61 }
 0xa03   :  { %1904 = vmax.xlane.f32.xlu0 %v1903_v54 }
 0xa78   :  { %v1671_v15 = vpop.xlane.xlu0 %1670  ;;  %v1806_v61 = vpop.xlane.xlu1 %1805 }
 0xa79   :  { %v1673_v60 = vsub.f32 %v1665_v13, %v1671_v15  ;;  %v1810_v15 = vsub.f32 %v6230_v10, %v1806_v61 }
 0xa7b   :  { %v1676_v11 = vmul.f32 1.442695, %v1673_v60 }
 0xa7c   :  { %v1621_v31 = vpop.xlane.xlu0 %1620 }
 0xa7d   :  { %v1623_v51 = vsub.f32 %v1615_v19, %v1621_v31  ;;  %5114 = vpow2.f32 %v1676_v11 }
 0xa7f   :  { %v1626_v40 = vmul.f32 1.442695, %v1623_v51 }
 0xa80   :  { %v1668_v38 = vpop.xlane.xlu0 %1667 }
 0xa81   :  { %5116 = vpow2.f32 %v1626_v40  ;;  %v1672_v8 = vsub.f32 %v1664_v52, %v1668_v38 }
 0xa83   :  { %v1674_v58 = vmul.f32 1.442695, %v1672_v8 }
 0xa84   :  { %v1618_v50 = vpop.xlane.xlu0 %1617 }
 0xa85   :  { %v1622_v1 = vsub.f32 %v1614_v55, %v1618_v50  ;;  %5118 = vpow2.f32 %v1674_v58 }
 0xa87   :  { %v5115_v6 = vpop.eup %5114  ;;  %v1624_v11 = vmul.f32 1.442695, %v1622_v1 }
 0xa88   :  { %v1809_v53 = vpop.xlane.xlu0 %1808  ;;  %v6257_v39 = vmul.f32 %v5115_v6, %v6224_v5 }
 0xa89   :  { %v1811_v16 = vsub.f32 %v1803_v23, %v1809_v53  ;;  %v1812_v23 = vmul.f32 1.442695, %v1810_v15 }
 0xa8a   :  { %v1683_v19 = vsel %vm346_vm6, %v6257_v39, 0.0 }
 0xa8b   :  { %v5117_v54 = vpop.eup %5116  ;;  %v1814_v13 = vmul.f32 1.442695, %v1811_v16  ;;  %1684 = vadd.xlane.f32.xlu0 %v1683_v19 }
 0xa8c   :  { %v1902_v52 = vpop.xlane.xlu0 %1901  ;;  %v6263_v60 = vmul.f32 %v5117_v54, %v6224_v5 }
 0xa8d   :  { %5120 = vpow2.f32 %v1814_v13  ;;  %v1906_v51 = vsub.f32 %v1898_v20, %v1902_v52 }
 0xa8e   :  { %v1633_v55 = vsel %vm346_vm6, %v6263_v60, 0.0  ;;  %5122 = vpow2.f32 %v1624_v11 }
 0xa8f   :  { %1634 = vadd.xlane.f32.xlu0 %v1633_v55  ;;  %5124 = vpow2.f32 %v1812_v23  ;;  %v1908_v10 = vmul.f32 1.442695, %v1906_v51  ;;  %v5119_v8 = vpop.eup %5118 }
 0xa90   :  { %v1905_v31 = vpop.xlane.xlu0 %1904  ;;  %v1678_v58 = vmul.f32 %v5119_v8, %v6221_v32 }
 0xa91   :  { %v1907_v40 = vsub.f32 %v1899_v24, %v1905_v31 }
 0xa92   :  { %v1680_v16 = vsel %vm346_vm6, %v1678_v58, 0.0 }
 0xa93   :  { %v1910_v38 = vmul.f32 1.442695, %v1907_v40 }
 0xa95   :  { %5126 = vpow2.f32 %v1910_v38 }
 0xa96   :  { %5128 = vpow2.f32 %v1908_v10 }
 0xa97   :  { %v5121_v50 = vpop.eup %5120 }
 0xa98   :  { %v1817_v6 = vmul.f32 %v5121_v50, %v6224_v5  ;;  %v5123_v53 = vpop.eup %5122 }
 0xa99   :  { %v5125_v61 = vpop.eup %5124  ;;  %v1628_v20 = vmul.f32 %v5123_v53, %v6221_v32 }
 0xa9a   :  { %v1821_v1 = vsel %vm346_vm6, %v1817_v6, 0.0  ;;  %v1816_v15 = vmul.f32 %v5125_v61, %v6221_v32 }
 0xa9b   :  { %1822 = vadd.xlane.f32.xlu0 %v1821_v1  ;;  %v1630_v13 = vsel %vm346_vm6, %v1628_v20, 0.0 }
 0xa9c   :  { %v1818_v11 = vsel %vm346_vm6, %v1816_v15, 0.0 }
 0xa9f   :  { %v5127_v24 = vpop.eup %5126  ;;  %1681 = vadd.xlane.f32.xlu0 %v1680_v16 }
 0xaa0   :  { %v1913_v54 = vmul.f32 %v5127_v24, %v6224_v5  ;;  %v5129_v52 = vpop.eup %5128 }
 0xaa1   :  { %v1912_v55 = vmul.f32 %v5129_v52, %v6221_v32 }
 0xaa2   :  { %v1917_v19 = vsel %vm346_vm6, %v1913_v54, 0.0 }
 0xaa3   :  { %1631 = vadd.xlane.f32.xlu0 %v1630_v13  ;;  %1918 = vadd.xlane.f32.xlu1 %v1917_v19  ;;  %v1914_v23 = vsel %vm346_vm6, %v1912_v55, 0.0 }
 0xaa7   :  { %1819 = vadd.xlane.f32.xlu0 %v1818_v11 }
 0xaab   :  { %1915 = vadd.xlane.f32.xlu0 %v1914_v23  ;;  %v7042_v23 = vpack.c.bf16 %v6173_v25, %v6166_v0 }
 0xb18   :  { %v1685_v31 = vpop.xlane.xlu0 %1684 }
 0xb19   :  { %5130 = vrcp.f32 %v1685_v31  ;;  %v7043_v31 = vmov 0.0  }
 0xb1c   :  { %v1635_v51 = vpop.xlane.xlu0 %1634 }
 0xb23   :  { %v5131_v50 = vpop.eup %5130 }
 0xb24   :  { %v1689_v32 = vmul.f32 %v5131_v50, %v6257_v39  ;;  %v7044_v39 = vmov 0.0|0.0  }
 0xb28   :  { %v1823_v5 = vpop.xlane.xlu0 %1822 }
 0xb2c   :  { %v1682_v40 = vpop.xlane.xlu0 %1681 }
 0xb2d   :  { %5132 = vrcp.f32 %v1682_v40 }
 0xb2e   :  { %5134 = vrcp.f32 %v1635_v51 }
 0xb30   :  { %v1632_v38 = vpop.xlane.xlu0 %1631  ;;  %v1919_v10 = vpop.xlane.xlu1 %1918 }
 0xb31   :  { %5136 = vrcp.f32 %v1632_v38 }
 0xb32   :  { %5138 = vrcp.f32 %v1823_v5 }
 0xb34   :  { %v1820_v8 = vpop.xlane.xlu0 %1819 }
 0xb35   :  { %5140 = vrcp.f32 %v1820_v8 }
 0xb36   :  { %5142 = vrcp.f32 %v1919_v10 }
 0xb37   :  { %v5133_v1 = vpop.eup %5132 }
 0xb38   :  { %v1688_v53 = vmul.f32 %v5133_v1, %v1678_v58  ;;  %v1916_v61 = vpop.xlane.xlu0 %1915  ;;  %v5135_v16 = vpop.eup %5134 }
 0xb39   :  { %5144 = vrcp.f32 %v1916_v61  ;;  %v1639_v52 = vmul.f32 %v5135_v16, %v6263_v60  ;;  %v7045_v60 = vpack.c.bf16 %v6179_v30, %v6176_v41  ;;  %v6301_v41 = vld [vmem:[#allocation15 + $0x8] sm:$0xff] }
 0xb3a   :  { %v1692_v24 = vpack.c.bf16 %v1689_v32, %v1688_v53  ;;  %v2051_v30 = vmul.f32 %v6301_v41, %v6301_v41 }
 0xb3b   :  { %v5137_v13 = vpop.eup %5136 }
 0xb3c   :  { %4765 = vmatmul.mubr.msk.bf16.vlgmr.msra.gmra.mrb[16].mxu1 %vm346_vm6, %v1692_v24  ;;  %v5139_v19 = vpop.eup %5138  ;;  %v1638_v11 = vmul.f32 %v5137_v13, %v1628_v20 }
 0xb3d   :  { %4775 = vmatpush3.bf16.msra.mxu1 %v7042_v23  ;;  %4776 = vmatprep.mubr.msk.bf16.mxu1 %vm5558_vm0, %v7043_v31  ;;  %v1827_v5 = vmul.f32 %v5139_v19, %v1817_v6 }
 0xb3e   :  { %4966 = vmatprep.subr.bf16.mxu1 %v7044_v39  ;;  %v1642_v51 = vpack.c.bf16 %v1639_v52, %v1638_v11 }
 0xb3f   :  { %v5141_v58 = vpop.eup %5140 }
 0xb40   :  { %v1826_v40 = vmul.f32 %v5141_v58, %v1816_v15  ;;  %v5143_v38 = vpop.eup %5142  ;;  %4771 = vmatmul.mubr.msk.bf16.vlgmr.msra.gmra.mrb[20].mxu0 %vm346_vm6, %v1642_v51  ;;  %v2053_v15 = vsel %vm2052_vm11, %v2051_v30, 0.0  ;;  %v1977_v51 = vrot.slane %v6301_v41, %v5857_v21  ;;  %v1998_v30 = vadd.f32 %v6101_v34, %v6108_v29 }
 0xb41   :  { %4781 = vmatpush3.bf16.msra.mxu0 %v7045_v60  ;;  %4782 = vmatprep.mubr.msk.bf16.mxu0 %vm5558_vm0, %v7043_v31  ;;  %v1923_v25 = vmul.f32 %v5143_v38, %v1913_v54 }
 0xb42   :  { %v1830_v20 = vpack.c.bf16 %v1827_v5, %v1826_v40  ;;  %4793 = vmatprep.subr.bf16.mxu0 %v7043_v31  ;;  %2054 = vadd.xlane.f32.xlu0 %v2053_v15 }
 0xb43   :  { %v5145_v0 = vpop.eup %5144 }
 0xb44   :  { %v1922_v10 = vmul.f32 %v5145_v0, %v1912_v55  ;;  %4777 = vmatmul.mubr.msk.bf16.vlgmr.msra.gmra.mrb[20].mxu1 %vm346_vm6, %v1830_v20 }
 0xb45   :  { %4790 = vmatprep.mubr.msk.f32.mxu1 %vm5558_vm0, %v7043_v31 }
 0xb46   :  { %v1926_v6 = vpack.c.bf16 %v1923_v25, %v1922_v10 }
 0xb48   :  { %4783 = vmatmul.mubr.msk.bf16.vlgmr.msra.gmra.mrb[24].mxu0 %vm346_vm6, %v1926_v6 }
 0xb49   :  { %4797 = vmatprep.mubr.msk.bf16.mxu0 %vm5558_vm0, %v7043_v31 }
 0xc0f   :  { %v1731_v54 = vpop.f32.mrb[16].mxu1 }
 0xc10   :  { %v4766_v55 = vpop.f32.mrb[17].mxu1 }
 0xc11   :  { %v1734_v8 = vpop.f32.mrb[18].mxu1 }
 0xc12   :  { %v4767_v50 = vpop.f32.mrb[19].mxu1 }
 0xc13   :  { %v1775_v1 = vpop.f32.mrb[20].mxu0  ;;  %v1999_v50 = vrot.slane %v1998_v30, 4 }
 0xc14   :  { %v1776_v32 = vadd.f32 %v1775_v1, %v1731_v54  ;;  %v4772_v53 = vpop.f32.mrb[21].mxu0 }
 0xc15   :  { %v1778_v61 = vpop.f32.mrb[22].mxu0 }
 0xc16   :  { %v1779_v16 = vadd.f32 %v1778_v61, %v1734_v8  ;;  %v4773_v24 = vpop.f32.mrb[23].mxu0 }
 0xc17   :  { %v1869_v13 = vpop.f32.mrb[20].mxu1 }
 0xc18   :  { %v1876_v19 = vadd.f32 %v1869_v13, %v1776_v32  ;;  %v4778_v52 = vpop.f32.mrb[21].mxu1 }
 0xc19   :  { %v1872_v11 = vpop.f32.mrb[22].mxu1 }
 0xc1a   :  { %v1877_v23 = vadd.f32 %v1872_v11, %v1779_v16  ;;  %v4779_v58 = vpop.f32.mrb[23].mxu1  ;;  %v2000_v16 = vadd.f32 %v1999_v50, %v1998_v30 }
 0xc1b   :  { %v1965_v5 = vpop.f32.mrb[24].mxu0 }
 0xc1c   :  { %v1972_v40 = vadd.f32 %v1965_v5, %v1876_v19  ;;  %v4784_v38 = vpop.f32.mrb[25].mxu0  ;;  %v2001_v13 = vrot.slane %v2000_v16, 2 }
 0xc1d   :  { %v1968_v60 = vpop.f32.mrb[26].mxu0 }
 0xc1e   :  { %v1978_v20 = vadd.f32 %v1977_v51, %v1972_v40  ;;  %v1973_v0 = vadd.f32 %v1968_v60, %v1877_v23  ;;  %v4785_v25 = vpop.f32.mrb[27].mxu0  ;;  %v2002_v19 = vadd.f32 %v2001_v13, %v2000_v16 }
 0xc20   :  { %v1982_v10 = vmul.f32 0.044715, %v1978_v20  ;;  %v1979_v6 = vadd.f32 %v1977_v51, %v1973_v0  ;;  %v2003_v11 = vrot.slane %v2002_v19, 1  ;;  %v1980_v23 = vmul.f32 0.5, %v1978_v20 }
 0xc22   :  { %v1984_v15 = vmul.f32 %v1982_v10, %v1978_v20  ;;  %v1983_v54 = vmul.f32 0.044715, %v1979_v6  ;;  %v1981_v5 = vmul.f32 0.5, %v1979_v6  ;;  %v2004_v0 = vadd.f32 %v2003_v11, %v2002_v19 }
 0xc24   :  { %v1986_v55 = vmul.f32 %v1984_v15, %v1978_v20  ;;  %v1985_v8 = vmul.f32 %v1983_v54, %v1979_v6  ;;  %v2005_v30 = vmax.f32 %v2004_v0, 1.0 }
 0xc26   :  { %v1988_v1 = vadd.f32 %v1986_v55, %v1978_v20  ;;  %v1987_v32 = vmul.f32 %v1985_v8, %v1979_v6 }
 0xc28   :  { %v1990_v53 = vmul.f32 0.7978846, %v1988_v1  ;;  %v1989_v61 = vadd.f32 %v1987_v32, %v1979_v6 }
 0xc2a   :  { %5146 = vtanh.f32 %v1990_v53  ;;  %v1991_v24 = vmul.f32 0.7978846, %v1989_v61 }
 0xc2c   :  { %5148 = vtanh.f32 %v1991_v24 }
 0xc2d   :  { %5150 = vrcp.f32 %v2005_v30 }
 0xc34   :  { %v5147_v52 = vpop.eup %5146 }
 0xc35   :  { %v1994_v58 = vadd.f32 1.0, %v5147_v52 }
 0xc36   :  { %v5149_v51 = vpop.eup %5148 }
 0xc37   :  { %v1995_v40 = vadd.f32 1.0, %v5149_v51  ;;  %v1996_v38 = vmul.f32 %v1994_v58, %v1980_v23  ;;  %v5151_v53 = vpop.eup %5150 }
 0xc39   :  { %v1997_v60 = vmul.f32 %v1995_v40, %v1981_v5  ;;  %v2007_v25 = vmul.f32 %v6108_v29, %v1996_v38 }
 0xc3b   :  { %v2008_v10 = vmul.f32 %v6101_v34, %v1997_v60  ;;  %v2009_v15 = vsel %vm403_vm13, %v2007_v25, 0.0 }
 0xc3d   :  { %v2010_v54 = vsel %vm403_vm13, %v2008_v10, 0.0 }
 0xc3e   :  { %v2011_v55 = vadd.f32 %v2010_v54, %v2009_v15 }
 0xc40   :  { %v2012_v8 = vrot.slane %v2011_v55, 4 }
 0xc42   :  { %v2013_v20 = vadd.f32 %v2012_v8, %v2011_v55  ;;  %v2048_v8 = vrot.slane %v6301_v41, %v5940_v7 }
 0xc44   :  { %v2014_v50 = vrot.slane %v2013_v20, 2 }
 0xc46   :  { %v2015_v1 = vadd.f32 %v2014_v50, %v2013_v20 }
 0xc48   :  { %v2016_v6 = vrot.slane %v2015_v1, 1 }
 0xc4a   :  { %v2017_v32 = vadd.f32 %v2016_v6, %v2015_v1  ;;  %v2060_v1 = vrot.slane %v6301_v41, %v5957_v35 }
 0xc4c   :  { %v2018_v61 = vmul.f32 %v5151_v53, %v2017_v32 }
 0xc4e   :  { %v2019_v16 = vsub.f32 %v1996_v38, %v2018_v61  ;;  %v2020_v24 = vsub.f32 %v1997_v60, %v2018_v61  ;;  %v2042_v60 = vrot.slane %v6301_v41, %v5860_v22 }
 0xc50   :  { %v2021_v13 = vmul.f32 %v2019_v16, %v2019_v16  ;;  %v2022_v19 = vmul.f32 %v2020_v24, %v2020_v24 }
 0xc52   :  { %v2023_v52 = vmul.f32 %v6108_v29, %v2021_v13  ;;  %v2024_v11 = vmul.f32 %v6101_v34, %v2022_v19 }
 0xc54   :  { %v2025_v23 = vsel %vm403_vm13, %v2023_v52, 0.0  ;;  %v2026_v58 = vsel %vm403_vm13, %v2024_v11, 0.0  ;;  %v2110_v11 = vmul.f32 %v6068_v48, %v6135_v17 }
 0xc55   :  { %v2027_v51 = vadd.f32 %v2026_v58, %v2025_v23  ;;  %v2055_v58 = vpop.xlane.xlu0 %2054 }
 0xc56   :  { %v2138_v23 = vsel %vm346_vm6, %v2110_v11, 0.0 }
 0xc57   :  { %v2028_v5 = vrot.slane %v2027_v51, 4 }
 0xc59   :  { %v2029_v40 = vadd.f32 %v2028_v5, %v2027_v51 }
 0xc5b   :  { %v2030_v0 = vrot.slane %v2029_v40, 2 }
 0xc5d   :  { %v2031_v25 = vadd.f32 %v2030_v0, %v2029_v40 }
 0xc5f   :  { %v2032_v10 = vrot.slane %v2031_v25, 1 }
 0xc61   :  { %v2033_v30 = vadd.f32 %v2032_v10, %v2031_v25 }
 0xc63   :  { %v2034_v15 = vmul.f32 %v5151_v53, %v2033_v30 }
 0xc65   :  { %v2035_v38 = vadd.f32 1e-05, %v2034_v15 }
 0xc67   :  { %5152 = vrsqrt.f32 %v2035_v38 }
 0xc68   :  { %5154 = vrsqrt.f32 %v2055_v58 }
 0xc71   :  { %v5153_v54 = vpop.eup %5152 }
 0xc72   :  { %v2038_v55 = vmul.f32 %v5153_v54, %v2020_v24  ;;  %v2037_v20 = vmul.f32 %v5153_v54, %v2019_v16  ;;  %v2109_v16 = vmul.f32 %v6065_v37, %v6135_v17  ;;  %v5155_v51 = vpop.eup %5154  ;;  %v7046_v17 = vmov 0  }
 0xc73   :  { %v2072_v5 = vrot.slane %v5155_v51, %v5957_v35 }
 0xc74   :  { %v2044_v50 = vmul.f32 %v2042_v60, %v2038_v55  ;;  %v2043_v6 = vmul.f32 %v2042_v60, %v2037_v20  ;;  %v2135_v52 = vsel %vm346_vm6, %v2109_v16, 0.0 }
 0xc76   :  { %v6323_v32 = vadd.f32 %v2048_v8, %v2044_v50  ;;  %v6325_v61 = vadd.f32 %v2048_v8, %v2043_v6  ;;  %v2330_v6 = vld [vmem:[#allocation12] sm:$0xff] }
 0xc78   :  { %v2062_v53 = vmul.f32 %v2060_v1, %v6323_v32  ;;  %v2061_v13 = vmul.f32 %v2060_v1, %v6325_v61 }
 0xc7a   :  { %v2066_v19 = vsel %vm403_vm13, %v2062_v53, 0.0  ;;  %v2063_v24 = vsel %vm403_vm13, %v2061_v13, 0.0  ;;  %v2331_v53 = vld [vmem:[#allocation12 + $0x8] sm:$0xff]  ;;  %v2332_v13 = vld [vmem:[#allocation12 + $0x10] sm:$0xff] }
 0xc7b   :  { %2067 = vadd.xlane.f32.xlu0 %v2066_v19  ;;  %2064 = vadd.xlane.f32.xlu1 %v2063_v24  ;;  %v2335_v19 = vpack.c.bf16 %v2331_v53, %v2330_v6  ;;  %v2333_v24 = vld [vmem:[#allocation12 + $0x18] sm:$0xff]  ;;  %v2390_v6 = vrot.slane %v6301_v41, %v6036_v43  ;;  %v2477_v53 = vrot.slane %v6301_v41, %v6041_v56 }
 0xc7d   :  { %4794 = vmatpush3.bf16.msra.mxu0 %v2335_v19 }
 0xc7e   :  { %4795 = vmatprep.subr.bf16.mxu0 %v7043_v31 }
 0xc7f   :  { %2136 = vadd.xlane.f32.xlu0 %v2135_v52  ;;  %v2336_v52 = vpack.c.bf16 %v2333_v24, %v2332_v13 }
 0xc81   :  { %4796 = vmatpush3.bf16.msra.mxu0 %v2336_v52 }
 0xc83   :  { %2139 = vadd.xlane.f32.xlu0 %v2138_v23 }
 0xd08   :  { %v2065_v40 = vpop.xlane.xlu1 %2064  ;;  %v2068_v0 = vpop.xlane.xlu0 %2067 }
 0xd09   :  { %v2073_v25 = vmul.f32 %v2072_v5, %v2065_v40  ;;  %v2074_v10 = vmul.f32 %v2072_v5, %v2068_v0 }
 0xd0b   :  { %5156 = vtanh.f32 %v2073_v25 }
 0xd0c   :  { %5158 = vtanh.f32 %v2074_v10  ;;  %v2137_v23 = vpop.xlane.xlu0 %2136 }
 0xd10   :  { %v2140_v58 = vpop.xlane.xlu0 %2139 }
 0xd11   :  { %v2142_v5 = vmul.f32 0.5, %v2140_v58 }
 0xd13   :  { %v2144_v25 = vceil.f32 %v2142_v5 }
 0xd15   :  { %v5157_v30 = vpop.eup %5156 }
 0xd16   :  { %2077 = vxpose.xlu1.b32.start [1/2] (short) (narrow) %v5157_v30, 8  ;;  %v5159_v15 = vpop.eup %5158 }
 0xd1a   :  { %2078 = vxpose.xlu1.b32.end [2/2] (short) (narrow) %v5159_v15, 8 }
 0xd38   :  { %5047 = vset.pattern.permute.xlu1 %v7046_v17 }
 0xd96   :  { %v2093_v38 = vpop.trf.xlu1 }
 0xd97   :  { %v2114_v60 = vrot.slane %v2093_v38, %v5857_v21 }
 0xd99   :  { %vm2115_vm12 = vcmp.gt.f32.partialorder %v2114_v60, %v5157_v30  ;;  %vm2117_vm14 = vcmp.eq.f32.partialorder %v2114_v60, %v5157_v30  ;;  %vm2118_vm1 = vcmp.eq.f32.partialorder %v2114_v60, %v5159_v15  ;;  %vm2116_vm3 = vcmp.gt.f32.partialorder %v2114_v60, %v5159_v15 }
 0xd9a   :  { %vm2119_vm2 = vmand %vm2117_vm14, %vm211_vm10 }
 0xd9b   :  { %vm2121_vm4 = vmor %vm2115_vm12, %vm2119_vm2 }
 0xd9c   :  { %v4508_v54 = vsel %vm2121_vm4, 1.0, %v7043_v31  ;;  %vm2120_vm7 = vmand %vm2118_vm1, %vm212_vm5 }
 0xd9d   :  { %v2127_v55 = vmul.f32 %v4508_v54, %v2109_v16  ;;  %vm2122_vm9 = vmor %vm2116_vm3, %vm2120_vm7  ;;  %v7047_v16 = vmov 1.0|1.0  }
 0xd9e   :  { %v4509_v8 = vsel %vm2122_vm9, 1.0, %v7043_v31  ;;  %4978 = vmatprep.subr.msk.bf16.mxu0 %vm5815_vm8, %v7047_v16 }
 0xd9f   :  { %v2129_v20 = vsel %vm346_vm6, %v2127_v55, 0.0  ;;  %v2128_v50 = vmul.f32 %v4509_v8, %v2110_v11  ;;  %v2141_v11 = vmul.f32 0.5, %v2137_v23  ;;  %v2185_v55 = vmul.f32 %v5157_v30, %v6325_v61 }
 0xda0   :  { %2130 = vadd.xlane.f32.xlu0 %v2129_v20  ;;  %v2186_v8 = vmul.f32 %v5159_v15, %v6323_v32  ;;  %v7050_v32 = vmov 1  }
 0xda1   :  { %v2132_v1 = vsel %vm346_vm6, %v2128_v50, 0.0  ;;  %v2143_v51 = vceil.f32 %v2141_v11 }
 0xda4   :  { %2133 = vadd.xlane.f32.xlu0 %v2132_v1 }
 0xe2d   :  { %v2131_v40 = vpop.xlane.xlu0 %2130 }
 0xe2e   :  { %vm2145_vm11 = vcmp.lt.f32.partialorder %v2131_v40, %v2143_v51 }
 0xe2f   :  { %v4510_v0 = vsel %vm2145_vm11, 1.0, %v7043_v31 }
 0xe30   :  { %v6356_v10 = vmul.f32 %v4510_v0, %v6108_v29 }
 0xe31   :  { %v2134_v38 = vpop.xlane.xlu0 %2133 }
 0xe32   :  { %vm2146_vm12 = vcmp.lt.f32.partialorder %v2134_v38, %v2144_v25  ;;  %2153 = vxpose.xlu0.b32.start [1/2] (short) (narrow) %v6356_v10, 8  ;;  %v6367_v20 = vmul.f32 %v2185_v55, %v6356_v10 }
 0xe33   :  { %v4511_v60 = vsel %vm2146_vm12, 1.0, %v7043_v31 }
 0xe34   :  { %v6361_v54 = vmul.f32 %v4511_v60, %v6101_v34  ;;  %7048 = vst [vmem:[#allocation40_spill] sm:$0xff] %v6367_v20 }
 0xe36   :  { %2154 = vxpose.xlu0.b32.end [2/2] (short) (narrow) %v6361_v54, 8  ;;  %v6370_v50 = vmul.f32 %v2186_v8, %v6361_v54 }
 0xe38   :  { %7049 = vst [vmem:[#allocation41_spill] sm:$0xff] %v6370_v50  ;;  %v4967_v1 = vpack.c.bf16 %v6370_v50, %v6367_v20 }
 0xe3a   :  { %4968 = vmatpush3.bf16.msra.mxu1 %v4967_v1  ;;  %4798 = vmatmul.mubr.msk.bf16.vlgmr.msra.gmra.mrb[28].mxu0 %vm403_vm13, %v4967_v1 }
 0xe3b   :  { %4970 = vmatprep.subr.msk.bf16.mxu1 %vm5815_vm8, %v7047_v16  ;;  %4980 = vmatpush3.bf16.msk.msra.mxu0 %vm5815_vm8, %v7047_v16 }
 0xe3c   :  { %4982 = vmatprep.subr.msk.bf16.mxu0 %vm5834_vm15, %v7047_v16 }
 0xe3f   :  { %4984 = vmatpush3.bf16.msk.msra.mxu0 %vm5834_vm15, %v7047_v16  ;;  %v7071_v3 = vld [vmem:[#allocation41_spill] sm:$0xff] }
 0xe40   :  { %4829 = vmatprep.subr.bf16.mxu0 %v7043_v31 }
 0xe5f   :  { %5046 = vset.pattern.permute.xlu0 %v7050_v32 }
 0xeb2   :  { %v2169_v61 = vpop.trf.xlu0 }
 0xeb3   :  { %v6390_v30 = vrot.slane %v2169_v61, %v5857_v21 }
 0xeb5   :  { %v6394_v15 = vmul.f32 %v6390_v30, %v6132_v46 }
 0xeb7   :  { %7051 = vst [vmem:[#allocation42_spill] sm:$0xff] %v6394_v15  ;;  %4791 = vmatmul.mubr.msk.f32.vlgmr.msra.gmra.mrb[14].mxu1 %vm346_vm6, %v6394_v15 }
 0xeb8   :  { %4972 = vmatpush3.bf16.msk.msra.mxu1 %vm5815_vm8, %v7047_v16 }
 0xeb9   :  { %4974 = vmatprep.subr.msk.bf16.mxu1 %vm5834_vm15, %v7047_v16 }
 0xebc   :  { %4976 = vmatpush3.bf16.msk.msra.mxu1 %vm5834_vm15, %v7047_v16 }
 0xebd   :  { %4823 = vmatprep.subr.bf16.mxu1 %v7043_v31 }
 0xf0d   :  { %v2374_v13 = vpop.f32.mrb[28].mxu0 }
 0xf0e   :  { %v4799_v19 = vpop.f32.mrb[29].mxu0  ;;  %v2391_v24 = vmul.f32 %v2390_v6, %v2374_v13  ;;  %v2478_v52 = vmul.f32 %v2477_v53, %v2374_v13  ;;  %v2691_v11 = vmul.f32 %v5874_v26, %v2374_v13  ;;  %v2641_v58 = vmul.f32 %v5877_v27, %v2374_v13 }
 0xf0f   :  { %v2377_v23 = vpop.f32.mrb[30].mxu0  ;;  %v6415_v51 = vmul.f32 %v5880_v28, %v2374_v13  ;;  %v6425_v55 = vmul.f32 %v5883_v33, %v2374_v13 }
 0xf10   :  { %v4800_v5 = vpop.f32.mrb[31].mxu0  ;;  %v2392_v40 = vmul.f32 %v2390_v6, %v2377_v23  ;;  %4809 = vmatprep.mubr.msk.f32.mxu1 %vm403_vm13, %v2391_v24  ;;  %v2479_v0 = vmul.f32 %v2477_v53, %v2377_v23  ;;  %4820 = vmatprep.mubr.msk.f32.mxu0 %vm403_vm13, %v2478_v52  ;;  %v2692_v25 = vmul.f32 %v5874_v26, %v2377_v23 }
 0xf11   :  { %v2642_v38 = vmul.f32 %v5877_v27, %v2377_v23  ;;  %v6422_v60 = vmul.f32 %v5880_v28, %v2377_v23  ;;  %v6428_v8 = vmul.f32 %v5883_v33, %v2377_v23  ;;  %v7054_v5 = vmov 3  }
 0xf12   :  { %4810 = vmatmul.mubr.msk.f32.vlgmr.msra.gmra.mrb[24].mxu1 %vm403_vm13, %v2392_v40  ;;  %4821 = vmatmul.mubr.msk.f32.vlgmr.msra.gmra.mrb[32].mxu0 %vm403_vm13, %v2479_v0  ;;  %v2694_v1 = vpack.c.bf16 %v2692_v25, %v2691_v11  ;;  %v2190_v25 = vmul.f32 %v6361_v54, %v6211_v12 }
 0xf13   :  { %v2644_v61 = vpack.c.bf16 %v2642_v38, %v2641_v58  ;;  %4825 = vmatprep.mubr.msk.bf16.mxu1 %vm5558_vm0, %v7043_v31  ;;  %4831 = vmatprep.mubr.msk.bf16.mxu0 %vm5558_vm0, %v7043_v31  ;;  %v7053_v58 = vmov 2  }
 0xf14   :  { %4824 = vmatpush3.bf16.msra.mxu1 %v2694_v1  ;;  %v6452_v38 = vmul.f32 %v6390_v30, %v2190_v25 }
 0xf15   :  { %4830 = vmatpush3.bf16.msra.mxu0 %v2644_v61  ;;  %4835 = vmatprep.subr.bf16.mxu1 %v7043_v31 }
 0xf16   :  { %4841 = vmatprep.subr.bf16.mxu0 %v7043_v31  ;;  %v2382_v53 = vmul.f32 %v6452_v38, %v5929_v62 }
 0xf18   :  { %v6465_v6 = vadd.f32 %v5925_v59, %v2382_v53 }
 0xf1a   :  { %vm2386_vm2 = vcmp.gt.f32.partialorder %v6465_v6, 0.0 }
 0xf8a   :  { %v6442_v13 = vpop.f32.mrb[14].mxu1 }
 0xf8b   :  { %7052 = vst [vmem:[#allocation43_spill] sm:$0xff] %v6442_v13  ;;  %v4792_v19 = vpop.f32.mrb[15].mxu1 }
 0xf8c   :  { %v2189_v19 = vmul.f32 %v6356_v10, %v6208_v36 }
 0xfe5   :  { %v4811_v24 = vpop.f32.mrb[24].mxu1  ;;  %v4822_v52 = vpop.f32.mrb[32].mxu0 }
 0xfe6   :  { %2600 = vperm.xlu1 %5047, %v4822_v52   ;;  %2650 = vperm.xlu0 %5046, %v4822_v52   ;;  %v2465_v23 = vpop.f32.mrb[25].mxu1  ;;  %v2552_v11 = vpop.f32.mrb[33].mxu0 }
 0xfea   :  { %5048 = vset.pattern.permute.xlu1 %v7053_v58 }
 0xfeb   :  { %2788 = vperm.xlu1 %5048, %v4822_v52  }
 0xfef   :  { %5049 = vset.pattern.permute.xlu1 %v7050_v32 }
 0xff0   :  { %2646 = vperm.xlu1 %5049, %v2552_v11  }
 0xff4   :  { %5050 = vset.pattern.permute.xlu1 %v7046_v17 }
 0xff5   :  { %2595 = vperm.xlu1 %5050, %v2552_v11  }
 0xff9   :  { %5051 = vset.pattern.permute.xlu1 %v7053_v58 }
 0xffa   :  { %2784 = vperm.xlu1 %5051, %v2552_v11  }
 0xffe   :  { %5052 = vset.pattern.permute.xlu1 %v7054_v5 }
 0xfff   :  { %2880 = vperm.xlu1 %5052, %v2552_v11  }
0x1003   :  { %2884 = vperm.xlu1 %5052, %v4822_v52   ;;  %v6459_v52 = vmul.f32 %v6390_v30, %v2189_v19 }
0x1004   :  { %2561 = vxpose.xlu0.b32.start [1/2] (short) (narrow) %v2465_v23, 8 }
0x1005   :  { %v2381_v42 = vmul.f32 %v6459_v52, %v5944_v9 }
0x1008   :  { %2562 = vxpose.xlu0.b32.end [2/2] (short) (narrow) %v4811_v24, 8 }
0x1065   :  { %v2601_v40 = vpop.permute.xlu1 %2600  ;;  %v2651_v61 = vpop.permute.xlu0 %2650 }
0x106a   :  { %v2789_v0 = vpop.permute.xlu1 %2788 }
0x106f   :  { %v2647_v1 = vpop.permute.xlu1 %2646 }
0x1074   :  { %v2596_v24 = vpop.permute.xlu1 %2595 }
0x1079   :  { %v2785_v44 = vpop.permute.xlu1 %2784 }
0x1084   :  { %v2577_v23 = vpop.trf.xlu0 }
0x1085   :  { %v2606_v11 = vrot.slane %v2577_v23, %v5857_v21  ;;  %v2656_v12 = vrot.slane %v2577_v23, %v5860_v22  ;;  %v2794_v25 = vrot.slane %v2577_v23, %v5940_v7 }
0x1087   :  { %v2658_v50 = vadd.f32 %v2656_v12, %v2651_v61  ;;  %v2608_v20 = vadd.f32 %v2606_v11, %v2601_v40  ;;  %v2796_v36 = vadd.f32 %v2794_v25, %v2789_v0  ;;  %v2657_v13 = vadd.f32 %v2656_v12, %v2647_v1 }
0x1088   :  { %v2607_v56 = vadd.f32 %v2606_v11, %v2596_v24  ;;  %v6475_v61 = vadd.f32 %v5934_v63, %v2381_v42  ;;  %v2795_v24 = vadd.f32 %v2794_v25, %v2785_v44 }
0x1089   :  { %vm2660_vm14 = vcmp.ge.f32.partialorder %v2658_v50, 0.0  ;;  %v2662_v19 = vmul.f32 0.2, %v2658_v50  ;;  %vm2610_vm1 = vcmp.ge.f32.partialorder %v2608_v20, 0.0  ;;  %v2612_v47 = vmul.f32 0.2, %v2608_v20 }
0x108a   :  { %vm2798_vm3 = vcmp.ge.f32.partialorder %v2796_v36, 0.0  ;;  %v2800_v15 = vmul.f32 0.2, %v2796_v36  ;;  %v2661_v53 = vmul.f32 0.2, %v2657_v13  ;;  %vm2659_vm4 = vcmp.ge.f32.partialorder %v2657_v13, 0.0 }
0x108b   :  { %v2664_v29 = vsel %vm2660_vm14, %v2658_v50, %v2662_v19  ;;  %v2614_v34 = vsel %vm2610_vm1, %v2608_v20, %v2612_v47  ;;  %v2890_v20 = vrot.slane %v2577_v23, %v5957_v35  ;;  %v2611_v50 = vmul.f32 0.2, %v2607_v56 }
0x108c   :  { %v2666_v40 = vsel %vm2386_vm2, %v2664_v29, -1e+30  ;;  %v2616_v0 = vsel %vm2386_vm2, %v2614_v34, -1e+30  ;;  %v2802_v1 = vsel %vm2798_vm3, %v2796_v36, %v2800_v15  ;;  %v2663_v29 = vsel %vm2659_vm4, %v2657_v13, %v2661_v53  ;;  %v2881_v34 = vpop.permute.xlu1 %2880 }
0x108d   :  { %v2670_v12 = vsel %vm346_vm6, %v2666_v40, -inf  ;;  %v2620_v43 = vsel %vm346_vm6, %v2616_v0, -inf  ;;  %v2804_v47 = vsel %vm2386_vm2, %v2802_v1, -1e+30  ;;  %vm2609_vm7 = vcmp.ge.f32.partialorder %v2607_v56, 0.0 }
0x108e   :  { %2671 = vmax.xlane.f32.xlu0 %v2670_v12  ;;  %2621 = vmax.xlane.f32.xlu1 %v2620_v43  ;;  %v2808_v15 = vsel %vm346_vm6, %v2804_v47, -inf  ;;  %vm2385_vm9 = vcmp.gt.f32.partialorder %v6475_v61, 0.0  ;;  %v2613_v11 = vsel %vm2609_vm7, %v2607_v56, %v2611_v50  ;;  %v2799_v43 = vmul.f32 0.2, %v2795_v24 }
0x108f   :  { %v2665_v42 = vsel %vm2385_vm9, %v2663_v29, -1e+30  ;;  %v2891_v36 = vadd.f32 %v2890_v20, %v2881_v34  ;;  %vm2797_vm11 = vcmp.ge.f32.partialorder %v2795_v24, 0.0  ;;  %v2615_v44 = vsel %vm2385_vm9, %v2613_v11, -1e+30 }
0x1090   :  { %v2667_v19 = vsel %vm346_vm6, %v2665_v42, -inf  ;;  %v2885_v23 = vpop.permute.xlu1 %2884  ;;  %v2801_v13 = vsel %vm2797_vm11, %v2795_v24, %v2799_v43  ;;  %v2617_v1 = vsel %vm346_vm6, %v2615_v44, -inf  ;;  %vm3053_vm1 = vcmask 254977  }
0x1091   :  { %v2895_v25 = vmul.f32 0.2, %v2891_v36  ;;  %v2892_v53 = vadd.f32 %v2890_v20, %v2885_v23  ;;  %vm2893_vm12 = vcmp.ge.f32.partialorder %v2891_v36, 0.0  ;;  %v2803_v56 = vsel %vm2385_vm9, %v2801_v13, -1e+30 }
0x1092   :  { %2809 = vmax.xlane.f32.xlu1 %v2808_v15  ;;  %v2805_v50 = vsel %vm346_vm6, %v2803_v56, -inf }
0x1093   :  { %v2897_v12 = vsel %vm2893_vm12, %v2891_v36, %v2895_v25  ;;  %v2896_v29 = vmul.f32 0.2, %v2892_v53  ;;  %vm2894_vm14 = vcmp.ge.f32.partialorder %v2892_v53, 0.0 }
0x1094   :  { %v2899_v34 = vsel %vm2385_vm9, %v2897_v12, -1e+30 }
0x1095   :  { %v2898_v15 = vsel %vm2894_vm14, %v2892_v53, %v2896_v29  ;;  %v2901_v24 = vsel %vm346_vm6, %v2899_v34, -inf }
0x1096   :  { %2668 = vmax.xlane.f32.xlu1 %v2667_v19  ;;  %v2900_v20 = vsel %vm2386_vm2, %v2898_v15, -1e+30 }
0x1097   :  { %v2904_v11 = vsel %vm346_vm6, %v2900_v20, -inf }
0x109a   :  { %2618 = vmax.xlane.f32.xlu1 %v2617_v1 }
0x109e   :  { %2806 = vmax.xlane.f32.xlu1 %v2805_v50 }
0x10a2   :  { %2902 = vmax.xlane.f32.xlu1 %v2901_v24 }
0x10a6   :  { %2905 = vmax.xlane.f32.xlu1 %v2904_v11 }
0x111b   :  { %v2672_v43 = vpop.xlane.xlu0 %2671  ;;  %v2622_v36 = vpop.xlane.xlu1 %2621 }
0x111c   :  { %v2674_v19 = vsub.f32 %v2666_v40, %v2672_v43  ;;  %v2624_v23 = vsub.f32 %v2616_v0, %v2622_v36 }
0x111e   :  { %v2677_v13 = vmul.f32 1.442695, %v2674_v19  ;;  %v2627_v25 = vmul.f32 1.442695, %v2624_v23 }
0x111f   :  { %v2810_v1 = vpop.xlane.xlu1 %2809 }
0x1120   :  { %5160 = vpow2.f32 %v2677_v13  ;;  %v2812_v50 = vsub.f32 %v2804_v47, %v2810_v1 }
0x1121   :  { %5162 = vpow2.f32 %v2627_v25 }
0x1122   :  { %v2815_v53 = vmul.f32 1.442695, %v2812_v50 }
0x1123   :  { %v2669_v12 = vpop.xlane.xlu1 %2668 }
0x1124   :  { %5164 = vpow2.f32 %v2815_v53  ;;  %v2673_v29 = vsub.f32 %v2665_v42, %v2669_v12 }
0x1126   :  { %v2675_v24 = vmul.f32 1.442695, %v2673_v29 }
0x1127   :  { %v2619_v45 = vpop.xlane.xlu1 %2618 }
0x1128   :  { %5166 = vpow2.f32 %v2675_v24  ;;  %v2623_v15 = vsub.f32 %v2615_v44, %v2619_v45 }
0x112a   :  { %v5161_v63 = vpop.eup %5160  ;;  %v2625_v11 = vmul.f32 1.442695, %v2623_v15 }
0x112b   :  { %v5163_v9 = vpop.eup %5162  ;;  %v2807_v59 = vpop.xlane.xlu1 %2806  ;;  %v2680_v40 = vmul.f32 %v5161_v63, %v6465_v6 }
0x112c   :  { %5168 = vpow2.f32 %v2625_v11  ;;  %v2811_v0 = vsub.f32 %v2803_v56, %v2807_v59  ;;  %v2630_v47 = vmul.f32 %v5163_v9, %v6465_v6 }
0x112d   :  { %v2684_v43 = vsel %vm346_vm6, %v2680_v40, 0.0 }
0x112e   :  { %v5165_v36 = vpop.eup %5164  ;;  %v2813_v19 = vmul.f32 1.442695, %v2811_v0  ;;  %2685 = vadd.xlane.f32.xlu1 %v2684_v43  ;;  %v2634_v63 = vsel %vm346_vm6, %v2630_v47, 0.0 }
0x112f   :  { %v2903_v42 = vpop.xlane.xlu1 %2902  ;;  %v6503_v23 = vmul.f32 %v5165_v36, %v6465_v6 }
0x1130   :  { %5170 = vpow2.f32 %v2813_v19  ;;  %v2907_v45 = vsub.f32 %v2899_v34, %v2903_v42 }
0x1131   :  { %v2822_v44 = vsel %vm346_vm6, %v6503_v23, 0.0 }
0x1132   :  { %v5167_v13 = vpop.eup %5166  ;;  %v2909_v59 = vmul.f32 1.442695, %v2907_v45  ;;  %2823 = vadd.xlane.f32.xlu0 %v2822_v44  ;;  %2635 = vadd.xlane.f32.xlu1 %v2634_v63 }
0x1133   :  { %v2906_v56 = vpop.xlane.xlu1 %2905  ;;  %v2679_v9 = vmul.f32 %v5167_v13, %v6475_v61 }
0x1134   :  { %5172 = vpow2.f32 %v2909_v59  ;;  %v2908_v25 = vsub.f32 %v2900_v20, %v2906_v56 }
0x1135   :  { %v2681_v1 = vsel %vm346_vm6, %v2679_v9, 0.0 }
0x1136   :  { %v5169_v50 = vpop.eup %5168  ;;  %v2911_v53 = vmul.f32 1.442695, %v2908_v25  ;;  %2682 = vadd.xlane.f32.xlu1 %v2681_v1 }
0x1137   :  { %v2629_v34 = vmul.f32 %v5169_v50, %v6475_v61 }
0x1138   :  { %5174 = vpow2.f32 %v2911_v53 }
0x1139   :  { %v2631_v12 = vsel %vm346_vm6, %v2629_v34, 0.0 }
0x113a   :  { %v5171_v29 = vpop.eup %5170  ;;  %2632 = vadd.xlane.f32.xlu1 %v2631_v12 }
0x113b   :  { %v2817_v24 = vmul.f32 %v5171_v29, %v6475_v61 }
0x113d   :  { %v2819_v15 = vsel %vm346_vm6, %v2817_v24, 0.0 }
0x113e   :  { %v5173_v11 = vpop.eup %5172  ;;  %2820 = vadd.xlane.f32.xlu1 %v2819_v15 }
0x113f   :  { %v2913_v20 = vmul.f32 %v5173_v11, %v6475_v61 }
0x1141   :  { %v2915_v0 = vsel %vm346_vm6, %v2913_v20, 0.0 }
0x1142   :  { %v5175_v43 = vpop.eup %5174  ;;  %2916 = vadd.xlane.f32.xlu1 %v2915_v0 }
0x1143   :  { %v2914_v36 = vmul.f32 %v5175_v43, %v6465_v6  ;;  %v7055_v43 = vpack.c.bf16 %v6422_v60, %v6415_v51 }
0x1145   :  { %v2918_v19 = vsel %vm346_vm6, %v2914_v36, 0.0 }
0x1146   :  { %2919 = vadd.xlane.f32.xlu0 %v2918_v19 }
0x11bb   :  { %v2686_v42 = vpop.xlane.xlu1 %2685 }
0x11bc   :  { %5176 = vrcp.f32 %v2686_v42 }
0x11bf   :  { %v2636_v45 = vpop.xlane.xlu1 %2635  ;;  %v2824_v63 = vpop.xlane.xlu0 %2823 }
0x11c3   :  { %v2683_v44 = vpop.xlane.xlu1 %2682 }
0x11c4   :  { %5178 = vrcp.f32 %v2683_v44 }
0x11c5   :  { %5180 = vrcp.f32 %v2636_v45 }
0x11c6   :  { %v5177_v59 = vpop.eup %5176 }
0x11c7   :  { %v2633_v13 = vpop.xlane.xlu1 %2632  ;;  %v2690_v25 = vmul.f32 %v5177_v59, %v2680_v40 }
0x11c8   :  { %5182 = vrcp.f32 %v2633_v13 }
0x11c9   :  { %5184 = vrcp.f32 %v2824_v63 }
0x11cb   :  { %v2821_v61 = vpop.xlane.xlu1 %2820 }
0x11cc   :  { %5186 = vrcp.f32 %v2821_v61 }
0x11ce   :  { %v5179_v56 = vpop.eup %5178 }
0x11cf   :  { %v2689_v1 = vmul.f32 %v5179_v56, %v2679_v9  ;;  %v2917_v6 = vpop.xlane.xlu1 %2916  ;;  %v5181_v50 = vpop.eup %5180 }
0x11d0   :  { %5188 = vrcp.f32 %v2917_v6  ;;  %v2640_v29 = vmul.f32 %v5181_v50, %v2630_v47 }
0x11d1   :  { %v2693_v53 = vpack.c.bf16 %v2690_v25, %v2689_v1 }
0x11d2   :  { %v5183_v12 = vpop.eup %5182 }
0x11d3   :  { %v2639_v15 = vmul.f32 %v5183_v12, %v2629_v34  ;;  %v2920_v11 = vpop.xlane.xlu0 %2919  ;;  %4826 = vmatmul.mubr.msk.bf16.vlgmr.msra.gmra.mrb[28].mxu1 %vm346_vm6, %v2693_v53  ;;  %v5185_v0 = vpop.eup %5184  ;;  %v7056_v34 = vpack.c.bf16 %v6428_v8, %v6425_v55  ;;  %v6539_v55 = vld [vmem:[#allocation15 + $0x10] sm:$0xff] }
0x11d4   :  { %5190 = vrcp.f32 %v2920_v11  ;;  %4836 = vmatpush3.bf16.msra.mxu1 %v7055_v43  ;;  %4837 = vmatprep.mubr.msk.bf16.mxu1 %vm5558_vm0, %v7043_v31  ;;  %v2828_v19 = vmul.f32 %v5185_v0, %v6503_v23  ;;  %v6543_v8 = vmul.f32 %v6539_v55, %v6539_v55  ;;  %v2978_v0 = vrot.slane %v6301_v41, %v6154_v49 }
0x11d5   :  { %v2643_v40 = vpack.c.bf16 %v2640_v29, %v2639_v15  ;;  %4985 = vmatprep.subr.bf16.mxu1 %v7044_v39 }
0x11d6   :  { %v5187_v9 = vpop.eup %5186  ;;  %v3054_v44 = vsel %vm3053_vm1, %v6543_v8, 0.0 }
0x11d7   :  { %v2827_v47 = vmul.f32 %v5187_v9, %v2817_v24  ;;  %4832 = vmatmul.mubr.msk.bf16.vlgmr.msra.gmra.mrb[36].mxu0 %vm346_vm6, %v2643_v40  ;;  %3055 = vadd.xlane.f32.xlu1 %v3054_v44 }
0x11d8   :  { %4842 = vmatpush3.bf16.msra.mxu0 %v7056_v34  ;;  %4843 = vmatprep.mubr.msk.bf16.mxu0 %vm5558_vm0, %v7043_v31 }
0x11d9   :  { %v2831_v51 = vpack.c.bf16 %v2828_v19, %v2827_v47  ;;  %4854 = vmatprep.subr.bf16.mxu0 %v7043_v31 }
0x11da   :  { %v5189_v60 = vpop.eup %5188 }
0x11db   :  { %4838 = vmatmul.mubr.msk.bf16.vlgmr.msra.gmra.mrb[32].mxu1 %vm346_vm6, %v2831_v51  ;;  %v2923_v24 = vmul.f32 %v5189_v60, %v2913_v20 }
0x11dc   :  { %4851 = vmatprep.mubr.msk.f32.mxu1 %vm5558_vm0, %v7043_v31 }
0x11de   :  { %v5191_v23 = vpop.eup %5190 }
0x11df   :  { %v2924_v42 = vmul.f32 %v5191_v23, %v2914_v36 }
0x11e1   :  { %v2927_v45 = vpack.c.bf16 %v2924_v42, %v2923_v24  ;;  %v2999_v24 = vadd.f32 %v6361_v54, %v6356_v10 }
0x11e3   :  { %4844 = vmatmul.mubr.msk.bf16.vlgmr.msra.gmra.mrb[40].mxu0 %vm346_vm6, %v2927_v45 }
0x11e4   :  { %4858 = vmatprep.mubr.msk.bf16.mxu0 %vm5558_vm0, %v7043_v31 }
0x12a6   :  { %v2732_v63 = vpop.f32.mrb[28].mxu1 }
0x12a7   :  { %v4827_v13 = vpop.f32.mrb[29].mxu1 }
0x12a8   :  { %v2735_v20 = vpop.f32.mrb[30].mxu1  ;;  %v3000_v13 = vrot.slane %v2999_v24, 4 }
0x12a9   :  { %v4828_v36 = vpop.f32.mrb[31].mxu1 }
0x12aa   :  { %v2776_v61 = vpop.f32.mrb[36].mxu0 }
0x12ab   :  { %v2777_v59 = vadd.f32 %v2776_v61, %v2732_v63  ;;  %v4833_v56 = vpop.f32.mrb[37].mxu0 }
0x12ac   :  { %v2779_v25 = vpop.f32.mrb[38].mxu0 }
0x12ad   :  { %v2780_v1 = vadd.f32 %v2779_v25, %v2735_v20  ;;  %v4834_v6 = vpop.f32.mrb[39].mxu0 }
0x12ae   :  { %v2870_v50 = vpop.f32.mrb[32].mxu1 }
0x12af   :  { %v2877_v53 = vadd.f32 %v2870_v50, %v2777_v59  ;;  %v4839_v12 = vpop.f32.mrb[33].mxu1  ;;  %v3001_v59 = vadd.f32 %v3000_v13, %v2999_v24 }
0x12b0   :  { %v2873_v29 = vpop.f32.mrb[34].mxu1 }
0x12b1   :  { %v2878_v15 = vadd.f32 %v2873_v29, %v2780_v1  ;;  %v4840_v11 = vpop.f32.mrb[35].mxu1  ;;  %v3002_v25 = vrot.slane %v3001_v59, 2 }
0x12b3   :  { %v3003_v1 = vadd.f32 %v3002_v25, %v3001_v59 }
0x12b5   :  { %v3004_v12 = vrot.slane %v3003_v1, 1 }
0x12b6   :  { %v2966_v43 = vpop.f32.mrb[40].mxu0 }
0x12b7   :  { %v2973_v40 = vadd.f32 %v2966_v43, %v2877_v53  ;;  %v4845_v9 = vpop.f32.mrb[41].mxu0 }
0x12b8   :  { %v2969_v19 = vpop.f32.mrb[42].mxu0 }
0x12b9   :  { %v2979_v47 = vadd.f32 %v2978_v0, %v2973_v40  ;;  %v2974_v34 = vadd.f32 %v2969_v19, %v2878_v15  ;;  %v4846_v51 = vpop.f32.mrb[43].mxu0  ;;  %v3005_v40 = vadd.f32 %v3004_v12, %v3003_v1 }
0x12bb   :  { %v2983_v60 = vmul.f32 0.044715, %v2979_v47  ;;  %v2980_v23 = vadd.f32 %v2978_v0, %v2974_v34  ;;  %v2981_v50 = vmul.f32 0.5, %v2979_v47  ;;  %v3006_v34 = vmax.f32 %v3005_v40, 1.0 }
0x12bd   :  { %v2985_v42 = vmul.f32 %v2983_v60, %v2979_v47  ;;  %v2984_v45 = vmul.f32 0.044715, %v2980_v23  ;;  %v2982_v15 = vmul.f32 0.5, %v2980_v23 }
0x12bf   :  { %v2987_v44 = vmul.f32 %v2985_v42, %v2979_v47  ;;  %v2986_v63 = vmul.f32 %v2984_v45, %v2980_v23 }
0x12c1   :  { %v2989_v20 = vadd.f32 %v2987_v44, %v2979_v47  ;;  %v2988_v36 = vmul.f32 %v2986_v63, %v2980_v23 }
0x12c3   :  { %v2991_v41 = vmul.f32 0.7978846, %v2989_v20  ;;  %v2990_v61 = vadd.f32 %v2988_v36, %v2980_v23 }
0x12c5   :  { %5192 = vtanh.f32 %v2991_v41  ;;  %v2992_v56 = vmul.f32 0.7978846, %v2990_v61 }
0x12c7   :  { %5194 = vtanh.f32 %v2992_v56 }
0x12c8   :  { %5196 = vrcp.f32 %v3006_v34 }
0x12cf   :  { %v5193_v6 = vpop.eup %5192 }
0x12d0   :  { %v2995_v53 = vadd.f32 1.0, %v5193_v6 }
0x12d1   :  { %v5195_v29 = vpop.eup %5194 }
0x12d2   :  { %v2996_v11 = vadd.f32 1.0, %v5195_v29  ;;  %v2997_v0 = vmul.f32 %v2995_v53, %v2981_v50  ;;  %v5197_v13 = vpop.eup %5196 }
0x12d4   :  { %v2998_v43 = vmul.f32 %v2996_v11, %v2982_v15  ;;  %v3008_v9 = vmul.f32 %v2997_v0, %v6356_v10 }
0x12d6   :  { %v3009_v19 = vmul.f32 %v2998_v43, %v6361_v54  ;;  %v3010_v51 = vsel %vm403_vm13, %v3008_v9, 0.0 }
0x12d8   :  { %v3011_v60 = vsel %vm403_vm13, %v3009_v19, 0.0 }
0x12d9   :  { %v3012_v24 = vadd.f32 %v3011_v60, %v3010_v51  ;;  %v3049_v60 = vrot.slane %v6539_v55, %v5857_v21 }
0x12db   :  { %v3013_v42 = vrot.slane %v3012_v24, 4 }
0x12dd   :  { %v3014_v47 = vadd.f32 %v3013_v42, %v3012_v24 }
0x12df   :  { %v3015_v45 = vrot.slane %v3014_v47, 2 }
0x12e1   :  { %v3016_v44 = vadd.f32 %v3015_v45, %v3014_v47  ;;  %v3061_v47 = vrot.slane %v6539_v55, %v5860_v22 }
0x12e3   :  { %v3017_v23 = vrot.slane %v3016_v44, 1 }
0x12e5   :  { %v3018_v63 = vadd.f32 %v3017_v23, %v3016_v44 }
0x12e7   :  { %v3019_v20 = vmul.f32 %v5197_v13, %v3018_v63 }
0x12e9   :  { %v3020_v36 = vsub.f32 %v2997_v0, %v3019_v20  ;;  %v3021_v41 = vsub.f32 %v2998_v43, %v3019_v20  ;;  %v5260_v43 = vld [vmem:[#allocation15 + $0x8] sm:$0xff] }
0x12ea   :  { %v3043_v19 = vrot.slane %v5260_v43, %v6157_v57 }
0x12eb   :  { %v3022_v61 = vmul.f32 %v3020_v36, %v3020_v36  ;;  %v3023_v59 = vmul.f32 %v3021_v41, %v3021_v41 }
0x12ed   :  { %v3024_v56 = vmul.f32 %v3022_v61, %v6356_v10  ;;  %v3025_v25 = vmul.f32 %v3023_v59, %v6361_v54  ;;  %v3111_v59 = vmul.f32 %v6068_v48, %v6390_v30 }
0x12ef   :  { %v3026_v1 = vsel %vm403_vm13, %v3024_v56, 0.0  ;;  %v3027_v6 = vsel %vm403_vm13, %v3025_v25, 0.0  ;;  %v3139_v56 = vsel %vm346_vm6, %v3111_v59, 0.0  ;;  %v3056_v25 = vpop.xlane.xlu1 %3055 }
0x12f0   :  { %v3028_v50 = vadd.f32 %v3027_v6, %v3026_v1 }
0x12f2   :  { %v3029_v53 = vrot.slane %v3028_v50, 4 }
0x12f4   :  { %v3030_v12 = vadd.f32 %v3029_v53, %v3028_v50 }
0x12f6   :  { %v3031_v29 = vrot.slane %v3030_v12, 2 }
0x12f8   :  { %v3032_v15 = vadd.f32 %v3031_v29, %v3030_v12 }
0x12fa   :  { %v3033_v11 = vrot.slane %v3032_v15, 1 }
0x12fc   :  { %v3034_v40 = vadd.f32 %v3033_v11, %v3032_v15 }
0x12fe   :  { %v3035_v9 = vmul.f32 %v5197_v13, %v3034_v40 }
0x1300   :  { %v3036_v0 = vadd.f32 1e-05, %v3035_v9 }
0x1302   :  { %5198 = vrsqrt.f32 %v3036_v0 }
0x1303   :  { %5200 = vrsqrt.f32 %v3056_v25 }
0x130c   :  { %v5199_v34 = vpop.eup %5198 }
0x130d   :  { %v3039_v51 = vmul.f32 %v5199_v34, %v3021_v41  ;;  %v3038_v24 = vmul.f32 %v5199_v34, %v3020_v36  ;;  %v3110_v36 = vmul.f32 %v6065_v37, %v6390_v30  ;;  %v5201_v1 = vpop.eup %5200 }
0x130e   :  { %v3073_v6 = vrot.slane %v5201_v1, %v5860_v22 }
0x130f   :  { %v3045_v42 = vmul.f32 %v3043_v19, %v3039_v51  ;;  %v3044_v45 = vmul.f32 %v3043_v19, %v3038_v24  ;;  %v3136_v61 = vsel %vm346_vm6, %v3110_v36, 0.0  ;;  %v3332_v24 = vld [vmem:[#allocation14 + $0x8] sm:$0xff] }
0x1311   :  { %v6563_v44 = vadd.f32 %v3049_v60, %v3045_v42  ;;  %v6565_v23 = vadd.f32 %v3049_v60, %v3044_v45  ;;  %v3331_v60 = vld [vmem:[#allocation14] sm:$0xff]  ;;  %v3333_v42 = vld [vmem:[#allocation14 + $0x10] sm:$0xff]  ;;  %v3334_v45 = vld [vmem:[#allocation14 + $0x18] sm:$0xff] }
0x1313   :  { %v3063_v63 = vmul.f32 %v3061_v47, %v6563_v44  ;;  %v3062_v13 = vmul.f32 %v3061_v47, %v6565_v23  ;;  %v3336_v47 = vpack.c.bf16 %v3332_v24, %v3331_v60 }
0x1315   :  { %v3067_v20 = vsel %vm403_vm13, %v3063_v63, 0.0  ;;  %v3064_v41 = vsel %vm403_vm13, %v3062_v13, 0.0  ;;  %4855 = vmatpush3.bf16.msra.mxu0 %v3336_v47  ;;  %v3337_v63 = vpack.c.bf16 %v3334_v45, %v3333_v42 }
0x1316   :  { %3068 = vadd.xlane.f32.xlu1 %v3067_v20  ;;  %3065 = vadd.xlane.f32.xlu0 %v3064_v41 }
0x1317   :  { %4856 = vmatprep.subr.bf16.mxu0 %v7043_v31 }
0x1319   :  { %4857 = vmatpush3.bf16.msra.mxu0 %v3337_v63 }
0x131a   :  { %3137 = vadd.xlane.f32.xlu1 %v3136_v61  ;;  %4997 = vmatprep.subr.msk.bf16.mxu0 %vm5815_vm8, %v7047_v16 }
0x131e   :  { %3140 = vadd.xlane.f32.xlu1 %v3139_v56 }
0x13a3   :  { %v3066_v50 = vpop.xlane.xlu0 %3065  ;;  %v3069_v53 = vpop.xlane.xlu1 %3068 }
0x13a4   :  { %v3074_v12 = vmul.f32 %v3073_v6, %v3066_v50  ;;  %v3075_v29 = vmul.f32 %v3073_v6, %v3069_v53 }
0x13a6   :  { %5202 = vtanh.f32 %v3074_v12 }
0x13a7   :  { %5204 = vtanh.f32 %v3075_v29  ;;  %v3138_v13 = vpop.xlane.xlu1 %3137 }
0x13a8   :  { %v3142_v20 = vmul.f32 0.5, %v3138_v13 }
0x13ab   :  { %v3141_v41 = vpop.xlane.xlu1 %3140 }
0x13ac   :  { %v3143_v61 = vmul.f32 0.5, %v3141_v41 }
0x13ae   :  { %v3145_v25 = vceil.f32 %v3143_v61 }
0x13b0   :  { %v5203_v15 = vpop.eup %5202 }
0x13b1   :  { %3078 = vxpose.xlu0.b32.start [1/2] (short) (narrow) %v5203_v15, 8  ;;  %v5205_v11 = vpop.eup %5204  ;;  %v3186_v12 = vmul.f32 %v5203_v15, %v6565_v23 }
0x13b2   :  { %v3187_v29 = vmul.f32 %v5205_v11, %v6563_v44 }
0x13b5   :  { %3079 = vxpose.xlu0.b32.end [2/2] (short) (narrow) %v5205_v11, 8 }
0x13de   :  { %5054 = vset.pattern.permute.xlu0 %v7046_v17 }
0x1431   :  { %v3094_v30 = vpop.trf.xlu0 }
0x1432   :  { %v3115_v40 = vrot.slane %v3094_v30, %v5857_v21 }
0x1434   :  { %vm3116_vm2 = vcmp.gt.f32.partialorder %v3115_v40, %v5203_v15  ;;  %vm3118_vm3 = vcmp.eq.f32.partialorder %v3115_v40, %v5203_v15  ;;  %vm3119_vm4 = vcmp.eq.f32.partialorder %v3115_v40, %v5205_v11  ;;  %vm3117_vm9 = vcmp.gt.f32.partialorder %v3115_v40, %v5205_v11 }
0x1435   :  { %vm3120_vm7 = vmand %vm3118_vm3, %vm211_vm10  ;;  %v3391_v11 = vrot.slane %v6539_v55, %v5940_v7 }
0x1436   :  { %vm3122_vm11 = vmor %vm3116_vm2, %vm3120_vm7 }
0x1437   :  { %v4530_v9 = vsel %vm3122_vm11, 1.0, %v7043_v31  ;;  %vm3121_vm12 = vmand %vm3119_vm4, %vm212_vm5 }
0x1438   :  { %v3128_v0 = vmul.f32 %v4530_v9, %v3110_v36  ;;  %vm3123_vm14 = vmor %vm3117_vm9, %vm3121_vm12  ;;  %v3144_v36 = vceil.f32 %v3142_v20 }
0x1439   :  { %v4531_v43 = vsel %vm3123_vm14, 1.0, %v7043_v31 }
0x143a   :  { %v3130_v19 = vsel %vm346_vm6, %v3128_v0, 0.0  ;;  %v3129_v34 = vmul.f32 %v4531_v43, %v3111_v59  ;;  %v3478_v0 = vrot.slane %v6539_v55, %v5957_v35 }
0x143b   :  { %3131 = vadd.xlane.f32.xlu1 %v3130_v19 }
0x143c   :  { %v3133_v51 = vsel %vm346_vm6, %v3129_v34, 0.0 }
0x143f   :  { %3134 = vadd.xlane.f32.xlu1 %v3133_v51 }
0x14c8   :  { %v3132_v59 = vpop.xlane.xlu1 %3131 }
0x14c9   :  { %vm3146_vm1 = vcmp.lt.f32.partialorder %v3132_v59, %v3144_v36 }
0x14ca   :  { %v4532_v56 = vsel %vm3146_vm1, 1.0, %v7043_v31 }
0x14cb   :  { %v6596_v1 = vmul.f32 %v4532_v56, %v6356_v10 }
0x14cc   :  { %v3135_v6 = vpop.xlane.xlu1 %3134 }
0x14cd   :  { %vm3147_vm2 = vcmp.lt.f32.partialorder %v3135_v6, %v3145_v25  ;;  %3154 = vxpose.xlu1.b32.start [1/2] (short) (narrow) %v6596_v1, 8  ;;  %v6607_v30 = vmul.f32 %v3186_v12, %v6596_v1 }
0x14ce   :  { %v4533_v50 = vsel %vm3147_vm2, 1.0, %v7043_v31  ;;  %vm1197_vm2 = vcmask 123904  }
0x14cf   :  { %v6601_v53 = vmul.f32 %v4533_v50, %v6361_v54 }
0x14d1   :  { %3155 = vxpose.xlu1.b32.end [2/2] (short) (narrow) %v6601_v53, 8  ;;  %v6610_v40 = vmul.f32 %v3187_v29, %v6601_v53  ;;  %v3191_v29 = vmul.f32 %v6601_v53, %v6452_v38  ;;  %v7057_v38 = vld [vmem:[#allocation29_spill] sm:$0xff] }
0x14d3   :  { %v4986_v9 = vpack.c.bf16 %v6610_v40, %v6607_v30 }
0x14d5   :  { %4987 = vmatpush3.bf16.msra.mxu1 %v4986_v9  ;;  %4859 = vmatmul.mubr.msk.bf16.vlgmr.msra.gmra.mrb[44].mxu0 %vm403_vm13, %v4986_v9 }
0x14d6   :  { %4989 = vmatprep.subr.msk.bf16.mxu1 %vm5815_vm8, %v7047_v16  ;;  %4999 = vmatpush3.bf16.msk.msra.mxu0 %vm5815_vm8, %v7047_v16 }
0x14d7   :  { %5001 = vmatprep.subr.msk.bf16.mxu0 %vm5834_vm15, %v7047_v16 }
0x14da   :  { %5003 = vmatpush3.bf16.msk.msra.mxu0 %vm5834_vm15, %v7047_v16 }
0x14db   :  { %4890 = vmatprep.subr.bf16.mxu0 %v7043_v31 }
0x14ef   :  { %5053 = vset.pattern.permute.xlu1 %v7050_v32 }
0x154d   :  { %v3170_v44 = vpop.trf.xlu1 }
0x154e   :  { %v6630_v23 = vrot.slane %v3170_v44, %v5857_v21 }
0x1550   :  { %v6634_v15 = vmul.f32 %v6630_v23, %v6132_v46  ;;  %v3197_v44 = vmul.f32 %v6630_v23, %v3191_v29 }
0x1552   :  { %4852 = vmatmul.mubr.msk.f32.vlgmr.msra.gmra.mrb[26].mxu1 %vm346_vm6, %v6634_v15 }
0x1553   :  { %4991 = vmatpush3.bf16.msk.msra.mxu1 %vm5815_vm8, %v7047_v16 }
0x1554   :  { %4993 = vmatprep.subr.msk.bf16.mxu1 %vm5834_vm15, %v7047_v16 }
0x1557   :  { %4995 = vmatpush3.bf16.msk.msra.mxu1 %vm5834_vm15, %v7047_v16 }
0x1558   :  { %4884 = vmatprep.subr.bf16.mxu1 %v7043_v31 }
0x15a8   :  { %v3375_v43 = vpop.f32.mrb[44].mxu0 }
0x15a9   :  { %v4860_v19 = vpop.f32.mrb[45].mxu0  ;;  %v3392_v14 = vmul.f32 %v3391_v11, %v3375_v43  ;;  %v3479_v34 = vmul.f32 %v3478_v0, %v3375_v43  ;;  %v3692_v60 = vmul.f32 %v5874_v26, %v3375_v43  ;;  %v3642_v24 = vmul.f32 %v5877_v27, %v3375_v43 }
0x15aa   :  { %v3378_v51 = vpop.f32.mrb[46].mxu0  ;;  %v6655_v18 = vmul.f32 %v5880_v28, %v3375_v43  ;;  %v6665_v20 = vmul.f32 %v5883_v33, %v3375_v43 }
0x15ab   :  { %v4861_v16 = vpop.f32.mrb[47].mxu0  ;;  %v3393_v42 = vmul.f32 %v3391_v11, %v3378_v51  ;;  %4870 = vmatprep.mubr.msk.f32.mxu1 %vm403_vm13, %v3392_v14  ;;  %v3480_v47 = vmul.f32 %v3478_v0, %v3378_v51  ;;  %4881 = vmatprep.mubr.msk.f32.mxu0 %vm403_vm13, %v3479_v34  ;;  %v3693_v45 = vmul.f32 %v5874_v26, %v3378_v51 }
0x15ac   :  { %v3643_v63 = vmul.f32 %v5877_v27, %v3378_v51  ;;  %v6662_v13 = vmul.f32 %v5880_v28, %v3378_v51  ;;  %v6668_v41 = vmul.f32 %v5883_v33, %v3378_v51  ;;  %v3383_v0 = vmul.f32 %v3197_v44, %v5929_v62 }
0x15ad   :  { %4871 = vmatmul.mubr.msk.f32.vlgmr.msra.gmra.mrb[36].mxu1 %vm403_vm13, %v3393_v42  ;;  %4882 = vmatmul.mubr.msk.f32.vlgmr.msra.gmra.mrb[34].mxu0 %vm403_vm13, %v3480_v47  ;;  %v3695_v36 = vpack.c.bf16 %v3693_v45, %v3692_v60  ;;  %v7058_v47 = vld [vmem:[#allocation31_spill] sm:$0xff] }
0x15ae   :  { %v3645_v61 = vpack.c.bf16 %v3643_v63, %v3642_v24  ;;  %4886 = vmatprep.mubr.msk.bf16.mxu1 %vm5558_vm0, %v7043_v31  ;;  %v3833_v26 = vpack.c.bf16 %v6662_v13, %v6655_v18  ;;  %4892 = vmatprep.mubr.msk.bf16.mxu0 %vm5558_vm0, %v7043_v31  ;;  %v3929_v27 = vpack.c.bf16 %v6668_v41, %v6665_v20 }
0x15af   :  { %4885 = vmatpush3.bf16.msra.mxu1 %v3695_v36  ;;  %v6702_v60 = vadd.f32 %v7057_v38, %v3383_v0 }
0x15b0   :  { %4891 = vmatpush3.bf16.msra.mxu0 %v3645_v61  ;;  %4896 = vmatprep.subr.bf16.mxu1 %v7043_v31 }
0x15b1   :  { %4902 = vmatprep.subr.bf16.mxu0 %v7043_v31  ;;  %vm3387_vm3 = vcmp.gt.f32.partialorder %v6702_v60, 0.0 }
0x1625   :  { %v6682_v28 = vpop.f32.mrb[26].mxu1 }
0x1626   :  { %v4853_v33 = vpop.f32.mrb[27].mxu1 }
0x1680   :  { %v4872_v59 = vpop.f32.mrb[36].mxu1  ;;  %v4883_v56 = vpop.f32.mrb[34].mxu0 }
0x1681   :  { %3601 = vperm.xlu0 %5054, %v4883_v56   ;;  %3651 = vperm.xlu1 %5053, %v4883_v56   ;;  %v3466_v25 = vpop.f32.mrb[37].mxu1  ;;  %v3553_v6 = vpop.f32.mrb[35].mxu0 }
0x1685   :  { %5056 = vset.pattern.permute.xlu0 %v7050_v32  ;;  %5055 = vset.pattern.permute.xlu1 %v7053_v58 }
0x1686   :  { %3789 = vperm.xlu1 %5055, %v4883_v56   ;;  %3647 = vperm.xlu0 %5056, %v3553_v6  }
0x168a   :  { %5060 = vset.pattern.permute.xlu1 %v7054_v5  ;;  %5057 = vset.pattern.permute.xlu0 %v7046_v17 }
0x168b   :  { %3881 = vperm.xlu1 %5060, %v3553_v6   ;;  %3596 = vperm.xlu0 %5057, %v3553_v6  }
0x168f   :  { %5058 = vset.pattern.permute.xlu0 %v7053_v58  ;;  %v3190_v58 = vmul.f32 %v6596_v1, %v6459_v52 }
0x1690   :  { %3785 = vperm.xlu0 %5058, %v3553_v6  }
0x1691   :  { %v3196_v43 = vmul.f32 %v6630_v23, %v3190_v58 }
0x1693   :  { %v3382_v52 = vmul.f32 %v3196_v43, %v7058_v47 }
0x1694   :  { %5059 = vset.pattern.permute.xlu0 %v7054_v5 }
0x1695   :  { %3885 = vperm.xlu0 %5059, %v4883_v56  }
0x16b4   :  { %3562 = vxpose.xlu1.b32.start [1/2] (short) (narrow) %v3466_v25, 8 }
0x16b8   :  { %3563 = vxpose.xlu1.b32.end [2/2] (short) (narrow) %v4872_v59, 8 }
0x16d6   :  { %5061 = vset.pattern.permute.xlu1 %v7046_v17 }
0x1700   :  { %v3652_v50 = vpop.permute.xlu1 %3651  ;;  %v3602_v9 = vpop.permute.xlu0 %3601 }
0x1705   :  { %v3790_v12 = vpop.permute.xlu1 %3789  ;;  %v3648_v5 = vpop.permute.xlu0 %3647 }
0x170a   :  { %v3882_v11 = vpop.permute.xlu1 %3881  ;;  %v3597_v45 = vpop.permute.xlu0 %3596 }
0x170f   :  { %v3786_v44 = vpop.permute.xlu0 %3785 }
0x1734   :  { %v3578_v19 = vpop.trf.xlu1 }
0x1735   :  { %v3607_v14 = vrot.slane %v3578_v19, %v5857_v21  ;;  %v3657_v34 = vrot.slane %v3578_v19, %v5860_v22  ;;  %v3795_v51 = vrot.slane %v3578_v19, %v5940_v7 }
0x1737   :  { %v3609_v24 = vadd.f32 %v3607_v14, %v3602_v9  ;;  %v3658_v16 = vadd.f32 %v3657_v34, %v3648_v5  ;;  %v3659_v42 = vadd.f32 %v3657_v34, %v3652_v50  ;;  %v3797_v62 = vadd.f32 %v3795_v51, %v3790_v12  ;;  %v7059_v50 = vld [vmem:[#allocation30_spill] sm:$0xff] }
0x1738   :  { %v3608_v61 = vadd.f32 %v3607_v14, %v3597_v45  ;;  %v6711_v12 = vadd.f32 %v7059_v50, %v3382_v52  ;;  %v3796_v0 = vadd.f32 %v3795_v51, %v3786_v44  ;;  %v3891_v5 = vrot.slane %v3578_v19, %v5957_v35  ;;  %v3886_v51 = vpop.permute.xlu0 %3885 }
0x1739   :  { %vm3661_vm8 = vcmp.ge.f32.partialorder %v3659_v42, 0.0  ;;  %v3663_v63 = vmul.f32 0.2, %v3659_v42  ;;  %vm3611_vm15 = vcmp.ge.f32.partialorder %v3609_v24, 0.0  ;;  %v3613_v36 = vmul.f32 0.2, %v3609_v24 }
0x173a   :  { %vm3799_vm4 = vcmp.ge.f32.partialorder %v3797_v62, 0.0  ;;  %v3801_v22 = vmul.f32 0.2, %v3797_v62  ;;  %v3662_v59 = vmul.f32 0.2, %v3658_v16  ;;  %vm3660_vm7 = vcmp.ge.f32.partialorder %v3658_v16, 0.0 }
0x173b   :  { %v3665_v7 = vsel %vm3661_vm8, %v3659_v42, %v3663_v63  ;;  %v3615_v33 = vsel %vm3611_vm15, %v3609_v24, %v3613_v36  ;;  %v3612_v14 = vmul.f32 0.2, %v3608_v61  ;;  %vm3610_vm9 = vcmp.ge.f32.partialorder %v3608_v61, 0.0 }
0x173c   :  { %v3667_v56 = vsel %vm3387_vm3, %v3665_v7, -1e+30  ;;  %v3617_v25 = vsel %vm3387_vm3, %v3615_v33, -1e+30  ;;  %v3803_v6 = vsel %vm3799_vm4, %v3797_v62, %v3801_v22  ;;  %v3664_v43 = vsel %vm3660_vm7, %v3658_v16, %v3662_v59 }
0x173d   :  { %v3671_v29 = vsel %vm346_vm6, %v3667_v56, -inf  ;;  %v3621_v9 = vsel %vm346_vm6, %v3617_v25, -inf  ;;  %v3805_v58 = vsel %vm3387_vm3, %v3803_v6, -1e+30  ;;  %vm3386_vm11 = vcmp.gt.f32.partialorder %v6711_v12, 0.0 }
0x173e   :  { %3672 = vmax.xlane.f32.xlu0 %v3671_v29  ;;  %3622 = vmax.xlane.f32.xlu1 %v3621_v9  ;;  %v3809_v34 = vsel %vm346_vm6, %v3805_v58, -inf  ;;  %v3666_v38 = vsel %vm3386_vm11, %v3664_v43, -1e+30  ;;  %v3892_v24 = vadd.f32 %v3891_v5, %v3882_v11  ;;  %v3614_v42 = vsel %vm3610_vm9, %v3608_v61, %v3612_v14 }
0x173f   :  { %v3800_v47 = vmul.f32 0.2, %v3796_v0  ;;  %vm3798_vm12 = vcmp.ge.f32.partialorder %v3796_v0, 0.0  ;;  %v3668_v52 = vsel %vm346_vm6, %v3666_v38, -inf  ;;  %v3616_v35 = vsel %vm3386_vm11, %v3614_v42, -1e+30 }
0x1740   :  { %v3893_v19 = vadd.f32 %v3891_v5, %v3886_v51  ;;  %v3896_v45 = vmul.f32 0.2, %v3892_v24  ;;  %vm3894_vm14 = vcmp.ge.f32.partialorder %v3892_v24, 0.0  ;;  %v3618_v62 = vsel %vm346_vm6, %v3616_v35, -inf }
0x1741   :  { %v3802_v16 = vsel %vm3798_vm12, %v3796_v0, %v3800_v47  ;;  %vm4053_vm8 = vcmask 261127   ;;  %vm1300_vm9 = vcmask 253952  }
0x1742   :  { %3810 = vmax.xlane.f32.xlu0 %v3809_v34  ;;  %v3804_v11 = vsel %vm3386_vm11, %v3802_v16, -1e+30  ;;  %v3898_v63 = vsel %vm3894_vm14, %v3892_v24, %v3896_v45  ;;  %v3897_v36 = vmul.f32 0.2, %v3893_v19  ;;  %vm3895_vm1 = vcmp.ge.f32.partialorder %v3893_v19, 0.0 }
0x1743   :  { %v3806_v22 = vsel %vm346_vm6, %v3804_v11, -inf  ;;  %v3900_v61 = vsel %vm3386_vm11, %v3898_v63, -1e+30  ;;  %v4054_v20 = vsel %vm4053_vm8, %v6543_v8, 0.0 }
0x1744   :  { %v3899_v7 = vsel %vm3895_vm1, %v3893_v19, %v3897_v36  ;;  %v3902_v33 = vsel %vm346_vm6, %v3900_v61, -inf }
0x1745   :  { %v3901_v59 = vsel %vm3387_vm3, %v3899_v7, -1e+30 }
0x1746   :  { %3669 = vmax.xlane.f32.xlu0 %v3668_v52  ;;  %v3905_v6 = vsel %vm346_vm6, %v3901_v59, -inf }
0x174a   :  { %3619 = vmax.xlane.f32.xlu0 %v3618_v62 }
0x174e   :  { %3807 = vmax.xlane.f32.xlu0 %v3806_v22 }
0x1752   :  { %3903 = vmax.xlane.f32.xlu0 %v3902_v33 }
0x1756   :  { %3906 = vmax.xlane.f32.xlu0 %v3905_v6 }
0x17cb   :  { %v3673_v50 = vpop.xlane.xlu0 %3672  ;;  %v3623_v29 = vpop.xlane.xlu1 %3622 }
0x17cc   :  { %v3675_v9 = vsub.f32 %v3667_v56, %v3673_v50  ;;  %v3625_v44 = vsub.f32 %v3617_v25, %v3623_v29 }
0x17ce   :  { %v3678_v0 = vmul.f32 1.442695, %v3675_v9  ;;  %v3628_v5 = vmul.f32 1.442695, %v3625_v44 }
0x17cf   :  { %v3811_v43 = vpop.xlane.xlu0 %3810 }
0x17d0   :  { %5206 = vpow2.f32 %v3678_v0  ;;  %v3813_v14 = vsub.f32 %v3805_v58, %v3811_v43 }
0x17d1   :  { %5208 = vpow2.f32 %v3628_v5 }
0x17d2   :  { %v3816_v34 = vmul.f32 1.442695, %v3813_v14 }
0x17d3   :  { %v3670_v24 = vpop.xlane.xlu0 %3669 }
0x17d4   :  { %5210 = vpow2.f32 %v3816_v34  ;;  %v3674_v42 = vsub.f32 %v3666_v38, %v3670_v24 }
0x17d6   :  { %v3676_v47 = vmul.f32 1.442695, %v3674_v42 }
0x17d7   :  { %v3620_v52 = vpop.xlane.xlu0 %3619 }
0x17d8   :  { %5212 = vpow2.f32 %v3676_v47  ;;  %v3624_v51 = vsub.f32 %v3616_v35, %v3620_v52 }
0x17da   :  { %v5207_v19 = vpop.eup %5206  ;;  %v3626_v16 = vmul.f32 1.442695, %v3624_v51 }
0x17db   :  { %v5209_v45 = vpop.eup %5208  ;;  %v3808_v62 = vpop.xlane.xlu0 %3807  ;;  %v3681_v56 = vmul.f32 %v5207_v19, %v6702_v60 }
0x17dc   :  { %5214 = vpow2.f32 %v3626_v16  ;;  %v3812_v25 = vsub.f32 %v3804_v11, %v3808_v62  ;;  %v6738_v58 = vmul.f32 %v5209_v45, %v6702_v60  ;;  %v7060_v16 = vld [vmem:[#allocation38_spill] sm:$0xff] }
0x17dd   :  { %v3685_v63 = vsel %vm346_vm6, %v3681_v56, 0.0  ;;  %v1198_v45 = vsel %vm1197_vm2, %v7060_v16, 0.0 }
0x17de   :  { %v5211_v36 = vpop.eup %5210  ;;  %v3814_v22 = vmul.f32 1.442695, %v3812_v25  ;;  %3686 = vadd.xlane.f32.xlu0 %v3685_v63  ;;  %v3635_v35 = vsel %vm346_vm6, %v6738_v58, 0.0 }
0x17df   :  { %v3904_v38 = vpop.xlane.xlu0 %3903  ;;  %v6743_v33 = vmul.f32 %v5211_v36, %v6702_v60 }
0x17e0   :  { %5216 = vpow2.f32 %v3814_v22  ;;  %v3908_v7 = vsub.f32 %v3900_v61, %v3904_v38 }
0x17e1   :  { %v3823_v9 = vsel %vm346_vm6, %v6743_v33, 0.0 }
0x17e2   :  { %v5213_v6 = vpop.eup %5212  ;;  %v3910_v50 = vmul.f32 1.442695, %v3908_v7  ;;  %3636 = vadd.xlane.f32.xlu0 %v3635_v35 }
0x17e3   :  { %v3907_v11 = vpop.xlane.xlu0 %3906  ;;  %v3680_v44 = vmul.f32 %v5213_v6, %v6711_v12 }
0x17e4   :  { %5218 = vpow2.f32 %v3910_v50  ;;  %v3909_v29 = vsub.f32 %v3901_v59, %v3907_v11 }
0x17e5   :  { %v3682_v61 = vsel %vm346_vm6, %v3680_v44, 0.0 }
0x17e6   :  { %v5215_v0 = vpop.eup %5214  ;;  %v3912_v5 = vmul.f32 1.442695, %v3909_v29  ;;  %3824 = vadd.xlane.f32.xlu0 %v3823_v9 }
0x17e7   :  { %v3630_v43 = vmul.f32 %v5215_v0, %v6711_v12 }
0x17e8   :  { %5220 = vpow2.f32 %v3912_v5 }
0x17e9   :  { %v3632_v34 = vsel %vm346_vm6, %v3630_v43, 0.0 }
0x17ea   :  { %v5217_v14 = vpop.eup %5216  ;;  %3683 = vadd.xlane.f32.xlu0 %v3682_v61 }
0x17eb   :  { %v3818_v24 = vmul.f32 %v5217_v14, %v6711_v12 }
0x17ed   :  { %v3820_v47 = vsel %vm346_vm6, %v3818_v24, 0.0 }
0x17ee   :  { %v5219_v59 = vpop.eup %5218  ;;  %3633 = vadd.xlane.f32.xlu0 %v3632_v34 }
0x17ef   :  { %v3914_v42 = vmul.f32 %v5219_v59, %v6711_v12 }
0x17f1   :  { %v3916_v52 = vsel %vm346_vm6, %v3914_v42, 0.0 }
0x17f2   :  { %v5221_v51 = vpop.eup %5220  ;;  %3821 = vadd.xlane.f32.xlu0 %v3820_v47  ;;  %3917 = vadd.xlane.f32.xlu1 %v3916_v52 }
0x17f3   :  { %v3915_v19 = vmul.f32 %v5221_v51, %v6702_v60 }
0x17f5   :  { %v3919_v62 = vsel %vm346_vm6, %v3915_v19, 0.0 }
0x17f6   :  { %1199 = vadd.xlane.f32.xlu1 %v1198_v45  ;;  %3920 = vadd.xlane.f32.xlu0 %v3919_v62 }
0x17fa   :  { %4055 = vadd.xlane.f32.xlu1 %v4054_v20 }
0x186b   :  { %v3687_v25 = vpop.xlane.xlu0 %3686 }
0x186c   :  { %5222 = vrcp.f32 %v3687_v25 }
0x186f   :  { %v3637_v63 = vpop.xlane.xlu0 %3636 }
0x1873   :  { %v3825_v12 = vpop.xlane.xlu0 %3824 }
0x1876   :  { %v5223_v60 = vpop.eup %5222 }
0x1877   :  { %v3684_v36 = vpop.xlane.xlu0 %3683  ;;  %v3691_v6 = vmul.f32 %v5223_v60, %v3681_v56 }
0x1878   :  { %5224 = vrcp.f32 %v3684_v36 }
0x1879   :  { %5226 = vrcp.f32 %v3637_v63 }
0x187b   :  { %v3634_v22 = vpop.xlane.xlu0 %3633 }
0x187c   :  { %5228 = vrcp.f32 %v3634_v22 }
0x187d   :  { %5230 = vrcp.f32 %v3825_v12  ;;  %v7061_v12 = vld [vmem:[#allocation32_spill] sm:$0xff] }
0x187e   :  { %v3979_v36 = vrot.slane %v6539_v55, %v7061_v12 }
0x187f   :  { %v3918_v38 = vpop.xlane.xlu1 %3917  ;;  %v3822_v7 = vpop.xlane.xlu0 %3821 }
0x1880   :  { %5232 = vrcp.f32 %v3822_v7 }
0x1881   :  { %5234 = vrcp.f32 %v3918_v38 }
0x1882   :  { %v5225_v35 = vpop.eup %5224 }
0x1883   :  { %v3690_v50 = vmul.f32 %v5225_v35, %v3680_v44  ;;  %v3921_v11 = vpop.xlane.xlu0 %3920  ;;  %v5227_v29 = vpop.eup %5226 }
0x1884   :  { %5236 = vrcp.f32 %v3921_v11  ;;  %v3641_v5 = vmul.f32 %v5227_v29, %v6738_v58 }
0x1885   :  { %v3694_v9 = vpack.c.bf16 %v3691_v6, %v3690_v50 }
0x1886   :  { %v5229_v0 = vpop.eup %5228 }
0x1887   :  { %v3640_v61 = vmul.f32 %v5229_v0, %v3630_v43  ;;  %4887 = vmatmul.mubr.msk.bf16.vlgmr.msra.gmra.mrb[40].mxu1 %vm346_vm6, %v3694_v9  ;;  %v5231_v14 = vpop.eup %5230  ;;  %v4000_v0 = vadd.f32 %v6601_v53, %v6596_v1 }
0x1888   :  { %4897 = vmatpush3.bf16.msra.mxu1 %v3833_v26  ;;  %4898 = vmatprep.mubr.msk.bf16.mxu1 %vm5558_vm0, %v7043_v31  ;;  %v3829_v58 = vmul.f32 %v5231_v14, %v6743_v33 }
0x1889   :  { %v3644_v56 = vpack.c.bf16 %v3641_v5, %v3640_v61  ;;  %5004 = vmatprep.subr.bf16.mxu1 %v7044_v39 }
0x188a   :  { %v5233_v44 = vpop.eup %5232 }
0x188b   :  { %4893 = vmatmul.mubr.msk.bf16.vlgmr.msra.gmra.mrb[48].mxu0 %vm346_vm6, %v3644_v56  ;;  %v5235_v34 = vpop.eup %5234  ;;  %v3828_v43 = vmul.f32 %v5233_v44, %v3818_v24  ;;  %v4001_v44 = vrot.slane %v4000_v0, 4 }
0x188c   :  { %4903 = vmatpush3.bf16.msra.mxu0 %v3929_v27  ;;  %4904 = vmatprep.mubr.msk.bf16.mxu0 %vm5558_vm0, %v7043_v31  ;;  %v3924_v26 = vmul.f32 %v5235_v34, %v3914_v42 }
0x188d   :  { %4915 = vmatprep.subr.bf16.mxu0 %v7043_v31  ;;  %v3832_v13 = vpack.c.bf16 %v3829_v58, %v3828_v43 }
0x188e   :  { %v5237_v18 = vpop.eup %5236 }
0x188f   :  { %v3925_v39 = vmul.f32 %v5237_v18, %v3915_v19  ;;  %4899 = vmatmul.mubr.msk.bf16.vlgmr.msra.gmra.mrb[44].mxu1 %vm346_vm6, %v3832_v13  ;;  %v4002_v18 = vadd.f32 %v4001_v44, %v4000_v0 }
0x1890   :  { %4912 = vmatprep.mubr.msk.f32.mxu1 %vm5558_vm0, %v7043_v31 }
0x1891   :  { %v3928_v59 = vpack.c.bf16 %v3925_v39, %v3924_v26  ;;  %v4003_v26 = vrot.slane %v4002_v18, 2 }
0x1893   :  { %4905 = vmatmul.mubr.msk.bf16.vlgmr.msra.gmra.mrb[52].mxu0 %vm346_vm6, %v3928_v59  ;;  %v4004_v39 = vadd.f32 %v4003_v26, %v4002_v18  ;;  %v5261_v26 = vld [vmem:[#allocation15 + $0x10] sm:$0xff] }
0x1894   :  { %4919 = vmatprep.mubr.msk.bf16.mxu0 %vm5558_vm0, %v7043_v31 }
0x195a   :  { %v3733_v41 = vpop.f32.mrb[40].mxu1 }
0x195b   :  { %v4888_v27 = vpop.f32.mrb[41].mxu1 }
0x195c   :  { %v3736_v33 = vpop.f32.mrb[42].mxu1  ;;  %v4005_v27 = vrot.slane %v4004_v39, 1 }
0x195d   :  { %v4889_v24 = vpop.f32.mrb[43].mxu1 }
0x195e   :  { %v3777_v42 = vpop.f32.mrb[48].mxu0 }
0x195f   :  { %v3778_v47 = vadd.f32 %v3777_v42, %v3733_v41  ;;  %v4894_v52 = vpop.f32.mrb[49].mxu0 }
0x1960   :  { %v3780_v51 = vpop.f32.mrb[50].mxu0 }
0x1961   :  { %v3781_v19 = vadd.f32 %v3780_v51, %v3736_v33  ;;  %v4895_v16 = vpop.f32.mrb[51].mxu0  ;;  %v4006_v51 = vadd.f32 %v4005_v27, %v4004_v39  ;;  %v7062_v39 = vld [vmem:[#allocation33_spill] sm:$0xff]  ;;  %v4050_v27 = vrot.slane %v5261_v26, %v6154_v49  ;;  %v6805_v49 = vld [vmem:[#allocation8 + $0x8] sm:$0xff] }
0x1962   :  { %v3871_v45 = vpop.f32.mrb[44].mxu1 }
0x1963   :  { %v3878_v62 = vadd.f32 %v3871_v45, %v3778_v47  ;;  %v4900_v25 = vpop.f32.mrb[45].mxu1  ;;  %v4007_v45 = vmax.f32 %v4006_v51, 1.0 }
0x1964   :  { %v3874_v63 = vpop.f32.mrb[46].mxu1 }
0x1965   :  { %v3879_v22 = vadd.f32 %v3874_v63, %v3781_v19  ;;  %v4901_v8 = vpop.f32.mrb[47].mxu1 }
0x1966   :  { %v3967_v38 = vpop.f32.mrb[52].mxu0 }
0x1967   :  { %v3974_v7 = vadd.f32 %v3967_v38, %v3878_v62  ;;  %v4906_v60 = vpop.f32.mrb[53].mxu0 }
0x1968   :  { %v3970_v35 = vpop.f32.mrb[54].mxu0 }
0x1969   :  { %v3980_v6 = vadd.f32 %v3979_v36, %v3974_v7  ;;  %v3975_v50 = vadd.f32 %v3970_v35, %v3879_v22  ;;  %v4907_v11 = vpop.f32.mrb[55].mxu0 }
0x196b   :  { %v3984_v29 = vmul.f32 0.044715, %v3980_v6  ;;  %v3981_v9 = vadd.f32 %v3979_v36, %v3975_v50  ;;  %v3982_v20 = vmul.f32 0.5, %v3980_v6 }
0x196d   :  { %v3986_v5 = vmul.f32 %v3984_v29, %v3980_v6  ;;  %v3985_v61 = vmul.f32 0.044715, %v3981_v9  ;;  %v3983_v24 = vmul.f32 0.5, %v3981_v9 }
0x196f   :  { %v3988_v14 = vmul.f32 %v3986_v5, %v3980_v6  ;;  %v3987_v56 = vmul.f32 %v3985_v61, %v3981_v9 }
0x1971   :  { %v3990_v55 = vadd.f32 %v3988_v14, %v3980_v6  ;;  %v3989_v34 = vmul.f32 %v3987_v56, %v3981_v9 }
0x1973   :  { %v3992_v58 = vmul.f32 0.7978846, %v3990_v55  ;;  %v3991_v43 = vadd.f32 %v3989_v34, %v3981_v9 }
0x1975   :  { %5238 = vtanh.f32 %v3992_v58  ;;  %v3993_v13 = vmul.f32 0.7978846, %v3991_v43 }
0x1977   :  { %5240 = vtanh.f32 %v3993_v13 }
0x1978   :  { %5242 = vrcp.f32 %v4007_v45 }
0x197f   :  { %v5239_v59 = vpop.eup %5238 }
0x1980   :  { %v3996_v41 = vadd.f32 1.0, %v5239_v59  ;;  %v4044_v59 = vrot.slane %v5261_v26, %v7062_v39 }
0x1981   :  { %v5241_v33 = vpop.eup %5240 }
0x1982   :  { %v3997_v42 = vadd.f32 1.0, %v5241_v33  ;;  %v3998_v47 = vmul.f32 %v3996_v41, %v3982_v20  ;;  %v5243_v60 = vpop.eup %5242 }
0x1984   :  { %v3999_v52 = vmul.f32 %v3997_v42, %v3983_v24  ;;  %v4009_v19 = vmul.f32 %v3998_v47, %v6596_v1  ;;  %v4061_v42 = vrot.slane %v5261_v26, %v6157_v57 }
0x1986   :  { %v4010_v16 = vmul.f32 %v3999_v52, %v6601_v53  ;;  %v4011_v62 = vsel %vm403_vm13, %v4009_v19, 0.0 }
0x1988   :  { %v4012_v25 = vsel %vm403_vm13, %v4010_v16, 0.0 }
0x1989   :  { %v4013_v63 = vadd.f32 %v4012_v25, %v4011_v62  ;;  %v7063_v25 = vld [vmem:[#allocation34_spill] sm:$0xff] }
0x198b   :  { %v4014_v12 = vrot.slane %v4013_v63, 4 }
0x198d   :  { %v4015_v36 = vadd.f32 %v4014_v12, %v4013_v63  ;;  %v1195_v63 = vmul.f32 %v6805_v49, %v7063_v25  ;;  %v6809_v12 = vld [vmem:[#allocation8] sm:$0xff] }
0x198f   :  { %v4016_v22 = vrot.slane %v4015_v36, 2  ;;  %vm1278_vm15 = vcmp.gt.f32.partialorder %v1195_v63, 0.0  ;;  %v3199_v63 = vmul.f32 %v6805_v49, %v6601_v53 }
0x1991   :  { %v4017_v8 = vadd.f32 %v4016_v22, %v4015_v36  ;;  %v7064_v36 = vld [vmem:[#allocation36_spill] sm:$0xff]  ;;  %vm3281_vm14 = vcmp.gt.f32.partialorder %v3199_v63, 0.0 }
0x1992   :  { %v1194_v22 = vmul.f32 %v6809_v12, %v7064_v36 }
0x1993   :  { %v4018_v38 = vrot.slane %v4017_v8, 1 }
0x1994   :  { %vm1277_vm3 = vcmp.gt.f32.partialorder %v1194_v22, 0.0 }
0x1995   :  { %v4019_v7 = vadd.f32 %v4018_v38, %v4017_v8  ;;  %v1280_v8 = vsel %vm1278_vm15, 1, %v7046_v17  ;;  %v1279_v38 = vsel %vm1277_vm3, 1, %v7046_v17 }
0x1997   :  { %v4020_v35 = vmul.f32 %v5243_v60, %v4019_v7  ;;  %v7065_v7 = vld [vmem:[#allocation42_spill] sm:$0xff] }
0x1999   :  { %v4021_v6 = vsub.f32 %v3998_v47, %v4020_v35  ;;  %v4022_v50 = vsub.f32 %v3999_v52, %v4020_v35  ;;  %v3201_v35 = vsel %vm1197_vm2, %v6634_v15, 0.0 }
0x199b   :  { %v4023_v11 = vmul.f32 %v4021_v6, %v4021_v6  ;;  %v4024_v29 = vmul.f32 %v4022_v50, %v4022_v50 }
0x199d   :  { %v4025_v9 = vmul.f32 %v4023_v11, %v6596_v1  ;;  %v4026_v0 = vmul.f32 %v4024_v29, %v6601_v53  ;;  %v6828_v11 = vmul.f32 %v6068_v48, %v6630_v23 }
0x199f   :  { %v4027_v5 = vsel %vm403_vm13, %v4025_v9, 0.0  ;;  %v4028_v61 = vsel %vm403_vm13, %v4026_v0, 0.0  ;;  %v4139_v29 = vsel %vm346_vm6, %v6828_v11, 0.0  ;;  %v6832_v9 = vpop.xlane.xlu1 %1199 }
0x19a0   :  { %v4029_v14 = vadd.f32 %v4028_v61, %v4027_v5 }
0x19a2   :  { %v4030_v56 = vrot.slane %v4029_v14, 4 }
0x19a3   :  { %v4056_v15 = vpop.xlane.xlu1 %4055 }
0x19a4   :  { %v4031_v44 = vadd.f32 %v4030_v56, %v4029_v14 }
0x19a6   :  { %v4032_v55 = vrot.slane %v4031_v44, 2 }
0x19a8   :  { %v4033_v34 = vadd.f32 %v4032_v55, %v4031_v44  ;;  %v7066_v55 = vld [vmem:[#allocation37_spill] sm:$0xff] }
0x19aa   :  { %v4034_v58 = vrot.slane %v4033_v34, 1 }
0x19ac   :  { %v4035_v43 = vadd.f32 %v4034_v58, %v4033_v34 }
0x19ae   :  { %v4036_v18 = vmul.f32 %v5243_v60, %v4035_v43  ;;  %v2200_v60 = vsel %vm1197_vm2, %v7065_v7, 0.0  ;;  %v7068_v7 = vld [vmem:[#allocation39_spill] sm:$0xff] }
0x19b0   :  { %v4037_v13 = vadd.f32 1e-05, %v4036_v18 }
0x19b2   :  { %5244 = vrsqrt.f32 %v4037_v13 }
0x19b3   :  { %5246 = vrsqrt.f32 %v4056_v15 }
0x19bc   :  { %v5245_v20 = vpop.eup %5244 }
0x19bd   :  { %v4039_v41 = vmul.f32 %v5245_v20, %v4021_v6  ;;  %v4040_v33 = vmul.f32 %v5245_v20, %v4022_v50  ;;  %v6822_v6 = vmul.f32 %v6065_v37, %v6630_v23  ;;  %v5247_v0 = vpop.eup %5246 }
0x19be   :  { %v4073_v37 = vrot.slane %v5247_v0, %v6157_v57  ;;  %v7067_v57 = vld [vmem:[#allocation35_spill] sm:$0xff] }
0x19bf   :  { %v4045_v24 = vmul.f32 %v4044_v59, %v4039_v41  ;;  %v4046_v47 = vmul.f32 %v4044_v59, %v4040_v33  ;;  %v4136_v50 = vsel %vm346_vm6, %v6822_v6, 0.0 }
0x19c1   :  { %v6797_v52 = vadd.f32 %v4050_v27, %v4045_v24  ;;  %v6799_v51 = vadd.f32 %v4050_v27, %v4046_v47  ;;  %v2198_v47 = vmul.f32 %v6805_v49, %v6361_v54 }
0x19c3   :  { %v4062_v19 = vmul.f32 %v4061_v42, %v6797_v52  ;;  %v4063_v45 = vmul.f32 %v4061_v42, %v6799_v51  ;;  %v2197_v42 = vmul.f32 %v6809_v12, %v6356_v10  ;;  %vm2280_vm12 = vcmp.gt.f32.partialorder %v2198_v47, 0.0 }
0x19c5   :  { %v4064_v16 = vsel %vm403_vm13, %v4062_v19, 0.0  ;;  %v4067_v62 = vsel %vm403_vm13, %v4063_v45, 0.0  ;;  %vm2279_vm11 = vcmp.gt.f32.partialorder %v2197_v42, 0.0  ;;  %v2282_v45 = vsel %vm2280_vm12, 1, %v7046_v17 }
0x19c6   :  { %4065 = vadd.xlane.f32.xlu1 %v4064_v16  ;;  %v2281_v19 = vsel %vm2279_vm11, 1, %v7046_v17  ;;  %v1201_v16 = vmax.f32 %v6832_v9, 1.0 }
0x19ca   :  { %4068 = vadd.xlane.f32.xlu1 %v4067_v62 }
0x19db   :  { %1285 = vperm.xlu1 %5061, %v1280_v8  }
0x19df   :  { %5062 = vset.pattern.permute.xlu1 %v7050_v32 }
0x19e0   :  { %1303 = vperm.xlu1 %5062, %v1279_v38  }
0x19e4   :  { %1306 = vperm.xlu1 %5062, %v1280_v8   ;;  %v6866_v8 = vsel %vm3281_vm14, 1, %v7046_v17 }
0x1a08   :  { %2201 = vadd.xlane.f32.xlu1 %v2200_v60 }
0x1a0c   :  { %3202 = vadd.xlane.f32.xlu1 %v3201_v35  ;;  %v7069_v35 = vld [vmem:[#allocation43_spill] sm:$0xff] }
0x1a10   :  { %4137 = vadd.xlane.f32.xlu1 %v4136_v50 }
0x1a14   :  { %4140 = vadd.xlane.f32.xlu1 %v4139_v29 }
0x1a53   :  { %v4066_v5 = vpop.xlane.xlu1 %4065 }
0x1a54   :  { %v4074_v61 = vmul.f32 %v4073_v37, %v4066_v5 }
0x1a56   :  { %5248 = vtanh.f32 %v4074_v61 }
0x1a57   :  { %v4069_v14 = vpop.xlane.xlu1 %4068 }
0x1a58   :  { %v4075_v56 = vmul.f32 %v4073_v37, %v4069_v14 }
0x1a5a   :  { %5250 = vtanh.f32 %v4075_v56 }
0x1a5b   :  { %v6835_v48 = vpop.permute.xlu1 %1285  ;;  %5252 = vrcp.f32 %v1201_v16 }
0x1a5f   :  { %v1304_v23 = vpop.permute.xlu1 %1303 }
0x1a60   :  { %v6837_v44 = vpop.eup %5248  ;;  %vm1308_vm4 = vcmp.eq.s32.totalorder %v1304_v23, 1 }
0x1a61   :  { %4078 = vxpose.xlu0.b32.start [1/2] (short) (narrow) %v6837_v44, 8  ;;  %v1310_v34 = vsel %vm1308_vm4, %v7066_v55, -1e+30 }
0x1a62   :  { %v1312_v13 = vsel %vm403_vm13, %v1310_v34, -inf }
0x1a63   :  { %v1307_v58 = vpop.permute.xlu1 %1306 }
0x1a64   :  { %v6841_v43 = vpop.eup %5250  ;;  %vm1309_vm7 = vcmp.eq.s32.totalorder %v1307_v58, 1 }
0x1a65   :  { %v1311_v18 = vsel %vm1309_vm7, %v7067_v57, -1e+30  ;;  %4079 = vxpose.xlu0.b32.end [2/2] (short) (narrow) %v6841_v43, 8  ;;  %v5253_v36 = vpop.eup %5252 }
0x1a66   :  { %v1313_v26 = vsel %vm403_vm13, %v1311_v18, -inf  ;;  %v1276_v60 = vmul.f32 %v5253_v36, %v7068_v7  ;;  %v7070_v18 = vld [vmem:[#allocation40_spill] sm:$0xff] }
0x1a67   :  { %v1314_v39 = vmax.f32 %v1312_v13, %v1313_v26 }
0x1a69   :  { %v1315_v59 = vrot.slane %v1314_v39, 4 }
0x1a6b   :  { %v1316_v20 = vmax.f32 %v1314_v39, %v1315_v59 }
0x1a6d   :  { %v1317_v41 = vrot.slane %v1316_v20, 2 }
0x1a6f   :  { %v1318_v27 = vmax.f32 %v1316_v20, %v1317_v41 }
0x1a71   :  { %v1319_v33 = vrot.slane %v1318_v27, 1 }
0x1a73   :  { %v1320_v24 = vmax.f32 %v1318_v27, %v1319_v33 }
0x1a75   :  { %1321 = vst.msk [vmem:[#allocation2 + $0x1] sm:$0x1] %vm1300_vm9, %v1320_v24 }
0x1a8e   :  { %5063 = vset.pattern.permute.xlu0 %v7050_v32 }
0x1a8f   :  { %2304 = vperm.xlu0 %5063, %v2281_v19  }
0x1a93   :  { %2307 = vperm.xlu0 %5063, %v2282_v45  }
0x1a95   :  { %v6856_v62 = vpop.xlane.xlu1 %2201 }
0x1a96   :  { %v2203_v10 = vmax.f32 %v6856_v62, 1.0 }
0x1a97   :  { %5064 = vset.pattern.permute.xlu0 %v7046_v17 }
0x1a98   :  { %5254 = vrcp.f32 %v2203_v10  ;;  %1282 = vperm.xlu0 %5064, %v1279_v38  }
0x1a99   :  { %v6860_v54 = vpop.xlane.xlu1 %3202 }
0x1a9a   :  { %v3204_v25 = vmax.f32 %v6860_v54, 1.0 }
0x1a9c   :  { %5256 = vrcp.f32 %v3204_v25  ;;  %2284 = vperm.xlu0 %5064, %v2281_v19  }
0x1aa0   :  { %2287 = vperm.xlu0 %5064, %v2282_v45  }
0x1aa2   :  { %v5255_v22 = vpop.eup %5254 }
0x1aa3   :  { %v2278_v38 = vmul.f32 %v5255_v22, %v7069_v35 }
0x1aa4   :  { %3288 = vperm.xlu0 %5064, %v6866_v8  }
0x1aa5   :  { %v2329_v50 = vadd.f32 %v2278_v38, %v1276_v60 }
0x1aa6   :  { %v5257_v29 = vpop.eup %5256 }
0x1aa7   :  { %v3279_v15 = vmul.f32 %v5257_v29, %v6682_v28 }
0x1aa9   :  { %v6872_v0 = vadd.f32 %v3279_v15, %v2329_v50 }
0x1ae1   :  { %v4094_v37 = vpop.trf.xlu0 }
0x1ae2   :  { %v4115_v5 = vrot.slane %v4094_v37, %v5857_v21 }
0x1ae4   :  { %vm4116_vm1 = vcmp.gt.f32.partialorder %v4115_v5, %v6837_v44  ;;  %vm4118_vm8 = vcmp.eq.f32.partialorder %v4115_v5, %v6837_v44  ;;  %vm4119_vm15 = vcmp.eq.f32.partialorder %v4115_v5, %v6841_v43  ;;  %vm4117_vm4 = vcmp.gt.f32.partialorder %v4115_v5, %v6841_v43 }
0x1ae5   :  { %vm4120_vm3 = vmand %vm4118_vm8, %vm211_vm10 }
0x1ae6   :  { %vm4122_vm7 = vmor %vm4116_vm1, %vm4120_vm3 }
0x1ae7   :  { %v4552_v28 = vsel %vm4122_vm7, 1.0, %v7043_v31  ;;  %vm4121_vm11 = vmand %vm4119_vm15, %vm212_vm5  ;;  %vm1288_vm5 = vcmp.eq.s32.totalorder %v6835_v48, 1 }
0x1ae8   :  { %v4128_v61 = vmul.f32 %v4552_v28, %v6822_v6  ;;  %vm4123_vm12 = vmor %vm4117_vm4, %vm4121_vm11 }
0x1ae9   :  { %v4553_v14 = vsel %vm4123_vm12, 1.0, %v7043_v31 }
0x1aea   :  { %v4130_v56 = vsel %vm346_vm6, %v4128_v61, 0.0  ;;  %v4129_v23 = vmul.f32 %v4553_v14, %v6828_v11  ;;  %v1290_v11 = vsel %vm1288_vm5, %v7067_v57, -1e+30 }
0x1aeb   :  { %4131 = vadd.xlane.f32.xlu1 %v4130_v56  ;;  %v1292_v41 = vsel %vm403_vm13, %v1290_v11, -inf  ;;  %v4138_v56 = vpop.xlane.xlu1 %4137  ;;  %v4186_v11 = vmul.f32 %v6837_v44, %v6797_v52 }
0x1aec   :  { %v4133_v2 = vsel %vm346_vm6, %v4129_v23, 0.0  ;;  %v4142_v23 = vmul.f32 0.5, %v4138_v56 }
0x1aef   :  { %4134 = vadd.xlane.f32.xlu1 %v4133_v2  ;;  %v4141_v2 = vpop.xlane.xlu1 %4140 }
0x1b0e   :  { %v2305_v34 = vpop.permute.xlu0 %2304 }
0x1b0f   :  { %vm2309_vm10 = vcmp.eq.s32.totalorder %v2305_v34, 1  ;;  %v4144_v34 = vceil.f32 %v4142_v23 }
0x1b10   :  { %v2311_v13 = vsel %vm2309_vm10, %v7070_v18, -1e+30 }
0x1b11   :  { %v2313_v26 = vsel %vm403_vm13, %v2311_v13, -inf }
0x1b12   :  { %v2308_v58 = vpop.permute.xlu0 %2307 }
0x1b13   :  { %vm2310_vm14 = vcmp.eq.s32.totalorder %v2308_v58, 1  ;;  %v4143_v58 = vmul.f32 0.5, %v4141_v2 }
0x1b14   :  { %v2312_v4 = vsel %vm2310_vm14, %v7071_v3, -1e+30 }
0x1b15   :  { %v2314_v6 = vsel %vm403_vm13, %v2312_v4, -inf }
0x1b16   :  { %v2315_v39 = vmax.f32 %v2313_v26, %v2314_v6 }
0x1b17   :  { %v1283_v59 = vpop.permute.xlu0 %1282 }
0x1b18   :  { %vm1287_vm1 = vcmp.eq.s32.totalorder %v1283_v59, 1  ;;  %v2316_v33 = vrot.slane %v2315_v39, 4 }
0x1b19   :  { %v1289_v20 = vsel %vm1287_vm1, %v7066_v55, -1e+30  ;;  %vm2323_vm1 = vcmp.gt.f32.partialorder %v6856_v62, 0.0 }
0x1b1a   :  { %v1291_v27 = vsel %vm403_vm13, %v1289_v20, -inf  ;;  %v2317_v47 = vmax.f32 %v2315_v39, %v2316_v33  ;;  %v4187_v39 = vmul.f32 %v6841_v43, %v6799_v51 }
0x1b1b   :  { %v1293_v24 = vmax.f32 %v1291_v27, %v1292_v41  ;;  %v2285_v48 = vpop.permute.xlu0 %2284 }
0x1b1c   :  { %vm2289_vm8 = vcmp.eq.s32.totalorder %v2285_v48, 1  ;;  %v2318_v63 = vrot.slane %v2317_v47, 2 }
0x1b1d   :  { %v1294_v42 = vrot.slane %v1293_v24, 4  ;;  %v2291_v16 = vsel %vm2289_vm8, %v7070_v18, -1e+30  ;;  %vm1322_vm8 = vcmp.gt.f32.partialorder %v6832_v9, 0.0 }
0x1b1e   :  { %v2293_v55 = vsel %vm403_vm13, %v2291_v16, -inf  ;;  %v2319_v35 = vmax.f32 %v2317_v47, %v2318_v63  ;;  %v4329_v63 = vld [vmem:[#allocation17 + $0x10] sm:$0xff] }
0x1b1f   :  { %v1295_v19 = vmax.f32 %v1293_v24, %v1294_v42  ;;  %v2288_v45 = vpop.permute.xlu0 %2287 }
0x1b20   :  { %vm2290_vm15 = vcmp.eq.s32.totalorder %v2288_v45, 1  ;;  %v2320_v15 = vrot.slane %v2319_v35, 1 }
0x1b21   :  { %v1296_v57 = vrot.slane %v1295_v19, 2  ;;  %v2292_v10 = vsel %vm2290_vm15, %v7071_v3, -1e+30  ;;  %v4145_v3 = vceil.f32 %v4143_v58  ;;  %vm3324_vm15 = vcmp.gt.f32.partialorder %v6860_v54, 0.0 }
0x1b22   :  { %v2294_v25 = vsel %vm403_vm13, %v2292_v10, -inf  ;;  %v2321_v28 = vmax.f32 %v2319_v35, %v2320_v15 }
0x1b23   :  { %v1297_v36 = vmax.f32 %v1295_v19, %v1296_v57  ;;  %v2295_v22 = vmax.f32 %v2293_v55, %v2294_v25  ;;  %v4327_v55 = vld [vmem:[#allocation17] sm:$0xff]  ;;  %v4328_v25 = vld [vmem:[#allocation17 + $0x8] sm:$0xff] }
0x1b25   :  { %v1298_v7 = vrot.slane %v1297_v36, 1  ;;  %v2296_v60 = vrot.slane %v2295_v22, 4 }
0x1b27   :  { %v1299_v38 = vmax.f32 %v1297_v36, %v1298_v7  ;;  %v2297_v50 = vmax.f32 %v2295_v22, %v2296_v60  ;;  %v4332_v22 = vpack.c.bf16 %v4328_v25, %v4327_v55  ;;  %v4330_v7 = vld [vmem:[#allocation17 + $0x18] sm:$0xff] }
0x1b29   :  { %1301 = vst.msk [vmem:[#allocation2] sm:$0x1] %vm1300_vm9, %v1299_v38  ;;  %v2298_v29 = vrot.slane %v2297_v50, 2 }
0x1b2b   :  { %v2299_v37 = vmax.f32 %v2297_v50, %v2298_v29  ;;  %v4333_v29 = vpack.c.bf16 %v4330_v7, %v4329_v63 }
0x1b2d   :  { %v2300_v5 = vrot.slane %v2299_v37, 1 }
0x1b2f   :  { %v2301_v61 = vmax.f32 %v2299_v37, %v2300_v5 }
0x1b30   :  { %v6905_v14 = vld [vmem:[#allocation2] sm:$0x3] }
0x1b31   :  { %2302 = vst.msk [vmem:[#allocation2] sm:$0x1] %vm1300_vm9, %v2301_v61  ;;  %2322 = vst.msk [vmem:[#allocation2 + $0x1] sm:$0x1] %vm1300_vm9, %v2321_v28 }
0x1b78   :  { %v4132_v18 = vpop.xlane.xlu1 %4131 }
0x1b79   :  { %vm4146_vm3 = vcmp.lt.f32.partialorder %v4132_v18, %v4144_v34  ;;  %v2324_v34 = vld [vmem:[#allocation2] sm:$0x3] }
0x1b7a   :  { %v4554_v13 = vsel %vm4146_vm3, 1.0, %v7043_v31 }
0x1b7b   :  { %v4152_v4 = vmul.f32 %v4554_v13, %v6596_v1 }
0x1b7c   :  { %v4135_v6 = vpop.xlane.xlu1 %4134 }
0x1b7d   :  { %vm4147_vm4 = vcmp.lt.f32.partialorder %v4135_v6, %v4145_v3  ;;  %4154 = vxpose.xlu1.b32.start [1/2] (short) (narrow) %v4152_v4, 8  ;;  %v6917_v20 = vmul.f32 %v4186_v11, %v4152_v4  ;;  %v4190_v51 = vmul.f32 %v6809_v12, %v4152_v4  ;;  %v4334_v11 = vld [vmem:[#allocation18] sm:$0xff] }
0x1b7e   :  { %v4555_v26 = vsel %vm4147_vm4, 1.0, %v7043_v31 }
0x1b7f   :  { %v4153_v59 = vmul.f32 %v4555_v26, %v6601_v53  ;;  %v3198_v53 = vmul.f32 %v6809_v12, %v6596_v1  ;;  %vm4276_vm12 = vcmp.gt.f32.partialorder %v4190_v51, 0.0  ;;  %v1326_v51 = vsel %vm1322_vm8, %v6905_v14, 0.0 }
0x1b81   :  { %v6919_v41 = vmul.f32 %v4187_v39, %v4153_v59  ;;  %4155 = vxpose.xlu1.b32.end [2/2] (short) (narrow) %v4153_v59, 8  ;;  %v4191_v27 = vmul.f32 %v6805_v49, %v4153_v59  ;;  %vm3280_vm11 = vcmp.gt.f32.partialorder %v3198_v53, 0.0  ;;  %v4278_v49 = vsel %vm4276_vm12, 1, %v7046_v17  ;;  %v4335_v39 = vld [vmem:[#allocation18 + $0x8] sm:$0xff] }
0x1b82   :  { %v3282_v52 = vsel %vm3280_vm11, 1, %v7046_v17  ;;  %v2327_v53 = vsel %vm2323_vm1, %v2324_v34, 0.0 }
0x1b83   :  { %vm4277_vm7 = vcmp.gt.f32.partialorder %v4191_v27, 0.0  ;;  %v5005_v33 = vpack.c.bf16 %v6919_v41, %v6917_v20  ;;  %v4339_v27 = vpack.c.bf16 %v4335_v39, %v4334_v11 }
0x1b84   :  { %v4279_v24 = vsel %vm4277_vm7, 1, %v7046_v17 }
0x1b85   :  { %4284 = vperm.xlu0 %5064, %v4279_v24   ;;  %5006 = vmatpush3.bf16.msra.mxu1 %v5005_v33 }
0x1b86   :  { %4923 = vmatprep.subr.bf16.mxu1 %v7043_v31  ;;  %4916 = vmatpush3.bf16.msra.mxu0 %v4339_v27 }
0x1b87   :  { %4917 = vmatprep.subr.bf16.mxu0 %v7043_v31 }
0x1b89   :  { %5068 = vset.pattern.permute.xlu0 %v7050_v32 }
0x1b9f   :  { %5065 = vset.pattern.permute.xlu1 %v7046_v17 }
0x1ba0   :  { %3285 = vperm.xlu1 %5065, %v3282_v52  }
0x1ba4   :  { %5066 = vset.pattern.permute.xlu1 %v7050_v32 }
0x1ba5   :  { %3305 = vperm.xlu1 %5066, %v3282_v52  }
0x1ba9   :  { %3308 = vperm.xlu1 %5066, %v6866_v8   ;;  %v3289_v8 = vpop.permute.xlu0 %3288 }
0x1baa   :  { %vm3291_vm10 = vcmp.eq.s32.totalorder %v3289_v8, 1  ;;  %v4337_v8 = vld [vmem:[#allocation18 + $0x18] sm:$0xff] }
0x1bad   :  { %5067 = vset.pattern.permute.xlu1 %v7046_v17  ;;  %v3293_v17 = vsel %vm3291_vm10, %v6610_v40, -1e+30 }
0x1bae   :  { %4281 = vperm.xlu1 %5067, %v4278_v49  }
0x1bb2   :  { %5069 = vset.pattern.permute.xlu1 %v7050_v32 }
0x1bb3   :  { %4304 = vperm.xlu1 %5069, %v4279_v24  }
0x1bfd   :  { %v4170_v1 = vpop.trf.xlu1 }
0x1bfe   :  { %v4195_v44 = vrot.slane %v4170_v1, %v5857_v21  ;;  %v3295_v21 = vsel %vm403_vm13, %v3293_v17, -inf }
0x1c00   :  { %v4196_v43 = vmul.f32 %v4195_v44, %v6132_v46 }
0x1c02   :  { %4913 = vmatmul.mubr.msk.f32.vlgmr.msra.gmra.mrb[38].mxu1 %vm346_vm6, %v4196_v43  ;;  %v4197_v12 = vsel %vm1197_vm2, %v4196_v43, 0.0 }
0x1c03   :  { %4198 = vadd.xlane.f32.xlu0 %v4197_v12  ;;  %4927 = vmatprep.mubr.msk.bf16.mxu1 %vm5558_vm0, %v7043_v31  ;;  %v4336_v12 = vld [vmem:[#allocation18 + $0x10] sm:$0xff] }
0x1c04   :  { %v4285_v16 = vpop.permute.xlu0 %4284  ;;  %4924 = vmatpush3.bf16.msra.mxu1 %v4332_v22 }
0x1c05   :  { %vm4287_vm2 = vcmp.eq.s32.totalorder %v4285_v16, 1  ;;  %4925 = vmatprep.subr.bf16.mxu1 %v7043_v31  ;;  %v4340_v31 = vpack.c.bf16 %v4337_v8, %v4336_v12 }
0x1c07   :  { %4918 = vmatpush3.bf16.msra.mxu0 %v4340_v31 }
0x1c08   :  { %4926 = vmatpush3.bf16.msra.mxu1 %v4333_v29 }
0x1c19   :  { %4301 = vperm.xlu0 %5068, %v4278_v49   ;;  %v2328_v49 = vadd.f32 %v2327_v53, %v1326_v51 }
0x1c1f   :  { %v3286_v32 = vpop.permute.xlu1 %3285 }
0x1c20   :  { %vm3290_vm14 = vcmp.eq.s32.totalorder %v3286_v32, 1 }
0x1c21   :  { %v3292_v48 = vsel %vm3290_vm14, %v6607_v30, -1e+30 }
0x1c22   :  { %v3294_v46 = vsel %vm403_vm13, %v3292_v48, -inf }
0x1c23   :  { %v3296_v42 = vmax.f32 %v3294_v46, %v3295_v21 }
0x1c24   :  { %v3306_v47 = vpop.permute.xlu1 %3305 }
0x1c25   :  { %v3297_v19 = vrot.slane %v3296_v42, 4  ;;  %vm3310_vm6 = vcmp.eq.s32.totalorder %v3306_v47, 1 }
0x1c26   :  { %v3312_v57 = vsel %vm3310_vm6, %v6607_v30, -1e+30  ;;  %v4289_v30 = vsel %vm4287_vm2, %v6919_v41, -1e+30 }
0x1c27   :  { %v3298_v45 = vmax.f32 %v3296_v42, %v3297_v19  ;;  %v3314_v38 = vsel %vm403_vm13, %v3312_v57, -inf }
0x1c28   :  { %v3309_v10 = vpop.permute.xlu1 %3308 }
0x1c29   :  { %v3299_v36 = vrot.slane %v3298_v45, 2  ;;  %vm3311_vm0 = vcmp.eq.s32.totalorder %v3309_v10, 1 }
0x1c2a   :  { %v3313_v60 = vsel %vm3311_vm0, %v6610_v40, -1e+30  ;;  %v4291_v40 = vsel %vm403_vm13, %v4289_v30, -inf  ;;  %v4559_v30 = vld [vmem:[#allocation20] ss:$0 sm:$0xff] }
0x1c2b   :  { %v3300_v35 = vmax.f32 %v3298_v45, %v3299_v36  ;;  %v3315_v50 = vsel %vm403_vm13, %v3313_v60, -inf }
0x1c2c   :  { %v3316_v15 = vmax.f32 %v3314_v38, %v3315_v50 }
0x1c2d   :  { %v3301_v37 = vrot.slane %v3300_v35, 1  ;;  %v4282_v5 = vpop.permute.xlu1 %4281 }
0x1c2e   :  { %v3317_v28 = vrot.slane %v3316_v15, 4  ;;  %vm4286_vm5 = vcmp.eq.s32.totalorder %v4282_v5, 1 }
0x1c2f   :  { %v3302_v61 = vmax.f32 %v3300_v35, %v3301_v37  ;;  %v4288_v56 = vsel %vm4286_vm5, %v6917_v20, -1e+30 }
0x1c30   :  { %v3318_v23 = vmax.f32 %v3316_v15, %v3317_v28  ;;  %v4290_v2 = vsel %vm403_vm13, %v4288_v56, -inf }
0x1c31   :  { %v4292_v58 = vmax.f32 %v4290_v2, %v4291_v40  ;;  %3303 = vst.msk [vmem:[#allocation2] sm:$0x1] %vm1300_vm9, %v3302_v61 }
0x1c32   :  { %v3319_v18 = vrot.slane %v3318_v23, 2  ;;  %v4305_v17 = vpop.permute.xlu1 %4304 }
0x1c33   :  { %v4293_v13 = vrot.slane %v4292_v58, 4  ;;  %vm4307_vm3 = vcmp.eq.s32.totalorder %v4305_v17, 1 }
0x1c34   :  { %v3320_v3 = vmax.f32 %v3318_v23, %v3319_v18  ;;  %v4309_v9 = vsel %vm4307_vm3, %v6919_v41, -1e+30 }
0x1c35   :  { %v4294_v4 = vmax.f32 %v4292_v58, %v4293_v13  ;;  %v4311_v54 = vsel %vm403_vm13, %v4309_v9, -inf }
0x1c36   :  { %v3321_v6 = vrot.slane %v3320_v3, 1 }
0x1c37   :  { %v4295_v26 = vrot.slane %v4294_v4, 2 }
0x1c38   :  { %v3322_v59 = vmax.f32 %v3320_v3, %v3321_v6 }
0x1c39   :  { %v4296_v33 = vmax.f32 %v4294_v4, %v4295_v26 }
0x1c3a   :  { %3323 = vst.msk [vmem:[#allocation2 + $0x1] sm:$0x1] %vm1300_vm9, %v3322_v59 }
0x1c3b   :  { %v4297_v24 = vrot.slane %v4296_v33, 1 }
0x1c3d   :  { %v4298_v52 = vmax.f32 %v4296_v33, %v4297_v24 }
0x1c41   :  { %v3325_v1 = vld [vmem:[#allocation2] sm:$0x3] }
0x1c42   :  { %v3328_v44 = vsel %vm3324_vm15, %v3325_v1, 0.0  ;;  %4299 = vst.msk [vmem:[#allocation2] sm:$0x1] %vm1300_vm9, %v4298_v52 }
0x1c43   :  { %v3329_v43 = vadd.f32 %v3328_v44, %v2328_v49 }
0x1c90   :  { %v4199_v62 = vpop.xlane.xlu0 %4198 }
0x1c91   :  { %vm4320_vm7 = vcmp.gt.f32.partialorder %v4199_v62, 0.0 }
0x1c98   :  { %v4302_v32 = vpop.permute.xlu0 %4301 }
0x1c99   :  { %vm4306_vm4 = vcmp.eq.s32.totalorder %v4302_v32, 1 }
0x1c9a   :  { %v4308_v14 = vsel %vm4306_vm4, %v6917_v20, -1e+30  ;;  %v4200_v20 = vmax.f32 %v4199_v62, 1.0 }
0x1c9b   :  { %v4310_v48 = vsel %vm403_vm13, %v4308_v14, -inf }
0x1c9c   :  { %v4312_v21 = vmax.f32 %v4310_v48, %v4311_v54  ;;  %5258 = vrcp.f32 %v4200_v20 }
0x1c9e   :  { %v4313_v46 = vrot.slane %v4312_v21, 4 }
0x1ca0   :  { %v4314_v42 = vmax.f32 %v4312_v21, %v4313_v46 }
0x1ca2   :  { %v4315_v47 = vrot.slane %v4314_v42, 2 }
0x1ca4   :  { %v4316_v19 = vmax.f32 %v4314_v42, %v4315_v47 }
0x1ca6   :  { %v4317_v16 = vrot.slane %v4316_v19, 1  ;;  %v5259_v25 = vpop.eup %5258 }
0x1ca8   :  { %v4318_v45 = vmax.f32 %v4316_v19, %v4317_v16 }
0x1caa   :  { %4319 = vst.msk [vmem:[#allocation2 + $0x1] sm:$0x1] %vm1300_vm9, %v4318_v45  ;;  %vm4435_vm9 = vcmask 254976  }
0x1cb1   :  { %v4321_v57 = vld [vmem:[#allocation2] sm:$0x3] }
0x1cb2   :  { %v4324_v41 = vsel %vm4320_vm7, %v4321_v57, 0.0 }
0x1cb3   :  { %v4325_v10 = vadd.f32 %v4324_v41, %v3329_v43 }
0x1cb5   :  { %v4331_v55 = vpack.c.bf16 %v4325_v10, %v4325_v10 }
0x1cb7   :  { %4928 = vmatmul.mubr.msk.bf16.vlgmr.msra.gmra.mrb[48].mxu1 %vm403_vm13, %v4331_v55 }
0x1cd5   :  { %v4271_v63 = vpop.f32.mrb[38].mxu1 }
0x1cd6   :  { %v4275_v36 = vmul.f32 %v5259_v25, %v4271_v63  ;;  %v4914_v22 = vpop.f32.mrb[39].mxu1 }
0x1cd8   :  { %v4326_v7 = vadd.f32 %v4275_v36, %v6872_v0 }
0x1cda   :  { %v4338_v60 = vpack.c.bf16 %v4326_v7, %v4326_v7 }
0x1cdc   :  { %4920 = vmatmul.mubr.msk.bf16.vlgmr.msra.gmra.mrb[56].mxu0 %vm403_vm13, %v4338_v60 }
0x1d8a   :  { %v4421_v35 = vpop.f32.mrb[48].mxu1 }
0x1d8b   :  { %v4929_v38 = vpop.f32.mrb[49].mxu1 }
0x1d8c   :  { %v4424_v50 = vpop.f32.mrb[50].mxu1 }
0x1d8d   :  { %v4930_v29 = vpop.f32.mrb[51].mxu1 }
0x1daf   :  { %v4378_v15 = vpop.f32.mrb[56].mxu0 }
0x1db0   :  { %v4422_v37 = vadd.f32 %v4421_v35, %v4378_v15  ;;  %v4921_v5 = vpop.f32.mrb[57].mxu0 }
0x1db1   :  { %v4381_v28 = vpop.f32.mrb[58].mxu0 }
0x1db2   :  { %v4434_v61 = vadd.f32 %v4559_v30, %v4422_v37  ;;  %v4922_v56 = vpop.f32.mrb[59].mxu0 }
0x1db4   :  { %4436 = vst.msk [vmem:[#allocation21] sm:$0x3] %vm4435_vm9, %v4434_v61 }
0x1db5   :  { %5517 = shalt.err (!%p5514_p8)
}
0x1db6   :  { %s5518_s13 = scalar_lea.hbm %s6995_s11, 32 }
0x1db7   :  { %p5519_p9 = scmp.ne.s32.totalorder %s6995_s11, %s5518_s13  ;;  %p5522_p10 = scmp.lt.u32.totalorder %s5518_s13, %s6995_s11 }
0x1db9   :  { %p5524_p11 = pnand %p5522_p10, %p5519_p9 }
0x1dbb   :  { %5527 = shalt.err (!%p5524_p11)
}
0x1dbc   :  { %4446 = dma.vmem_to_hbm [thread:$0]  %s4444_s19, 32, %s6995_s11, [#allocation5]  }
0x1dbd   :  { %5540 = dma.done.wait [#allocation5], 32  }
0x1dbe   :  { %5541 = vsyncadd [#allocation5], 4294967264 }
0x1dbf   :  { %4450 = vsyncpa [#allocation4], 1 }
0x1dc0   :  { %4451 = vsyncpa [#allocation7], 1 }
0x1dc1   :  { %4452 = vsyncpa [#allocation10], 1 }
0x1dc2   :  { %4453 = vsyncpa [#allocation13], 1 }
0x1dc3   :  { %4454 = vsyncpa [#allocation16], 1 }
0x1dc4   :  { %4455 = vsyncpa [#allocation19], 1 }
0x1dc5   :  { %4456 = vsyncpa [#allocation5], 1 }

</bundles_post_ra>
